<compile_context>
chip_gen: v7x
topology: tpu7x:2x2x1
jax: 0.10.0
libtpu: 0.0.40
codegen_flags: <defaults>
</compile_context>

<pallas_src>
import functools
import math

import jax
import jax.numpy as jnp
import numpy as np
from jax import lax
from jax.experimental import pallas as pl
from jax.experimental.pallas import tpu as pltpu


def _row_reduce(a, fn):
    """Reduce a (bb, rows, lanes) tile to (bb, 1, 1): one value per batch row."""
    return fn(fn(a, axis=1, keepdims=True), axis=2, keepdims=True)


def _ash_s_kernel(x_ref, o_ref, *, k_lo, k_hi, frac, n_valid, n_pad):
    x = x_ref[...].astype(jnp.float32)            # (bb, rows, 128)
    bb, rows, lanes = x.shape

    # IEEE-754 order-preserving int32 key: flip magnitude bits for negatives.
    xi = pltpu.bitcast(x, jnp.int32)
    key = jnp.where(xi < 0, xi ^ jnp.int32(0x7FFFFFFF), xi)

    if n_valid != n_pad:
        # Zero-padded tail: push its keys to +max so it never holds rank <= k_hi.
        r = lax.broadcasted_iota(jnp.int32, (bb, rows, lanes), 1)
        c = lax.broadcasted_iota(jnp.int32, (bb, rows, lanes), 2)
        valid = (r * lanes + c) < n_valid
        key = jnp.where(valid, key, jnp.int32(2147483647))
    else:
        valid = None

    def count_lt(trial):                          # per-row #{key < trial}, int32
        return _row_reduce((key < trial).astype(jnp.int32), jnp.sum)

    # Bitwise radix select of sorted[k_lo]:
    #   cand = max int32 value v such that #{key < v} <= k_lo  ==  key(sorted[k_lo]).
    k = jnp.int32(k_lo)
    cand = jnp.where(count_lt(jnp.int32(0)) <= k,
                     jnp.int32(0), jnp.int32(-2147483648))       # sign bit
    for b in range(30, -1, -1):                                  # static unroll
        trial = cand | jnp.int32(1 << b)
        cand = jnp.where(count_lt(trial) <= k, trial, cand)

    # Recover sorted[k_lo] as a float with a masked max (key == cand is achieved).
    v_lo = _row_reduce(jnp.where(key == cand, x, -jnp.inf), jnp.max)

    if frac != 0.0:
        # sorted[k_hi] is either a tie with v_lo or the smallest element > v_lo.
        c_le = _row_reduce((key <= cand).astype(jnp.int32), jnp.sum)
        gt = key > cand
        if valid is not None:
            gt = jnp.logical_and(gt, valid)
        min_gt = _row_reduce(jnp.where(gt, x, jnp.inf), jnp.min)
        v_hi = jnp.where(c_le >= jnp.int32(k_hi + 1), v_lo, min_gt)
        thr = v_lo + jnp.float32(frac) * (v_hi - v_lo)           # 'linear' interp
    else:
        thr = v_lo

    # ASH-S: prune below the percentile, rescale by exp(sum_1 / sum_2).
    # (Padded positions are zero, so they contribute nothing to either sum.)
    sum_1 = _row_reduce(x, jnp.sum)
    pruned = jnp.where(x > thr, x, jnp.zeros_like(x))
    sum_2 = _row_reduce(pruned, jnp.sum)
    ratio = jnp.exp(sum_1 / (sum_2 + jnp.float32(1e-6)))
    o_ref[...] = (pruned * ratio).astype(o_ref.dtype)


def activation_shaping_s(x, pruning_level):
    b, s, h = x.shape
    n = s * h
    assert 0.0 <= pruning_level <= 1.0

    # torch.quantile 'linear' interpolation constants (static at trace time).
    pos = pruning_level * (n - 1)
    k_lo = int(math.floor(pos))
    frac = float(pos - k_lo)
    k_hi = k_lo + 1 if frac > 0.0 else k_lo

    lanes = 128
    n_pad = -(-n // 1024) * 1024          # multiple of 8*128 -> dense f32 vregs
    rows = n_pad // lanes

    x_flat = x.reshape(b, n)
    if n_pad != n:
        x_flat = jnp.pad(x_flat, ((0, 0), (0, n_pad - n)))
    x3 = x_flat.reshape(b, rows, lanes)

    # Batch rows per grid step: fill sublanes / amortize per-step overhead while
    # keeping the (double-buffered) blocks comfortably inside scoped VMEM.
    bb = max(1, min(b, 8, (4 << 20) // (n_pad * 4)))
    b_pad = -(-b // bb) * bb
    if b_pad != b:
        x3 = jnp.pad(x3, ((0, b_pad - b), (0, 0), (0, 0)))

    params = {"dimension_semantics": ("parallel",)}
    est_vmem = 8 * bb * n_pad * 4         # in/out double buffers + key/pruned temps
    if est_vmem > (16 << 20):
        params["vmem_limit_bytes"] = int(min(est_vmem, 64 << 20))

    kernel = functools.partial(_ash_s_kernel, k_lo=k_lo, k_hi=k_hi, frac=frac,
                               n_valid=n, n_pad=n_pad)
    out = pl.pallas_call(
        kernel,
        out_shape=jax.ShapeDtypeStruct((b_pad, rows, lanes), x.dtype),
        grid=(b_pad // bb,),
        in_specs=[pl.BlockSpec((bb, rows, lanes), lambda i: (i, 0, 0))],
        out_specs=pl.BlockSpec((bb, rows, lanes), lambda i: (i, 0, 0)),
        compiler_params=pltpu.CompilerParams(**params),
    )(x3)
    return out[:b].reshape(b, n_pad)[:, :n].reshape(b, s, h)


def _reference(x, pruning_level):
    # pure-JAX reference mirroring the PyTorch forward
    b, s, h = x.shape
    flat = x.reshape(b, -1)
    sum_1 = jnp.sum(flat, axis=1)
    perc = jnp.quantile(flat, pruning_level, axis=-1)[:, None, None]
    x_with_zeros = jnp.where(x > perc, x, jnp.zeros_like(x))
    sum_2 = jnp.sum(x_with_zeros.reshape(b, -1), axis=1)
    exp_ratio = jnp.exp(sum_1 / (sum_2 + 1e-6))[:, None, None]
    return x_with_zeros * exp_ratio


if __name__ == "__main__":
    pruning_level = 0.65           # module "parameter" (deterministic, in-script)
    key = jax.random.PRNGKey(0)
    B, S, H = 2, 8, 32             # (batch, seq, hidden)
    x = jax.random.uniform(key, (B, S, H), dtype=jnp.float32)

    out = activation_shaping_s(x, pruning_level)
    out = jax.block_until_ready(out)

    ref = _reference(x, pruning_level)
    np.testing.assert_allclose(np.asarray(out), np.asarray(ref),
                               rtol=1e-4, atol=1e-5)
    print("KERNEL_OK")
</pallas_src>

<mosaic_0001>
module attributes {stable_mosaic.version = 11 : i64} {
  func.func @_ash_s_kernel(%arg0: i32, %arg1: memref<2x8x128xf32, #tpu.memory_space<vmem>>, %arg2: memref<2x8x128xf32, #tpu.memory_space<vmem>>) attributes {dimension_semantics = [#tpu.dimension_semantics<parallel>], iteration_bounds = array<i64: 1>, scalar_prefetch = 0 : i64, scratch_operands = 0 : i64, tpu.core_type = #tpu.core_type<tc>, window_params = [{transform_indices = @transform_0, window_bounds = array<i64: 2, 8, 128>}, {transform_indices = @transform_1, window_bounds = array<i64: 2, 8, 128>}]} {
    %c0 = arith.constant 0 : index
    %c0_0 = arith.constant 0 : index
    %c0_1 = arith.constant 0 : index
    %0 = vector.load %arg1[%c0, %c0_0, %c0_1] : memref<2x8x128xf32, #tpu.memory_space<vmem>>, vector<2x8x128xf32>
    %1 = tpu.bitcast %0 : vector<2x8x128xf32> -> vector<2x8x128xi32>
    %c0_i32 = arith.constant 0 : i32
    %2 = vector.broadcast %c0_i32 : i32 to vector<2x8x128xi32>
    %3 = arith.cmpi slt, %1, %2 : vector<2x8x128xi32>
    %c2147483647_i32 = arith.constant 2147483647 : i32
    %4 = vector.broadcast %c2147483647_i32 : i32 to vector<2x8x128xi32>
    %5 = arith.xori %1, %4 : vector<2x8x128xi32>
    %6 = arith.select %3, %5, %1 : vector<2x8x128xi1>, vector<2x8x128xi32>
    %7 = tpu.iota {dimensions = array<i32: 1>} : vector<2x8x128xi32>
    %8 = tpu.iota {dimensions = array<i32: 2>} : vector<2x8x128xi32>
    %c128_i32 = arith.constant 128 : i32
    %9 = vector.broadcast %c128_i32 : i32 to vector<2x8x128xi32>
    %10 = arith.muli %7, %9 : vector<2x8x128xi32>
    %11 = arith.addi %10, %8 : vector<2x8x128xi32>
    %c256_i32 = arith.constant 256 : i32
    %12 = vector.broadcast %c256_i32 : i32 to vector<2x8x128xi32>
    %13 = arith.cmpi slt, %11, %12 : vector<2x8x128xi32>
    %c2147483647_i32_2 = arith.constant 2147483647 : i32
    %14 = vector.broadcast %c2147483647_i32_2 : i32 to vector<2x8x128xi32>
    %15 = arith.select %13, %6, %14 : vector<2x8x128xi1>, vector<2x8x128xi32>
    %c0_i32_3 = arith.constant 0 : i32
    %16 = vector.broadcast %c0_i32_3 : i32 to vector<2x8x128xi32>
    %17 = arith.cmpi slt, %15, %16 : vector<2x8x128xi32>
    %18 = arith.extui %17 : vector<2x8x128xi1> to vector<2x8x128xi32>
    %cst = arith.constant dense<0> : vector<2x128xi32>
    %19 = vector.multi_reduction <add>, %18, %cst [1] : vector<2x8x128xi32> to vector<2x128xi32>
    %20 = vector.shape_cast %19 : vector<2x128xi32> to vector<2x1x128xi32>
    %cst_4 = arith.constant dense<0> : vector<2x1xi32>
    %21 = vector.multi_reduction <add>, %20, %cst_4 [2] : vector<2x1x128xi32> to vector<2x1xi32>
    %22 = vector.shape_cast %21 : vector<2x1xi32> to vector<2x1x1xi32>
    %c165_i32 = arith.constant 165 : i32
    %23 = vector.broadcast %c165_i32 : i32 to vector<2x1x1xi32>
    %24 = arith.cmpi sle, %22, %23 : vector<2x1x1xi32>
    %c0_i32_5 = arith.constant 0 : i32
    %c-2147483648_i32 = arith.constant -2147483648 : i32
    %25 = vector.broadcast %c0_i32_5 : i32 to vector<2x1x1xi32>
    %26 = vector.broadcast %c-2147483648_i32 : i32 to vector<2x1x1xi32>
    %27 = arith.select %24, %25, %26 : vector<2x1x1xi1>, vector<2x1x1xi32>
    %c1073741824_i32 = arith.constant 1073741824 : i32
    %28 = vector.broadcast %c1073741824_i32 : i32 to vector<2x1x1xi32>
    %29 = arith.ori %27, %28 : vector<2x1x1xi32>
    %30 = vector.broadcast %29 : vector<2x1x1xi32> to vector<2x8x128xi32>
    %31 = arith.cmpi slt, %15, %30 : vector<2x8x128xi32>
    %32 = arith.extui %31 : vector<2x8x128xi1> to vector<2x8x128xi32>
    %cst_6 = arith.constant dense<0> : vector<2x128xi32>
    %33 = vector.multi_reduction <add>, %32, %cst_6 [1] : vector<2x8x128xi32> to vector<2x128xi32>
    %34 = vector.shape_cast %33 : vector<2x128xi32> to vector<2x1x128xi32>
    %cst_7 = arith.constant dense<0> : vector<2x1xi32>
    %35 = vector.multi_reduction <add>, %34, %cst_7 [2] : vector<2x1x128xi32> to vector<2x1xi32>
    %36 = vector.shape_cast %35 : vector<2x1xi32> to vector<2x1x1xi32>
    %c165_i32_8 = arith.constant 165 : i32
    %37 = vector.broadcast %c165_i32_8 : i32 to vector<2x1x1xi32>
    %38 = arith.cmpi sle, %36, %37 : vector<2x1x1xi32>
    %39 = arith.select %38, %29, %27 : vector<2x1x1xi1>, vector<2x1x1xi32>
    %c536870912_i32 = arith.constant 536870912 : i32
    %40 = vector.broadcast %c536870912_i32 : i32 to vector<2x1x1xi32>
    %41 = arith.ori %39, %40 : vector<2x1x1xi32>
    %42 = vector.broadcast %41 : vector<2x1x1xi32> to vector<2x8x128xi32>
    %43 = arith.cmpi slt, %15, %42 : vector<2x8x128xi32>
    %44 = arith.extui %43 : vector<2x8x128xi1> to vector<2x8x128xi32>
    %cst_9 = arith.constant dense<0> : vector<2x128xi32>
    %45 = vector.multi_reduction <add>, %44, %cst_9 [1] : vector<2x8x128xi32> to vector<2x128xi32>
    %46 = vector.shape_cast %45 : vector<2x128xi32> to vector<2x1x128xi32>
    %cst_10 = arith.constant dense<0> : vector<2x1xi32>
    %47 = vector.multi_reduction <add>, %46, %cst_10 [2] : vector<2x1x128xi32> to vector<2x1xi32>
    %48 = vector.shape_cast %47 : vector<2x1xi32> to vector<2x1x1xi32>
    %c165_i32_11 = arith.constant 165 : i32
    %49 = vector.broadcast %c165_i32_11 : i32 to vector<2x1x1xi32>
    %50 = arith.cmpi sle, %48, %49 : vector<2x1x1xi32>
    %51 = arith.select %50, %41, %39 : vector<2x1x1xi1>, vector<2x1x1xi32>
    %c268435456_i32 = arith.constant 268435456 : i32
    %52 = vector.broadcast %c268435456_i32 : i32 to vector<2x1x1xi32>
    %53 = arith.ori %51, %52 : vector<2x1x1xi32>
    %54 = vector.broadcast %53 : vector<2x1x1xi32> to vector<2x8x128xi32>
    %55 = arith.cmpi slt, %15, %54 : vector<2x8x128xi32>
    %56 = arith.extui %55 : vector<2x8x128xi1> to vector<2x8x128xi32>
    %cst_12 = arith.constant dense<0> : vector<2x128xi32>
    %57 = vector.multi_reduction <add>, %56, %cst_12 [1] : vector<2x8x128xi32> to vector<2x128xi32>
    %58 = vector.shape_cast %57 : vector<2x128xi32> to vector<2x1x128xi32>
    %cst_13 = arith.constant dense<0> : vector<2x1xi32>
    %59 = vector.multi_reduction <add>, %58, %cst_13 [2] : vector<2x1x128xi32> to vector<2x1xi32>
    %60 = vector.shape_cast %59 : vector<2x1xi32> to vector<2x1x1xi32>
    %c165_i32_14 = arith.constant 165 : i32
    %61 = vector.broadcast %c165_i32_14 : i32 to vector<2x1x1xi32>
    %62 = arith.cmpi sle, %60, %61 : vector<2x1x1xi32>
    %63 = arith.select %62, %53, %51 : vector<2x1x1xi1>, vector<2x1x1xi32>
    %c134217728_i32 = arith.constant 134217728 : i32
    %64 = vector.broadcast %c134217728_i32 : i32 to vector<2x1x1xi32>
    %65 = arith.ori %63, %64 : vector<2x1x1xi32>
    %66 = vector.broadcast %65 : vector<2x1x1xi32> to vector<2x8x128xi32>
    %67 = arith.cmpi slt, %15, %66 : vector<2x8x128xi32>
    %68 = arith.extui %67 : vector<2x8x128xi1> to vector<2x8x128xi32>
    %cst_15 = arith.constant dense<0> : vector<2x128xi32>
    %69 = vector.multi_reduction <add>, %68, %cst_15 [1] : vector<2x8x128xi32> to vector<2x128xi32>
    %70 = vector.shape_cast %69 : vector<2x128xi32> to vector<2x1x128xi32>
    %cst_16 = arith.constant dense<0> : vector<2x1xi32>
    %71 = vector.multi_reduction <add>, %70, %cst_16 [2] : vector<2x1x128xi32> to vector<2x1xi32>
    %72 = vector.shape_cast %71 : vector<2x1xi32> to vector<2x1x1xi32>
    %c165_i32_17 = arith.constant 165 : i32
    %73 = vector.broadcast %c165_i32_17 : i32 to vector<2x1x1xi32>
    %74 = arith.cmpi sle, %72, %73 : vector<2x1x1xi32>
    %75 = arith.select %74, %65, %63 : vector<2x1x1xi1>, vector<2x1x1xi32>
    %c67108864_i32 = arith.constant 67108864 : i32
    %76 = vector.broadcast %c67108864_i32 : i32 to vector<2x1x1xi32>
    %77 = arith.ori %75, %76 : vector<2x1x1xi32>
    %78 = vector.broadcast %77 : vector<2x1x1xi32> to vector<2x8x128xi32>
    %79 = arith.cmpi slt, %15, %78 : vector<2x8x128xi32>
    %80 = arith.extui %79 : vector<2x8x128xi1> to vector<2x8x128xi32>
    %cst_18 = arith.constant dense<0> : vector<2x128xi32>
    %81 = vector.multi_reduction <add>, %80, %cst_18 [1] : vector<2x8x128xi32> to vector<2x128xi32>
    %82 = vector.shape_cast %81 : vector<2x128xi32> to vector<2x1x128xi32>
    %cst_19 = arith.constant dense<0> : vector<2x1xi32>
    %83 = vector.multi_reduction <add>, %82, %cst_19 [2] : vector<2x1x128xi32> to vector<2x1xi32>
    %84 = vector.shape_cast %83 : vector<2x1xi32> to vector<2x1x1xi32>
    %c165_i32_20 = arith.constant 165 : i32
    %85 = vector.broadcast %c165_i32_20 : i32 to vector<2x1x1xi32>
    %86 = arith.cmpi sle, %84, %85 : vector<2x1x1xi32>
    %87 = arith.select %86, %77, %75 : vector<2x1x1xi1>, vector<2x1x1xi32>
    %c33554432_i32 = arith.constant 33554432 : i32
    %88 = vector.broadcast %c33554432_i32 : i32 to vector<2x1x1xi32>
    %89 = arith.ori %87, %88 : vector<2x1x1xi32>
    %90 = vector.broadcast %89 : vector<2x1x1xi32> to vector<2x8x128xi32>
    %91 = arith.cmpi slt, %15, %90 : vector<2x8x128xi32>
    %92 = arith.extui %91 : vector<2x8x128xi1> to vector<2x8x128xi32>
    %cst_21 = arith.constant dense<0> : vector<2x128xi32>
    %93 = vector.multi_reduction <add>, %92, %cst_21 [1] : vector<2x8x128xi32> to vector<2x128xi32>
    %94 = vector.shape_cast %93 : vector<2x128xi32> to vector<2x1x128xi32>
    %cst_22 = arith.constant dense<0> : vector<2x1xi32>
    %95 = vector.multi_reduction <add>, %94, %cst_22 [2] : vector<2x1x128xi32> to vector<2x1xi32>
    %96 = vector.shape_cast %95 : vector<2x1xi32> to vector<2x1x1xi32>
    %c165_i32_23 = arith.constant 165 : i32
    %97 = vector.broadcast %c165_i32_23 : i32 to vector<2x1x1xi32>
    %98 = arith.cmpi sle, %96, %97 : vector<2x1x1xi32>
    %99 = arith.select %98, %89, %87 : vector<2x1x1xi1>, vector<2x1x1xi32>
    %c16777216_i32 = arith.constant 16777216 : i32
    %100 = vector.broadcast %c16777216_i32 : i32 to vector<2x1x1xi32>
    %101 = arith.ori %99, %100 : vector<2x1x1xi32>
    %102 = vector.broadcast %101 : vector<2x1x1xi32> to vector<2x8x128xi32>
    %103 = arith.cmpi slt, %15, %102 : vector<2x8x128xi32>
    %104 = arith.extui %103 : vector<2x8x128xi1> to vector<2x8x128xi32>
    %cst_24 = arith.constant dense<0> : vector<2x128xi32>
    %105 = vector.multi_reduction <add>, %104, %cst_24 [1] : vector<2x8x128xi32> to vector<2x128xi32>
    %106 = vector.shape_cast %105 : vector<2x128xi32> to vector<2x1x128xi32>
    %cst_25 = arith.constant dense<0> : vector<2x1xi32>
    %107 = vector.multi_reduction <add>, %106, %cst_25 [2] : vector<2x1x128xi32> to vector<2x1xi32>
    %108 = vector.shape_cast %107 : vector<2x1xi32> to vector<2x1x1xi32>
    %c165_i32_26 = arith.constant 165 : i32
    %109 = vector.broadcast %c165_i32_26 : i32 to vector<2x1x1xi32>
    %110 = arith.cmpi sle, %108, %109 : vector<2x1x1xi32>
    %111 = arith.select %110, %101, %99 : vector<2x1x1xi1>, vector<2x1x1xi32>
    %c8388608_i32 = arith.constant 8388608 : i32
    %112 = vector.broadcast %c8388608_i32 : i32 to vector<2x1x1xi32>
    %113 = arith.ori %111, %112 : vector<2x1x1xi32>
    %114 = vector.broadcast %113 : vector<2x1x1xi32> to vector<2x8x128xi32>
    %115 = arith.cmpi slt, %15, %114 : vector<2x8x128xi32>
    %116 = arith.extui %115 : vector<2x8x128xi1> to vector<2x8x128xi32>
    %cst_27 = arith.constant dense<0> : vector<2x128xi32>
    %117 = vector.multi_reduction <add>, %116, %cst_27 [1] : vector<2x8x128xi32> to vector<2x128xi32>
    %118 = vector.shape_cast %117 : vector<2x128xi32> to vector<2x1x128xi32>
    %cst_28 = arith.constant dense<0> : vector<2x1xi32>
    %119 = vector.multi_reduction <add>, %118, %cst_28 [2] : vector<2x1x128xi32> to vector<2x1xi32>
    %120 = vector.shape_cast %119 : vector<2x1xi32> to vector<2x1x1xi32>
    %c165_i32_29 = arith.constant 165 : i32
    %121 = vector.broadcast %c165_i32_29 : i32 to vector<2x1x1xi32>
    %122 = arith.cmpi sle, %120, %121 : vector<2x1x1xi32>
    %123 = arith.select %122, %113, %111 : vector<2x1x1xi1>, vector<2x1x1xi32>
    %c4194304_i32 = arith.constant 4194304 : i32
    %124 = vector.broadcast %c4194304_i32 : i32 to vector<2x1x1xi32>
    %125 = arith.ori %123, %124 : vector<2x1x1xi32>
    %126 = vector.broadcast %125 : vector<2x1x1xi32> to vector<2x8x128xi32>
    %127 = arith.cmpi slt, %15, %126 : vector<2x8x128xi32>
    %128 = arith.extui %127 : vector<2x8x128xi1> to vector<2x8x128xi32>
    %cst_30 = arith.constant dense<0> : vector<2x128xi32>
    %129 = vector.multi_reduction <add>, %128, %cst_30 [1] : vector<2x8x128xi32> to vector<2x128xi32>
    %130 = vector.shape_cast %129 : vector<2x128xi32> to vector<2x1x128xi32>
    %cst_31 = arith.constant dense<0> : vector<2x1xi32>
    %131 = vector.multi_reduction <add>, %130, %cst_31 [2] : vector<2x1x128xi32> to vector<2x1xi32>
    %132 = vector.shape_cast %131 : vector<2x1xi32> to vector<2x1x1xi32>
    %c165_i32_32 = arith.constant 165 : i32
    %133 = vector.broadcast %c165_i32_32 : i32 to vector<2x1x1xi32>
    %134 = arith.cmpi sle, %132, %133 : vector<2x1x1xi32>
    %135 = arith.select %134, %125, %123 : vector<2x1x1xi1>, vector<2x1x1xi32>
    %c2097152_i32 = arith.constant 2097152 : i32
    %136 = vector.broadcast %c2097152_i32 : i32 to vector<2x1x1xi32>
    %137 = arith.ori %135, %136 : vector<2x1x1xi32>
    %138 = vector.broadcast %137 : vector<2x1x1xi32> to vector<2x8x128xi32>
    %139 = arith.cmpi slt, %15, %138 : vector<2x8x128xi32>
    %140 = arith.extui %139 : vector<2x8x128xi1> to vector<2x8x128xi32>
    %cst_33 = arith.constant dense<0> : vector<2x128xi32>
    %141 = vector.multi_reduction <add>, %140, %cst_33 [1] : vector<2x8x128xi32> to vector<2x128xi32>
    %142 = vector.shape_cast %141 : vector<2x128xi32> to vector<2x1x128xi32>
    %cst_34 = arith.constant dense<0> : vector<2x1xi32>
    %143 = vector.multi_reduction <add>, %142, %cst_34 [2] : vector<2x1x128xi32> to vector<2x1xi32>
    %144 = vector.shape_cast %143 : vector<2x1xi32> to vector<2x1x1xi32>
    %c165_i32_35 = arith.constant 165 : i32
    %145 = vector.broadcast %c165_i32_35 : i32 to vector<2x1x1xi32>
    %146 = arith.cmpi sle, %144, %145 : vector<2x1x1xi32>
    %147 = arith.select %146, %137, %135 : vector<2x1x1xi1>, vector<2x1x1xi32>
    %c1048576_i32 = arith.constant 1048576 : i32
    %148 = vector.broadcast %c1048576_i32 : i32 to vector<2x1x1xi32>
    %149 = arith.ori %147, %148 : vector<2x1x1xi32>
    %150 = vector.broadcast %149 : vector<2x1x1xi32> to vector<2x8x128xi32>
    %151 = arith.cmpi slt, %15, %150 : vector<2x8x128xi32>
    %152 = arith.extui %151 : vector<2x8x128xi1> to vector<2x8x128xi32>
    %cst_36 = arith.constant dense<0> : vector<2x128xi32>
    %153 = vector.multi_reduction <add>, %152, %cst_36 [1] : vector<2x8x128xi32> to vector<2x128xi32>
    %154 = vector.shape_cast %153 : vector<2x128xi32> to vector<2x1x128xi32>
    %cst_37 = arith.constant dense<0> : vector<2x1xi32>
    %155 = vector.multi_reduction <add>, %154, %cst_37 [2] : vector<2x1x128xi32> to vector<2x1xi32>
    %156 = vector.shape_cast %155 : vector<2x1xi32> to vector<2x1x1xi32>
    %c165_i32_38 = arith.constant 165 : i32
    %157 = vector.broadcast %c165_i32_38 : i32 to vector<2x1x1xi32>
    %158 = arith.cmpi sle, %156, %157 : vector<2x1x1xi32>
    %159 = arith.select %158, %149, %147 : vector<2x1x1xi1>, vector<2x1x1xi32>
    %c524288_i32 = arith.constant 524288 : i32
    %160 = vector.broadcast %c524288_i32 : i32 to vector<2x1x1xi32>
    %161 = arith.ori %159, %160 : vector<2x1x1xi32>
    %162 = vector.broadcast %161 : vector<2x1x1xi32> to vector<2x8x128xi32>
    %163 = arith.cmpi slt, %15, %162 : vector<2x8x128xi32>
    %164 = arith.extui %163 : vector<2x8x128xi1> to vector<2x8x128xi32>
    %cst_39 = arith.constant dense<0> : vector<2x128xi32>
    %165 = vector.multi_reduction <add>, %164, %cst_39 [1] : vector<2x8x128xi32> to vector<2x128xi32>
    %166 = vector.shape_cast %165 : vector<2x128xi32> to vector<2x1x128xi32>
    %cst_40 = arith.constant dense<0> : vector<2x1xi32>
    %167 = vector.multi_reduction <add>, %166, %cst_40 [2] : vector<2x1x128xi32> to vector<2x1xi32>
    %168 = vector.shape_cast %167 : vector<2x1xi32> to vector<2x1x1xi32>
    %c165_i32_41 = arith.constant 165 : i32
    %169 = vector.broadcast %c165_i32_41 : i32 to vector<2x1x1xi32>
    %170 = arith.cmpi sle, %168, %169 : vector<2x1x1xi32>
    %171 = arith.select %170, %161, %159 : vector<2x1x1xi1>, vector<2x1x1xi32>
    %c262144_i32 = arith.constant 262144 : i32
    %172 = vector.broadcast %c262144_i32 : i32 to vector<2x1x1xi32>
    %173 = arith.ori %171, %172 : vector<2x1x1xi32>
    %174 = vector.broadcast %173 : vector<2x1x1xi32> to vector<2x8x128xi32>
    %175 = arith.cmpi slt, %15, %174 : vector<2x8x128xi32>
    %176 = arith.extui %175 : vector<2x8x128xi1> to vector<2x8x128xi32>
    %cst_42 = arith.constant dense<0> : vector<2x128xi32>
    %177 = vector.multi_reduction <add>, %176, %cst_42 [1] : vector<2x8x128xi32> to vector<2x128xi32>
    %178 = vector.shape_cast %177 : vector<2x128xi32> to vector<2x1x128xi32>
    %cst_43 = arith.constant dense<0> : vector<2x1xi32>
    %179 = vector.multi_reduction <add>, %178, %cst_43 [2] : vector<2x1x128xi32> to vector<2x1xi32>
    %180 = vector.shape_cast %179 : vector<2x1xi32> to vector<2x1x1xi32>
    %c165_i32_44 = arith.constant 165 : i32
    %181 = vector.broadcast %c165_i32_44 : i32 to vector<2x1x1xi32>
    %182 = arith.cmpi sle, %180, %181 : vector<2x1x1xi32>
    %183 = arith.select %182, %173, %171 : vector<2x1x1xi1>, vector<2x1x1xi32>
    %c131072_i32 = arith.constant 131072 : i32
    %184 = vector.broadcast %c131072_i32 : i32 to vector<2x1x1xi32>
    %185 = arith.ori %183, %184 : vector<2x1x1xi32>
    %186 = vector.broadcast %185 : vector<2x1x1xi32> to vector<2x8x128xi32>
    %187 = arith.cmpi slt, %15, %186 : vector<2x8x128xi32>
    %188 = arith.extui %187 : vector<2x8x128xi1> to vector<2x8x128xi32>
    %cst_45 = arith.constant dense<0> : vector<2x128xi32>
    %189 = vector.multi_reduction <add>, %188, %cst_45 [1] : vector<2x8x128xi32> to vector<2x128xi32>
    %190 = vector.shape_cast %189 : vector<2x128xi32> to vector<2x1x128xi32>
    %cst_46 = arith.constant dense<0> : vector<2x1xi32>
    %191 = vector.multi_reduction <add>, %190, %cst_46 [2] : vector<2x1x128xi32> to vector<2x1xi32>
    %192 = vector.shape_cast %191 : vector<2x1xi32> to vector<2x1x1xi32>
    %c165_i32_47 = arith.constant 165 : i32
    %193 = vector.broadcast %c165_i32_47 : i32 to vector<2x1x1xi32>
    %194 = arith.cmpi sle, %192, %193 : vector<2x1x1xi32>
    %195 = arith.select %194, %185, %183 : vector<2x1x1xi1>, vector<2x1x1xi32>
    %c65536_i32 = arith.constant 65536 : i32
    %196 = vector.broadcast %c65536_i32 : i32 to vector<2x1x1xi32>
    %197 = arith.ori %195, %196 : vector<2x1x1xi32>
    %198 = vector.broadcast %197 : vector<2x1x1xi32> to vector<2x8x128xi32>
    %199 = arith.cmpi slt, %15, %198 : vector<2x8x128xi32>
    %200 = arith.extui %199 : vector<2x8x128xi1> to vector<2x8x128xi32>
    %cst_48 = arith.constant dense<0> : vector<2x128xi32>
    %201 = vector.multi_reduction <add>, %200, %cst_48 [1] : vector<2x8x128xi32> to vector<2x128xi32>
    %202 = vector.shape_cast %201 : vector<2x128xi32> to vector<2x1x128xi32>
    %cst_49 = arith.constant dense<0> : vector<2x1xi32>
    %203 = vector.multi_reduction <add>, %202, %cst_49 [2] : vector<2x1x128xi32> to vector<2x1xi32>
    %204 = vector.shape_cast %203 : vector<2x1xi32> to vector<2x1x1xi32>
    %c165_i32_50 = arith.constant 165 : i32
    %205 = vector.broadcast %c165_i32_50 : i32 to vector<2x1x1xi32>
    %206 = arith.cmpi sle, %204, %205 : vector<2x1x1xi32>
    %207 = arith.select %206, %197, %195 : vector<2x1x1xi1>, vector<2x1x1xi32>
    %c32768_i32 = arith.constant 32768 : i32
    %208 = vector.broadcast %c32768_i32 : i32 to vector<2x1x1xi32>
    %209 = arith.ori %207, %208 : vector<2x1x1xi32>
    %210 = vector.broadcast %209 : vector<2x1x1xi32> to vector<2x8x128xi32>
    %211 = arith.cmpi slt, %15, %210 : vector<2x8x128xi32>
    %212 = arith.extui %211 : vector<2x8x128xi1> to vector<2x8x128xi32>
    %cst_51 = arith.constant dense<0> : vector<2x128xi32>
    %213 = vector.multi_reduction <add>, %212, %cst_51 [1] : vector<2x8x128xi32> to vector<2x128xi32>
    %214 = vector.shape_cast %213 : vector<2x128xi32> to vector<2x1x128xi32>
    %cst_52 = arith.constant dense<0> : vector<2x1xi32>
    %215 = vector.multi_reduction <add>, %214, %cst_52 [2] : vector<2x1x128xi32> to vector<2x1xi32>
    %216 = vector.shape_cast %215 : vector<2x1xi32> to vector<2x1x1xi32>
    %c165_i32_53 = arith.constant 165 : i32
    %217 = vector.broadcast %c165_i32_53 : i32 to vector<2x1x1xi32>
    %218 = arith.cmpi sle, %216, %217 : vector<2x1x1xi32>
    %219 = arith.select %218, %209, %207 : vector<2x1x1xi1>, vector<2x1x1xi32>
    %c16384_i32 = arith.constant 16384 : i32
    %220 = vector.broadcast %c16384_i32 : i32 to vector<2x1x1xi32>
    %221 = arith.ori %219, %220 : vector<2x1x1xi32>
    %222 = vector.broadcast %221 : vector<2x1x1xi32> to vector<2x8x128xi32>
    %223 = arith.cmpi slt, %15, %222 : vector<2x8x128xi32>
    %224 = arith.extui %223 : vector<2x8x128xi1> to vector<2x8x128xi32>
    %cst_54 = arith.constant dense<0> : vector<2x128xi32>
    %225 = vector.multi_reduction <add>, %224, %cst_54 [1] : vector<2x8x128xi32> to vector<2x128xi32>
    %226 = vector.shape_cast %225 : vector<2x128xi32> to vector<2x1x128xi32>
    %cst_55 = arith.constant dense<0> : vector<2x1xi32>
    %227 = vector.multi_reduction <add>, %226, %cst_55 [2] : vector<2x1x128xi32> to vector<2x1xi32>
    %228 = vector.shape_cast %227 : vector<2x1xi32> to vector<2x1x1xi32>
    %c165_i32_56 = arith.constant 165 : i32
    %229 = vector.broadcast %c165_i32_56 : i32 to vector<2x1x1xi32>
    %230 = arith.cmpi sle, %228, %229 : vector<2x1x1xi32>
    %231 = arith.select %230, %221, %219 : vector<2x1x1xi1>, vector<2x1x1xi32>
    %c8192_i32 = arith.constant 8192 : i32
    %232 = vector.broadcast %c8192_i32 : i32 to vector<2x1x1xi32>
    %233 = arith.ori %231, %232 : vector<2x1x1xi32>
    %234 = vector.broadcast %233 : vector<2x1x1xi32> to vector<2x8x128xi32>
    %235 = arith.cmpi slt, %15, %234 : vector<2x8x128xi32>
    %236 = arith.extui %235 : vector<2x8x128xi1> to vector<2x8x128xi32>
    %cst_57 = arith.constant dense<0> : vector<2x128xi32>
    %237 = vector.multi_reduction <add>, %236, %cst_57 [1] : vector<2x8x128xi32> to vector<2x128xi32>
    %238 = vector.shape_cast %237 : vector<2x128xi32> to vector<2x1x128xi32>
    %cst_58 = arith.constant dense<0> : vector<2x1xi32>
    %239 = vector.multi_reduction <add>, %238, %cst_58 [2] : vector<2x1x128xi32> to vector<2x1xi32>
    %240 = vector.shape_cast %239 : vector<2x1xi32> to vector<2x1x1xi32>
    %c165_i32_59 = arith.constant 165 : i32
    %241 = vector.broadcast %c165_i32_59 : i32 to vector<2x1x1xi32>
    %242 = arith.cmpi sle, %240, %241 : vector<2x1x1xi32>
    %243 = arith.select %242, %233, %231 : vector<2x1x1xi1>, vector<2x1x1xi32>
    %c4096_i32 = arith.constant 4096 : i32
    %244 = vector.broadcast %c4096_i32 : i32 to vector<2x1x1xi32>
    %245 = arith.ori %243, %244 : vector<2x1x1xi32>
    %246 = vector.broadcast %245 : vector<2x1x1xi32> to vector<2x8x128xi32>
    %247 = arith.cmpi slt, %15, %246 : vector<2x8x128xi32>
    %248 = arith.extui %247 : vector<2x8x128xi1> to vector<2x8x128xi32>
    %cst_60 = arith.constant dense<0> : vector<2x128xi32>
    %249 = vector.multi_reduction <add>, %248, %cst_60 [1] : vector<2x8x128xi32> to vector<2x128xi32>
    %250 = vector.shape_cast %249 : vector<2x128xi32> to vector<2x1x128xi32>
    %cst_61 = arith.constant dense<0> : vector<2x1xi32>
    %251 = vector.multi_reduction <add>, %250, %cst_61 [2] : vector<2x1x128xi32> to vector<2x1xi32>
    %252 = vector.shape_cast %251 : vector<2x1xi32> to vector<2x1x1xi32>
    %c165_i32_62 = arith.constant 165 : i32
    %253 = vector.broadcast %c165_i32_62 : i32 to vector<2x1x1xi32>
    %254 = arith.cmpi sle, %252, %253 : vector<2x1x1xi32>
    %255 = arith.select %254, %245, %243 : vector<2x1x1xi1>, vector<2x1x1xi32>
    %c2048_i32 = arith.constant 2048 : i32
    %256 = vector.broadcast %c2048_i32 : i32 to vector<2x1x1xi32>
    %257 = arith.ori %255, %256 : vector<2x1x1xi32>
    %258 = vector.broadcast %257 : vector<2x1x1xi32> to vector<2x8x128xi32>
    %259 = arith.cmpi slt, %15, %258 : vector<2x8x128xi32>
    %260 = arith.extui %259 : vector<2x8x128xi1> to vector<2x8x128xi32>
    %cst_63 = arith.constant dense<0> : vector<2x128xi32>
    %261 = vector.multi_reduction <add>, %260, %cst_63 [1] : vector<2x8x128xi32> to vector<2x128xi32>
    %262 = vector.shape_cast %261 : vector<2x128xi32> to vector<2x1x128xi32>
    %cst_64 = arith.constant dense<0> : vector<2x1xi32>
    %263 = vector.multi_reduction <add>, %262, %cst_64 [2] : vector<2x1x128xi32> to vector<2x1xi32>
    %264 = vector.shape_cast %263 : vector<2x1xi32> to vector<2x1x1xi32>
    %c165_i32_65 = arith.constant 165 : i32
    %265 = vector.broadcast %c165_i32_65 : i32 to vector<2x1x1xi32>
    %266 = arith.cmpi sle, %264, %265 : vector<2x1x1xi32>
    %267 = arith.select %266, %257, %255 : vector<2x1x1xi1>, vector<2x1x1xi32>
    %c1024_i32 = arith.constant 1024 : i32
    %268 = vector.broadcast %c1024_i32 : i32 to vector<2x1x1xi32>
    %269 = arith.ori %267, %268 : vector<2x1x1xi32>
    %270 = vector.broadcast %269 : vector<2x1x1xi32> to vector<2x8x128xi32>
    %271 = arith.cmpi slt, %15, %270 : vector<2x8x128xi32>
    %272 = arith.extui %271 : vector<2x8x128xi1> to vector<2x8x128xi32>
    %cst_66 = arith.constant dense<0> : vector<2x128xi32>
    %273 = vector.multi_reduction <add>, %272, %cst_66 [1] : vector<2x8x128xi32> to vector<2x128xi32>
    %274 = vector.shape_cast %273 : vector<2x128xi32> to vector<2x1x128xi32>
    %cst_67 = arith.constant dense<0> : vector<2x1xi32>
    %275 = vector.multi_reduction <add>, %274, %cst_67 [2] : vector<2x1x128xi32> to vector<2x1xi32>
    %276 = vector.shape_cast %275 : vector<2x1xi32> to vector<2x1x1xi32>
    %c165_i32_68 = arith.constant 165 : i32
    %277 = vector.broadcast %c165_i32_68 : i32 to vector<2x1x1xi32>
    %278 = arith.cmpi sle, %276, %277 : vector<2x1x1xi32>
    %279 = arith.select %278, %269, %267 : vector<2x1x1xi1>, vector<2x1x1xi32>
    %c512_i32 = arith.constant 512 : i32
    %280 = vector.broadcast %c512_i32 : i32 to vector<2x1x1xi32>
    %281 = arith.ori %279, %280 : vector<2x1x1xi32>
    %282 = vector.broadcast %281 : vector<2x1x1xi32> to vector<2x8x128xi32>
    %283 = arith.cmpi slt, %15, %282 : vector<2x8x128xi32>
    %284 = arith.extui %283 : vector<2x8x128xi1> to vector<2x8x128xi32>
    %cst_69 = arith.constant dense<0> : vector<2x128xi32>
    %285 = vector.multi_reduction <add>, %284, %cst_69 [1] : vector<2x8x128xi32> to vector<2x128xi32>
    %286 = vector.shape_cast %285 : vector<2x128xi32> to vector<2x1x128xi32>
    %cst_70 = arith.constant dense<0> : vector<2x1xi32>
    %287 = vector.multi_reduction <add>, %286, %cst_70 [2] : vector<2x1x128xi32> to vector<2x1xi32>
    %288 = vector.shape_cast %287 : vector<2x1xi32> to vector<2x1x1xi32>
    %c165_i32_71 = arith.constant 165 : i32
    %289 = vector.broadcast %c165_i32_71 : i32 to vector<2x1x1xi32>
    %290 = arith.cmpi sle, %288, %289 : vector<2x1x1xi32>
    %291 = arith.select %290, %281, %279 : vector<2x1x1xi1>, vector<2x1x1xi32>
    %c256_i32_72 = arith.constant 256 : i32
    %292 = vector.broadcast %c256_i32_72 : i32 to vector<2x1x1xi32>
    %293 = arith.ori %291, %292 : vector<2x1x1xi32>
    %294 = vector.broadcast %293 : vector<2x1x1xi32> to vector<2x8x128xi32>
    %295 = arith.cmpi slt, %15, %294 : vector<2x8x128xi32>
    %296 = arith.extui %295 : vector<2x8x128xi1> to vector<2x8x128xi32>
    %cst_73 = arith.constant dense<0> : vector<2x128xi32>
    %297 = vector.multi_reduction <add>, %296, %cst_73 [1] : vector<2x8x128xi32> to vector<2x128xi32>
    %298 = vector.shape_cast %297 : vector<2x128xi32> to vector<2x1x128xi32>
    %cst_74 = arith.constant dense<0> : vector<2x1xi32>
    %299 = vector.multi_reduction <add>, %298, %cst_74 [2] : vector<2x1x128xi32> to vector<2x1xi32>
    %300 = vector.shape_cast %299 : vector<2x1xi32> to vector<2x1x1xi32>
    %c165_i32_75 = arith.constant 165 : i32
    %301 = vector.broadcast %c165_i32_75 : i32 to vector<2x1x1xi32>
    %302 = arith.cmpi sle, %300, %301 : vector<2x1x1xi32>
    %303 = arith.select %302, %293, %291 : vector<2x1x1xi1>, vector<2x1x1xi32>
    %c128_i32_76 = arith.constant 128 : i32
    %304 = vector.broadcast %c128_i32_76 : i32 to vector<2x1x1xi32>
    %305 = arith.ori %303, %304 : vector<2x1x1xi32>
    %306 = vector.broadcast %305 : vector<2x1x1xi32> to vector<2x8x128xi32>
    %307 = arith.cmpi slt, %15, %306 : vector<2x8x128xi32>
    %308 = arith.extui %307 : vector<2x8x128xi1> to vector<2x8x128xi32>
    %cst_77 = arith.constant dense<0> : vector<2x128xi32>
    %309 = vector.multi_reduction <add>, %308, %cst_77 [1] : vector<2x8x128xi32> to vector<2x128xi32>
    %310 = vector.shape_cast %309 : vector<2x128xi32> to vector<2x1x128xi32>
    %cst_78 = arith.constant dense<0> : vector<2x1xi32>
    %311 = vector.multi_reduction <add>, %310, %cst_78 [2] : vector<2x1x128xi32> to vector<2x1xi32>
    %312 = vector.shape_cast %311 : vector<2x1xi32> to vector<2x1x1xi32>
    %c165_i32_79 = arith.constant 165 : i32
    %313 = vector.broadcast %c165_i32_79 : i32 to vector<2x1x1xi32>
    %314 = arith.cmpi sle, %312, %313 : vector<2x1x1xi32>
    %315 = arith.select %314, %305, %303 : vector<2x1x1xi1>, vector<2x1x1xi32>
    %c64_i32 = arith.constant 64 : i32
    %316 = vector.broadcast %c64_i32 : i32 to vector<2x1x1xi32>
    %317 = arith.ori %315, %316 : vector<2x1x1xi32>
    %318 = vector.broadcast %317 : vector<2x1x1xi32> to vector<2x8x128xi32>
    %319 = arith.cmpi slt, %15, %318 : vector<2x8x128xi32>
    %320 = arith.extui %319 : vector<2x8x128xi1> to vector<2x8x128xi32>
    %cst_80 = arith.constant dense<0> : vector<2x128xi32>
    %321 = vector.multi_reduction <add>, %320, %cst_80 [1] : vector<2x8x128xi32> to vector<2x128xi32>
    %322 = vector.shape_cast %321 : vector<2x128xi32> to vector<2x1x128xi32>
    %cst_81 = arith.constant dense<0> : vector<2x1xi32>
    %323 = vector.multi_reduction <add>, %322, %cst_81 [2] : vector<2x1x128xi32> to vector<2x1xi32>
    %324 = vector.shape_cast %323 : vector<2x1xi32> to vector<2x1x1xi32>
    %c165_i32_82 = arith.constant 165 : i32
    %325 = vector.broadcast %c165_i32_82 : i32 to vector<2x1x1xi32>
    %326 = arith.cmpi sle, %324, %325 : vector<2x1x1xi32>
    %327 = arith.select %326, %317, %315 : vector<2x1x1xi1>, vector<2x1x1xi32>
    %c32_i32 = arith.constant 32 : i32
    %328 = vector.broadcast %c32_i32 : i32 to vector<2x1x1xi32>
    %329 = arith.ori %327, %328 : vector<2x1x1xi32>
    %330 = vector.broadcast %329 : vector<2x1x1xi32> to vector<2x8x128xi32>
    %331 = arith.cmpi slt, %15, %330 : vector<2x8x128xi32>
    %332 = arith.extui %331 : vector<2x8x128xi1> to vector<2x8x128xi32>
    %cst_83 = arith.constant dense<0> : vector<2x128xi32>
    %333 = vector.multi_reduction <add>, %332, %cst_83 [1] : vector<2x8x128xi32> to vector<2x128xi32>
    %334 = vector.shape_cast %333 : vector<2x128xi32> to vector<2x1x128xi32>
    %cst_84 = arith.constant dense<0> : vector<2x1xi32>
    %335 = vector.multi_reduction <add>, %334, %cst_84 [2] : vector<2x1x128xi32> to vector<2x1xi32>
    %336 = vector.shape_cast %335 : vector<2x1xi32> to vector<2x1x1xi32>
    %c165_i32_85 = arith.constant 165 : i32
    %337 = vector.broadcast %c165_i32_85 : i32 to vector<2x1x1xi32>
    %338 = arith.cmpi sle, %336, %337 : vector<2x1x1xi32>
    %339 = arith.select %338, %329, %327 : vector<2x1x1xi1>, vector<2x1x1xi32>
    %c16_i32 = arith.constant 16 : i32
    %340 = vector.broadcast %c16_i32 : i32 to vector<2x1x1xi32>
    %341 = arith.ori %339, %340 : vector<2x1x1xi32>
    %342 = vector.broadcast %341 : vector<2x1x1xi32> to vector<2x8x128xi32>
    %343 = arith.cmpi slt, %15, %342 : vector<2x8x128xi32>
    %344 = arith.extui %343 : vector<2x8x128xi1> to vector<2x8x128xi32>
    %cst_86 = arith.constant dense<0> : vector<2x128xi32>
    %345 = vector.multi_reduction <add>, %344, %cst_86 [1] : vector<2x8x128xi32> to vector<2x128xi32>
    %346 = vector.shape_cast %345 : vector<2x128xi32> to vector<2x1x128xi32>
    %cst_87 = arith.constant dense<0> : vector<2x1xi32>
    %347 = vector.multi_reduction <add>, %346, %cst_87 [2] : vector<2x1x128xi32> to vector<2x1xi32>
    %348 = vector.shape_cast %347 : vector<2x1xi32> to vector<2x1x1xi32>
    %c165_i32_88 = arith.constant 165 : i32
    %349 = vector.broadcast %c165_i32_88 : i32 to vector<2x1x1xi32>
    %350 = arith.cmpi sle, %348, %349 : vector<2x1x1xi32>
    %351 = arith.select %350, %341, %339 : vector<2x1x1xi1>, vector<2x1x1xi32>
    %c8_i32 = arith.constant 8 : i32
    %352 = vector.broadcast %c8_i32 : i32 to vector<2x1x1xi32>
    %353 = arith.ori %351, %352 : vector<2x1x1xi32>
    %354 = vector.broadcast %353 : vector<2x1x1xi32> to vector<2x8x128xi32>
    %355 = arith.cmpi slt, %15, %354 : vector<2x8x128xi32>
    %356 = arith.extui %355 : vector<2x8x128xi1> to vector<2x8x128xi32>
    %cst_89 = arith.constant dense<0> : vector<2x128xi32>
    %357 = vector.multi_reduction <add>, %356, %cst_89 [1] : vector<2x8x128xi32> to vector<2x128xi32>
    %358 = vector.shape_cast %357 : vector<2x128xi32> to vector<2x1x128xi32>
    %cst_90 = arith.constant dense<0> : vector<2x1xi32>
    %359 = vector.multi_reduction <add>, %358, %cst_90 [2] : vector<2x1x128xi32> to vector<2x1xi32>
    %360 = vector.shape_cast %359 : vector<2x1xi32> to vector<2x1x1xi32>
    %c165_i32_91 = arith.constant 165 : i32
    %361 = vector.broadcast %c165_i32_91 : i32 to vector<2x1x1xi32>
    %362 = arith.cmpi sle, %360, %361 : vector<2x1x1xi32>
    %363 = arith.select %362, %353, %351 : vector<2x1x1xi1>, vector<2x1x1xi32>
    %c4_i32 = arith.constant 4 : i32
    %364 = vector.broadcast %c4_i32 : i32 to vector<2x1x1xi32>
    %365 = arith.ori %363, %364 : vector<2x1x1xi32>
    %366 = vector.broadcast %365 : vector<2x1x1xi32> to vector<2x8x128xi32>
    %367 = arith.cmpi slt, %15, %366 : vector<2x8x128xi32>
    %368 = arith.extui %367 : vector<2x8x128xi1> to vector<2x8x128xi32>
    %cst_92 = arith.constant dense<0> : vector<2x128xi32>
    %369 = vector.multi_reduction <add>, %368, %cst_92 [1] : vector<2x8x128xi32> to vector<2x128xi32>
    %370 = vector.shape_cast %369 : vector<2x128xi32> to vector<2x1x128xi32>
    %cst_93 = arith.constant dense<0> : vector<2x1xi32>
    %371 = vector.multi_reduction <add>, %370, %cst_93 [2] : vector<2x1x128xi32> to vector<2x1xi32>
    %372 = vector.shape_cast %371 : vector<2x1xi32> to vector<2x1x1xi32>
    %c165_i32_94 = arith.constant 165 : i32
    %373 = vector.broadcast %c165_i32_94 : i32 to vector<2x1x1xi32>
    %374 = arith.cmpi sle, %372, %373 : vector<2x1x1xi32>
    %375 = arith.select %374, %365, %363 : vector<2x1x1xi1>, vector<2x1x1xi32>
    %c2_i32 = arith.constant 2 : i32
    %376 = vector.broadcast %c2_i32 : i32 to vector<2x1x1xi32>
    %377 = arith.ori %375, %376 : vector<2x1x1xi32>
    %378 = vector.broadcast %377 : vector<2x1x1xi32> to vector<2x8x128xi32>
    %379 = arith.cmpi slt, %15, %378 : vector<2x8x128xi32>
    %380 = arith.extui %379 : vector<2x8x128xi1> to vector<2x8x128xi32>
    %cst_95 = arith.constant dense<0> : vector<2x128xi32>
    %381 = vector.multi_reduction <add>, %380, %cst_95 [1] : vector<2x8x128xi32> to vector<2x128xi32>
    %382 = vector.shape_cast %381 : vector<2x128xi32> to vector<2x1x128xi32>
    %cst_96 = arith.constant dense<0> : vector<2x1xi32>
    %383 = vector.multi_reduction <add>, %382, %cst_96 [2] : vector<2x1x128xi32> to vector<2x1xi32>
    %384 = vector.shape_cast %383 : vector<2x1xi32> to vector<2x1x1xi32>
    %c165_i32_97 = arith.constant 165 : i32
    %385 = vector.broadcast %c165_i32_97 : i32 to vector<2x1x1xi32>
    %386 = arith.cmpi sle, %384, %385 : vector<2x1x1xi32>
    %387 = arith.select %386, %377, %375 : vector<2x1x1xi1>, vector<2x1x1xi32>
    %c1_i32 = arith.constant 1 : i32
    %388 = vector.broadcast %c1_i32 : i32 to vector<2x1x1xi32>
    %389 = arith.ori %387, %388 : vector<2x1x1xi32>
    %390 = vector.broadcast %389 : vector<2x1x1xi32> to vector<2x8x128xi32>
    %391 = arith.cmpi slt, %15, %390 : vector<2x8x128xi32>
    %392 = arith.extui %391 : vector<2x8x128xi1> to vector<2x8x128xi32>
    %cst_98 = arith.constant dense<0> : vector<2x128xi32>
    %393 = vector.multi_reduction <add>, %392, %cst_98 [1] : vector<2x8x128xi32> to vector<2x128xi32>
    %394 = vector.shape_cast %393 : vector<2x128xi32> to vector<2x1x128xi32>
    %cst_99 = arith.constant dense<0> : vector<2x1xi32>
    %395 = vector.multi_reduction <add>, %394, %cst_99 [2] : vector<2x1x128xi32> to vector<2x1xi32>
    %396 = vector.shape_cast %395 : vector<2x1xi32> to vector<2x1x1xi32>
    %c165_i32_100 = arith.constant 165 : i32
    %397 = vector.broadcast %c165_i32_100 : i32 to vector<2x1x1xi32>
    %398 = arith.cmpi sle, %396, %397 : vector<2x1x1xi32>
    %399 = arith.select %398, %389, %387 : vector<2x1x1xi1>, vector<2x1x1xi32>
    %400 = vector.broadcast %399 : vector<2x1x1xi32> to vector<2x8x128xi32>
    %401 = arith.cmpi eq, %15, %400 : vector<2x8x128xi32>
    %cst_101 = arith.constant 0xFF800000 : f32
    %402 = vector.broadcast %cst_101 : f32 to vector<2x8x128xf32>
    %403 = arith.select %401, %0, %402 : vector<2x8x128xi1>, vector<2x8x128xf32>
    %cst_102 = arith.constant dense<0xFF800000> : vector<2x128xf32>
    %404 = vector.multi_reduction <maximumf>, %403, %cst_102 [1] : vector<2x8x128xf32> to vector<2x128xf32>
    %405 = vector.shape_cast %404 : vector<2x128xf32> to vector<2x1x128xf32>
    %cst_103 = arith.constant dense<0xFF800000> : vector<2x1xf32>
    %406 = vector.multi_reduction <maximumf>, %405, %cst_103 [2] : vector<2x1x128xf32> to vector<2x1xf32>
    %407 = vector.shape_cast %406 : vector<2x1xf32> to vector<2x1x1xf32>
    %408 = vector.broadcast %399 : vector<2x1x1xi32> to vector<2x8x128xi32>
    %409 = arith.cmpi sle, %15, %408 : vector<2x8x128xi32>
    %410 = arith.extui %409 : vector<2x8x128xi1> to vector<2x8x128xi32>
    %cst_104 = arith.constant dense<0> : vector<2x128xi32>
    %411 = vector.multi_reduction <add>, %410, %cst_104 [1] : vector<2x8x128xi32> to vector<2x128xi32>
    %412 = vector.shape_cast %411 : vector<2x128xi32> to vector<2x1x128xi32>
    %cst_105 = arith.constant dense<0> : vector<2x1xi32>
    %413 = vector.multi_reduction <add>, %412, %cst_105 [2] : vector<2x1x128xi32> to vector<2x1xi32>
    %414 = vector.shape_cast %413 : vector<2x1xi32> to vector<2x1x1xi32>
    %415 = vector.broadcast %399 : vector<2x1x1xi32> to vector<2x8x128xi32>
    %416 = arith.cmpi sgt, %15, %415 : vector<2x8x128xi32>
    %417 = arith.andi %416, %13 : vector<2x8x128xi1>
    %cst_106 = arith.constant 0x7F800000 : f32
    %418 = vector.broadcast %cst_106 : f32 to vector<2x8x128xf32>
    %419 = arith.select %417, %0, %418 : vector<2x8x128xi1>, vector<2x8x128xf32>
    %cst_107 = arith.constant dense<0x7F800000> : vector<2x128xf32>
    %420 = vector.multi_reduction <minimumf>, %419, %cst_107 [1] : vector<2x8x128xf32> to vector<2x128xf32>
    %421 = vector.shape_cast %420 : vector<2x128xf32> to vector<2x1x128xf32>
    %cst_108 = arith.constant dense<0x7F800000> : vector<2x1xf32>
    %422 = vector.multi_reduction <minimumf>, %421, %cst_108 [2] : vector<2x1x128xf32> to vector<2x1xf32>
    %423 = vector.shape_cast %422 : vector<2x1xf32> to vector<2x1x1xf32>
    %c167_i32 = arith.constant 167 : i32
    %424 = vector.broadcast %c167_i32 : i32 to vector<2x1x1xi32>
    %425 = arith.cmpi sge, %414, %424 : vector<2x1x1xi32>
    %426 = arith.select %425, %407, %423 : vector<2x1x1xi1>, vector<2x1x1xf32>
    %427 = arith.subf %426, %407 : vector<2x1x1xf32>
    %cst_109 = arith.constant 7.500000e-01 : f32
    %428 = vector.broadcast %cst_109 : f32 to vector<2x1x1xf32>
    %429 = arith.mulf %428, %427 : vector<2x1x1xf32>
    %430 = arith.addf %407, %429 : vector<2x1x1xf32>
    %cst_110 = arith.constant dense<0.000000e+00> : vector<2x128xf32>
    %431 = vector.multi_reduction <add>, %0, %cst_110 [1] : vector<2x8x128xf32> to vector<2x128xf32>
    %432 = vector.shape_cast %431 : vector<2x128xf32> to vector<2x1x128xf32>
    %cst_111 = arith.constant dense<0.000000e+00> : vector<2x1xf32>
    %433 = vector.multi_reduction <add>, %432, %cst_111 [2] : vector<2x1x128xf32> to vector<2x1xf32>
    %434 = vector.shape_cast %433 : vector<2x1xf32> to vector<2x1x1xf32>
    %435 = vector.broadcast %430 : vector<2x1x1xf32> to vector<2x8x128xf32>
    %436 = arith.cmpf ogt, %0, %435 : vector<2x8x128xf32>
    %cst_112 = arith.constant 0.000000e+00 : f32
    %437 = vector.broadcast %cst_112 : f32 to vector<2x8x128xf32>
    %438 = arith.select %436, %0, %437 : vector<2x8x128xi1>, vector<2x8x128xf32>
    %cst_113 = arith.constant dense<0.000000e+00> : vector<2x128xf32>
    %439 = vector.multi_reduction <add>, %438, %cst_113 [1] : vector<2x8x128xf32> to vector<2x128xf32>
    %440 = vector.shape_cast %439 : vector<2x128xf32> to vector<2x1x128xf32>
    %cst_114 = arith.constant dense<0.000000e+00> : vector<2x1xf32>
    %441 = vector.multi_reduction <add>, %440, %cst_114 [2] : vector<2x1x128xf32> to vector<2x1xf32>
    %442 = vector.shape_cast %441 : vector<2x1xf32> to vector<2x1x1xf32>
    %cst_115 = arith.constant 9.99999997E-7 : f32
    %443 = vector.broadcast %cst_115 : f32 to vector<2x1x1xf32>
    %444 = arith.addf %442, %443 : vector<2x1x1xf32>
    %445 = arith.divf %434, %444 : vector<2x1x1xf32>
    %446 = math.exp %445 : vector<2x1x1xf32>
    %447 = vector.broadcast %446 : vector<2x1x1xf32> to vector<2x8x128xf32>
    %448 = arith.mulf %438, %447 : vector<2x8x128xf32>
    %c0_116 = arith.constant 0 : index
    %c0_117 = arith.constant 0 : index
    %c0_118 = arith.constant 0 : index
    %449 = vector.load %arg2[%c0_116, %c0_117, %c0_118] : memref<2x8x128xf32, #tpu.memory_space<vmem>>, vector<2x8x128xf32>
    tpu.vector_store %arg2[%c0_116, %c0_117, %c0_118], %448 {strides = array<i32>} : memref<2x8x128xf32, #tpu.memory_space<vmem>>, vector<2x8x128xf32>,
    return
  }
  func.func @transform_0(%arg0: i32) -> (i32, i32, i32) {
    %c0_i32 = arith.constant 0 : i32
    %c0_i32_0 = arith.constant 0 : i32
    %c0_i32_1 = arith.constant 0 : i32
    return %arg0, %c0_i32, %c0_i32_0 : i32, i32, i32
  }
  func.func @transform_1(%arg0: i32) -> (i32, i32, i32) {
    %c0_i32 = arith.constant 0 : i32
    %c0_i32_0 = arith.constant 0 : i32
    %c0_i32_1 = arith.constant 0 : i32
    return %arg0, %c0_i32, %c0_i32_0 : i32, i32, i32
  }
}

</mosaic_0001>

<bundles_post_ra>
// kernel: tpu_custom_call.1
= control target key start
LH: loop header
LB: loop body
LE: loop exit
PB: predicated region body
PF: predicated region fallthrough
CT: control target
= control target key end

     0   :  { %6 = vsyncpa [#allocation3], 0  ;;  %s1948_s0 = inlined_call_operand.hbm [shape: f32[2,8,128], index: 0, kind: input, shape index: {}]   ;;  %s1949_s1 = inlined_call_operand.hbm [shape: f32[2,8,128], index: 1, kind: output, shape index: {}]  }
   0x1   :  { %7 = vsyncpa [#allocation4], 0  ;;  %s1735_s6 = smov [#allocation2]   ;;  %s1687_s10 = scalar_lea.hbm %s1948_s0, 256 }
   0x2   :  { %s13_s7 = sshll.u32 %s1735_s6, 4  ;;  %p1688_p0 = scmp.ne.s32.totalorder %s1948_s0, %s1687_s10  ;;  %s14_s7 = int_to_ptr.vmem [resolvable:$true] %s13_s7 }
   0x3   :  { %p1691_p1 = scmp.lt.u32.totalorder %s1687_s10, %s1948_s0 }
   0x5   :  { %p1693_p2 = pnand %p1691_p1, %p1688_p0 }
   0x7   :  { %1696 = shalt.err (!%p1693_p2)
}
   0x8   :  { %s1697_s15 = scalar_lea.vmem %s14_s7, 256  ;;  %p1702_p4 = scmp.lt.s32.totalorder %s14_s7, %s14_s7 }
   0x9   :  { %p1698_p3 = scmp.ne.s32.totalorder %s14_s7, %s1697_s15  ;;  %p1703_p5 = scmp.lt.s32.totalorder %s1697_s15, %s1697_s15 }
   0xb   :  { %p1704_p6 = por %p1703_p5, %p1702_p4 }
   0xd   :  { %p1705_p7 = pnand %p1704_p6, %p1698_p3 }
   0xf   :  { %1708 = shalt.err (!%p1705_p7)
}
  0x10   :  { %s1736_s16 = smov 128   ;;  %s1737_s17 = smov 8  }
  0x11   :  { %19 = dma.hbm_to_vmem [thread:$0]  %s1948_s0, 256, %s14_s7, [#allocation3], %s1736_s16, %s1736_s16, %s1737_s17  }
  0x12   :  { %1731 = dma.done.wait [#allocation3], 256  }
  0x13   :  { %1732 = vsyncadd [#allocation3], 4294967040  ;;  %v33_v0 = vlaneseq  ;;  %v23_v5 = vld [vmem:[#allocation2] sm:$0xff]  ;;  %v24_v6 = vld [vmem:[#allocation2 + $0x8] sm:$0xff]  ;;  %v1738_v13 = vmov 0   ;;  %v1739_v47 = vmov 2147483648  }
  0x14   :  { %vm27_vm0 = vcmp.lt.s32.totalorder %v23_v5, 0  ;;  %vm28_vm1 = vcmp.lt.s32.totalorder %v24_v6, 0  ;;  %v29_v7 = vxor.u32 2147483647, %v23_v5  ;;  %v30_v8 = vxor.u32 2147483647, %v24_v6 }
  0x15   :  { %v34_v1 = vshrl.u32 %v33_v0, 7  ;;  %v36_v2 = vand.u32 127, %v33_v0  ;;  %s1740_s0 = smov [#allocation5]  }
  0x16   :  { %v31_v9 = vsel %vm27_vm0, %v29_v7, %v23_v5  ;;  %v32_v10 = vsel %vm28_vm1, %v30_v8, %v24_v6  ;;  %s1659_s20 = sshll.u32 %s1740_s0, 4  ;;  %s1660_s20 = int_to_ptr.vmem [resolvable:$true] %s1659_s20 }
  0x17   :  { %v37_v3 = vmul.u32 128, %v34_v1  ;;  %s1709_s21 = scalar_lea.vmem %s1660_s20, 256  ;;  %p1714_p9 = scmp.lt.s32.totalorder %s1660_s20, %s1660_s20 }
  0x18   :  { %p1710_p8 = scmp.ne.s32.totalorder %s1660_s20, %s1709_s21  ;;  %p1715_p10 = scmp.lt.s32.totalorder %s1709_s21, %s1709_s21 }
  0x19   :  { %v1766_v4 = vadd.s32 %v37_v3, %v36_v2 }
  0x1a   :  { %p1716_p11 = por %p1715_p10, %p1714_p9 }
  0x1b   :  { %vm39_vm2 = vcmp.lt.s32.totalorder %v1766_v4, 256 }
  0x1c   :  { %v1771_v11 = vsel %vm39_vm2, %v31_v9, 2147483647  ;;  %v1775_v12 = vsel %vm39_vm2, %v32_v10, 2147483647  ;;  %p1717_p12 = pnand %p1716_p11, %p1710_p8 }
  0x1d   :  { %vm42_vm3 = vcmp.lt.s32.totalorder %v1771_v11, 0  ;;  %vm43_vm4 = vcmp.lt.s32.totalorder %v1775_v12, 0 }
  0x1e   :  { %v44_v14 = vsel %vm42_vm3, 1, %v1738_v13  ;;  %v45_v15 = vsel %vm43_vm4, 1, %v1738_v13 }
  0x1f   :  { %v46_v16 = vrot.slane %v44_v14, 4  ;;  %v52_v17 = vrot.slane %v45_v15, 4 }
  0x21   :  { %v47_v18 = vadd.s32 %v46_v16, %v44_v14  ;;  %v53_v19 = vadd.s32 %v52_v17, %v45_v15 }
  0x23   :  { %v48_v20 = vrot.slane %v47_v18, 2  ;;  %v54_v21 = vrot.slane %v53_v19, 2 }
  0x25   :  { %v49_v22 = vadd.s32 %v48_v20, %v47_v18  ;;  %v55_v23 = vadd.s32 %v54_v21, %v53_v19 }
  0x27   :  { %v50_v24 = vrot.slane %v49_v22, 1  ;;  %v56_v25 = vrot.slane %v55_v23, 1 }
  0x29   :  { %v51_v26 = vadd.s32 %v50_v24, %v49_v22  ;;  %v57_v27 = vadd.s32 %v56_v25, %v55_v23 }
  0x2b   :  { %v59_v28 = vshrl.u32 %v51_v26, 16  ;;  %v58_v29 = vand.u32 65535, %v51_v26  ;;  %v71_v30 = vshrl.u32 %v57_v27, 16  ;;  %v70_v31 = vand.u32 65535, %v57_v27 }
  0x2d   :  { %v61_v32 = vcvt.s32.f32 %v59_v28  ;;  %v60_v33 = vcvt.s32.f32 %v58_v29  ;;  %v73_v34 = vcvt.s32.f32 %v71_v30  ;;  %v72_v35 = vcvt.s32.f32 %v70_v31 }
  0x2f   :  { %64 = vadd.xlane.f32.xlu0 %v61_v32  ;;  %62 = vadd.xlane.f32.xlu1 %v60_v33 }
  0x33   :  { %76 = vadd.xlane.f32.xlu0 %v73_v34  ;;  %74 = vadd.xlane.f32.xlu1 %v72_v35 }
  0xbc   :  { %v65_v36 = vpop.xlane.xlu0 %64  ;;  %v63_v37 = vpop.xlane.xlu1 %62 }
  0xbd   :  { %v67_v38 = vcvt.f32.s32 %v65_v36  ;;  %v66_v39 = vcvt.f32.s32 %v63_v37 }
  0xbf   :  { %v68_v40 = vshll.u32 %v67_v38, 16 }
  0xc0   :  { %v77_v41 = vpop.xlane.xlu0 %76  ;;  %v75_v42 = vpop.xlane.xlu1 %74 }
  0xc1   :  { %v69_v43 = vadd.s32 %v68_v40, %v66_v39  ;;  %v79_v44 = vcvt.f32.s32 %v77_v41  ;;  %v78_v45 = vcvt.f32.s32 %v75_v42 }
  0xc3   :  { %vm82_vm5 = vcmp.le.s32.totalorder %v69_v43, 165  ;;  %v80_v46 = vshll.u32 %v79_v44, 16 }
  0xc4   :  { %v84_v48 = vsel %vm82_vm5, 0, %v1739_v47 }
  0xc5   :  { %v86_v49 = vor.u32 1073741824, %v84_v48  ;;  %v81_v50 = vadd.s32 %v80_v46, %v78_v45 }
  0xc7   :  { %vm88_vm6 = vcmp.lt.s32.totalorder %v1771_v11, %v86_v49  ;;  %vm83_vm7 = vcmp.le.s32.totalorder %v81_v50, 165 }
  0xc8   :  { %v85_v51 = vsel %vm83_vm7, 0, %v1739_v47  ;;  %v90_v52 = vsel %vm88_vm6, 1, %v1738_v13 }
  0xc9   :  { %v87_v53 = vor.u32 1073741824, %v85_v51  ;;  %v92_v54 = vrot.slane %v90_v52, 4 }
  0xcb   :  { %vm89_vm8 = vcmp.lt.s32.totalorder %v1775_v12, %v87_v53  ;;  %v93_v55 = vadd.s32 %v92_v54, %v90_v52 }
  0xcc   :  { %v91_v56 = vsel %vm89_vm8, 1, %v1738_v13 }
  0xcd   :  { %v94_v57 = vrot.slane %v93_v55, 2  ;;  %v98_v58 = vrot.slane %v91_v56, 4 }
  0xcf   :  { %v95_v59 = vadd.s32 %v94_v57, %v93_v55  ;;  %v99_v60 = vadd.s32 %v98_v58, %v91_v56 }
  0xd1   :  { %v96_v61 = vrot.slane %v95_v59, 1  ;;  %v100_v62 = vrot.slane %v99_v60, 2 }
  0xd3   :  { %v97_v63 = vadd.s32 %v96_v61, %v95_v59  ;;  %v101_v0 = vadd.s32 %v100_v62, %v99_v60 }
  0xd5   :  { %v105_v1 = vshrl.u32 %v97_v63, 16  ;;  %v102_v2 = vrot.slane %v101_v0, 1  ;;  %v104_v5 = vand.u32 65535, %v97_v63 }
  0xd7   :  { %v107_v3 = vcvt.s32.f32 %v105_v1  ;;  %v103_v6 = vadd.s32 %v102_v2, %v101_v0  ;;  %v106_v8 = vcvt.s32.f32 %v104_v5 }
  0xd9   :  { %110 = vadd.xlane.f32.xlu0 %v107_v3  ;;  %v117_v7 = vshrl.u32 %v103_v6, 16  ;;  %v116_v10 = vand.u32 65535, %v103_v6 }
  0xdb   :  { %v119_v9 = vcvt.s32.f32 %v117_v7  ;;  %v118_v14 = vcvt.s32.f32 %v116_v10 }
  0xdd   :  { %108 = vadd.xlane.f32.xlu0 %v106_v8  ;;  %122 = vadd.xlane.f32.xlu1 %v119_v9 }
  0xe1   :  { %120 = vadd.xlane.f32.xlu1 %v118_v14 }
 0x166   :  { %v111_v15 = vpop.xlane.xlu0 %110 }
 0x167   :  { %v113_v16 = vcvt.f32.s32 %v111_v15 }
 0x169   :  { %v114_v19 = vshll.u32 %v113_v16, 16 }
 0x16a   :  { %v109_v17 = vpop.xlane.xlu0 %108  ;;  %v123_v18 = vpop.xlane.xlu1 %122 }
 0x16b   :  { %v112_v20 = vcvt.f32.s32 %v109_v17  ;;  %v125_v21 = vcvt.f32.s32 %v123_v18 }
 0x16d   :  { %v115_v22 = vadd.s32 %v114_v19, %v112_v20  ;;  %v126_v24 = vshll.u32 %v125_v21, 16 }
 0x16e   :  { %v121_v23 = vpop.xlane.xlu1 %120 }
 0x16f   :  { %vm128_vm9 = vcmp.le.s32.totalorder %v115_v22, 165  ;;  %v124_v25 = vcvt.f32.s32 %v121_v23 }
 0x170   :  { %v130_v26 = vsel %vm128_vm9, %v86_v49, %v84_v48 }
 0x171   :  { %v132_v27 = vor.u32 536870912, %v130_v26  ;;  %v127_v28 = vadd.s32 %v126_v24, %v124_v25 }
 0x173   :  { %vm134_vm10 = vcmp.lt.s32.totalorder %v1771_v11, %v132_v27  ;;  %vm129_vm11 = vcmp.le.s32.totalorder %v127_v28, 165 }
 0x174   :  { %v131_v29 = vsel %vm129_vm11, %v87_v53, %v85_v51  ;;  %v136_v30 = vsel %vm134_vm10, 1, %v1738_v13 }
 0x175   :  { %v133_v31 = vor.u32 536870912, %v131_v29  ;;  %v138_v32 = vrot.slane %v136_v30, 4 }
 0x177   :  { %vm135_vm12 = vcmp.lt.s32.totalorder %v1775_v12, %v133_v31  ;;  %v139_v33 = vadd.s32 %v138_v32, %v136_v30 }
 0x178   :  { %v137_v34 = vsel %vm135_vm12, 1, %v1738_v13 }
 0x179   :  { %v140_v35 = vrot.slane %v139_v33, 2  ;;  %v144_v36 = vrot.slane %v137_v34, 4 }
 0x17b   :  { %v141_v37 = vadd.s32 %v140_v35, %v139_v33  ;;  %v145_v38 = vadd.s32 %v144_v36, %v137_v34 }
 0x17d   :  { %v142_v39 = vrot.slane %v141_v37, 1  ;;  %v146_v40 = vrot.slane %v145_v38, 2 }
 0x17f   :  { %v143_v41 = vadd.s32 %v142_v39, %v141_v37  ;;  %v147_v42 = vadd.s32 %v146_v40, %v145_v38 }
 0x181   :  { %v151_v43 = vshrl.u32 %v143_v41, 16  ;;  %v148_v44 = vrot.slane %v147_v42, 1  ;;  %v150_v46 = vand.u32 65535, %v143_v41 }
 0x183   :  { %v153_v45 = vcvt.s32.f32 %v151_v43  ;;  %v149_v47 = vadd.s32 %v148_v44, %v147_v42  ;;  %v152_v49 = vcvt.s32.f32 %v150_v46 }
 0x185   :  { %156 = vadd.xlane.f32.xlu0 %v153_v45  ;;  %v163_v48 = vshrl.u32 %v149_v47, 16  ;;  %v162_v51 = vand.u32 65535, %v149_v47 }
 0x187   :  { %v165_v50 = vcvt.s32.f32 %v163_v48  ;;  %v164_v52 = vcvt.s32.f32 %v162_v51 }
 0x189   :  { %154 = vadd.xlane.f32.xlu0 %v152_v49  ;;  %168 = vadd.xlane.f32.xlu1 %v165_v50 }
 0x18d   :  { %166 = vadd.xlane.f32.xlu1 %v164_v52 }
 0x212   :  { %v157_v53 = vpop.xlane.xlu0 %156 }
 0x213   :  { %v159_v54 = vcvt.f32.s32 %v157_v53 }
 0x215   :  { %v160_v57 = vshll.u32 %v159_v54, 16 }
 0x216   :  { %v155_v55 = vpop.xlane.xlu0 %154  ;;  %v169_v56 = vpop.xlane.xlu1 %168 }
 0x217   :  { %v158_v58 = vcvt.f32.s32 %v155_v55  ;;  %v171_v59 = vcvt.f32.s32 %v169_v56 }
 0x219   :  { %v161_v60 = vadd.s32 %v160_v57, %v158_v58  ;;  %v172_v62 = vshll.u32 %v171_v59, 16 }
 0x21a   :  { %v167_v61 = vpop.xlane.xlu1 %166 }
 0x21b   :  { %vm174_vm13 = vcmp.le.s32.totalorder %v161_v60, 165  ;;  %v170_v63 = vcvt.f32.s32 %v167_v61 }
 0x21c   :  { %v176_v0 = vsel %vm174_vm13, %v132_v27, %v130_v26 }
 0x21d   :  { %v178_v1 = vor.u32 268435456, %v176_v0  ;;  %v173_v2 = vadd.s32 %v172_v62, %v170_v63 }
 0x21f   :  { %vm180_vm14 = vcmp.lt.s32.totalorder %v1771_v11, %v178_v1  ;;  %vm175_vm15 = vcmp.le.s32.totalorder %v173_v2, 165 }
 0x220   :  { %v177_v3 = vsel %vm175_vm15, %v133_v31, %v131_v29  ;;  %v182_v5 = vsel %vm180_vm14, 1, %v1738_v13 }
 0x221   :  { %v179_v6 = vor.u32 268435456, %v177_v3  ;;  %v184_v7 = vrot.slane %v182_v5, 4 }
 0x223   :  { %vm181_vm0 = vcmp.lt.s32.totalorder %v1775_v12, %v179_v6  ;;  %v185_v8 = vadd.s32 %v184_v7, %v182_v5 }
 0x224   :  { %v183_v9 = vsel %vm181_vm0, 1, %v1738_v13 }
 0x225   :  { %v186_v10 = vrot.slane %v185_v8, 2  ;;  %v190_v14 = vrot.slane %v183_v9, 4 }
 0x227   :  { %v187_v15 = vadd.s32 %v186_v10, %v185_v8  ;;  %v191_v16 = vadd.s32 %v190_v14, %v183_v9 }
 0x229   :  { %v188_v17 = vrot.slane %v187_v15, 1  ;;  %v192_v18 = vrot.slane %v191_v16, 2 }
 0x22b   :  { %v189_v19 = vadd.s32 %v188_v17, %v187_v15  ;;  %v193_v20 = vadd.s32 %v192_v18, %v191_v16 }
 0x22d   :  { %v197_v21 = vshrl.u32 %v189_v19, 16  ;;  %v194_v22 = vrot.slane %v193_v20, 1  ;;  %v196_v24 = vand.u32 65535, %v189_v19 }
 0x22f   :  { %v199_v23 = vcvt.s32.f32 %v197_v21  ;;  %v195_v25 = vadd.s32 %v194_v22, %v193_v20  ;;  %v198_v27 = vcvt.s32.f32 %v196_v24 }
 0x231   :  { %202 = vadd.xlane.f32.xlu0 %v199_v23  ;;  %v209_v26 = vshrl.u32 %v195_v25, 16  ;;  %v208_v29 = vand.u32 65535, %v195_v25 }
 0x233   :  { %v211_v28 = vcvt.s32.f32 %v209_v26  ;;  %v210_v30 = vcvt.s32.f32 %v208_v29 }
 0x235   :  { %200 = vadd.xlane.f32.xlu0 %v198_v27  ;;  %214 = vadd.xlane.f32.xlu1 %v211_v28 }
 0x239   :  { %212 = vadd.xlane.f32.xlu1 %v210_v30 }
 0x2be   :  { %v203_v31 = vpop.xlane.xlu0 %202 }
 0x2bf   :  { %v205_v32 = vcvt.f32.s32 %v203_v31 }
 0x2c1   :  { %v206_v35 = vshll.u32 %v205_v32, 16 }
 0x2c2   :  { %v201_v33 = vpop.xlane.xlu0 %200  ;;  %v215_v34 = vpop.xlane.xlu1 %214 }
 0x2c3   :  { %v204_v36 = vcvt.f32.s32 %v201_v33  ;;  %v217_v37 = vcvt.f32.s32 %v215_v34 }
 0x2c5   :  { %v207_v38 = vadd.s32 %v206_v35, %v204_v36  ;;  %v218_v40 = vshll.u32 %v217_v37, 16 }
 0x2c6   :  { %v213_v39 = vpop.xlane.xlu1 %212 }
 0x2c7   :  { %vm220_vm1 = vcmp.le.s32.totalorder %v207_v38, 165  ;;  %v216_v41 = vcvt.f32.s32 %v213_v39 }
 0x2c8   :  { %v222_v42 = vsel %vm220_vm1, %v178_v1, %v176_v0 }
 0x2c9   :  { %v224_v43 = vor.u32 134217728, %v222_v42  ;;  %v219_v44 = vadd.s32 %v218_v40, %v216_v41 }
 0x2cb   :  { %vm226_vm3 = vcmp.lt.s32.totalorder %v1771_v11, %v224_v43  ;;  %vm221_vm4 = vcmp.le.s32.totalorder %v219_v44, 165 }
 0x2cc   :  { %v223_v45 = vsel %vm221_vm4, %v179_v6, %v177_v3  ;;  %v228_v46 = vsel %vm226_vm3, 1, %v1738_v13 }
 0x2cd   :  { %v225_v47 = vor.u32 134217728, %v223_v45  ;;  %v230_v48 = vrot.slane %v228_v46, 4 }
 0x2cf   :  { %vm227_vm5 = vcmp.lt.s32.totalorder %v1775_v12, %v225_v47  ;;  %v231_v49 = vadd.s32 %v230_v48, %v228_v46 }
 0x2d0   :  { %v229_v50 = vsel %vm227_vm5, 1, %v1738_v13 }
 0x2d1   :  { %v232_v51 = vrot.slane %v231_v49, 2  ;;  %v236_v52 = vrot.slane %v229_v50, 4 }
 0x2d3   :  { %v233_v53 = vadd.s32 %v232_v51, %v231_v49  ;;  %v237_v54 = vadd.s32 %v236_v52, %v229_v50 }
 0x2d5   :  { %v234_v55 = vrot.slane %v233_v53, 1  ;;  %v238_v56 = vrot.slane %v237_v54, 2 }
 0x2d7   :  { %v235_v57 = vadd.s32 %v234_v55, %v233_v53  ;;  %v239_v58 = vadd.s32 %v238_v56, %v237_v54 }
 0x2d9   :  { %v243_v59 = vshrl.u32 %v235_v57, 16  ;;  %v240_v60 = vrot.slane %v239_v58, 1  ;;  %v242_v62 = vand.u32 65535, %v235_v57 }
 0x2db   :  { %v245_v61 = vcvt.s32.f32 %v243_v59  ;;  %v241_v63 = vadd.s32 %v240_v60, %v239_v58  ;;  %v244_v1 = vcvt.s32.f32 %v242_v62 }
 0x2dd   :  { %248 = vadd.xlane.f32.xlu0 %v245_v61  ;;  %v255_v0 = vshrl.u32 %v241_v63, 16  ;;  %v254_v3 = vand.u32 65535, %v241_v63 }
 0x2df   :  { %v257_v2 = vcvt.s32.f32 %v255_v0  ;;  %v256_v5 = vcvt.s32.f32 %v254_v3 }
 0x2e1   :  { %246 = vadd.xlane.f32.xlu0 %v244_v1  ;;  %260 = vadd.xlane.f32.xlu1 %v257_v2 }
 0x2e5   :  { %258 = vadd.xlane.f32.xlu1 %v256_v5 }
 0x36a   :  { %v249_v6 = vpop.xlane.xlu0 %248 }
 0x36b   :  { %v251_v7 = vcvt.f32.s32 %v249_v6 }
 0x36d   :  { %v252_v10 = vshll.u32 %v251_v7, 16 }
 0x36e   :  { %v247_v8 = vpop.xlane.xlu0 %246  ;;  %v261_v9 = vpop.xlane.xlu1 %260 }
 0x36f   :  { %v250_v14 = vcvt.f32.s32 %v247_v8  ;;  %v263_v15 = vcvt.f32.s32 %v261_v9 }
 0x371   :  { %v253_v16 = vadd.s32 %v252_v10, %v250_v14  ;;  %v264_v18 = vshll.u32 %v263_v15, 16 }
 0x372   :  { %v259_v17 = vpop.xlane.xlu1 %258 }
 0x373   :  { %vm266_vm6 = vcmp.le.s32.totalorder %v253_v16, 165  ;;  %v262_v19 = vcvt.f32.s32 %v259_v17 }
 0x374   :  { %v268_v20 = vsel %vm266_vm6, %v224_v43, %v222_v42 }
 0x375   :  { %v270_v21 = vor.u32 67108864, %v268_v20  ;;  %v265_v22 = vadd.s32 %v264_v18, %v262_v19 }
 0x377   :  { %vm272_vm7 = vcmp.lt.s32.totalorder %v1771_v11, %v270_v21  ;;  %vm267_vm8 = vcmp.le.s32.totalorder %v265_v22, 165 }
 0x378   :  { %v269_v23 = vsel %vm267_vm8, %v225_v47, %v223_v45  ;;  %v274_v24 = vsel %vm272_vm7, 1, %v1738_v13 }
 0x379   :  { %v271_v25 = vor.u32 67108864, %v269_v23  ;;  %v276_v26 = vrot.slane %v274_v24, 4 }
 0x37b   :  { %vm273_vm9 = vcmp.lt.s32.totalorder %v1775_v12, %v271_v25  ;;  %v277_v27 = vadd.s32 %v276_v26, %v274_v24 }
 0x37c   :  { %v275_v28 = vsel %vm273_vm9, 1, %v1738_v13 }
 0x37d   :  { %v278_v29 = vrot.slane %v277_v27, 2  ;;  %v282_v30 = vrot.slane %v275_v28, 4 }
 0x37f   :  { %v279_v31 = vadd.s32 %v278_v29, %v277_v27  ;;  %v283_v32 = vadd.s32 %v282_v30, %v275_v28 }
 0x381   :  { %v280_v33 = vrot.slane %v279_v31, 1  ;;  %v284_v34 = vrot.slane %v283_v32, 2 }
 0x383   :  { %v281_v35 = vadd.s32 %v280_v33, %v279_v31  ;;  %v285_v36 = vadd.s32 %v284_v34, %v283_v32 }
 0x385   :  { %v289_v37 = vshrl.u32 %v281_v35, 16  ;;  %v286_v38 = vrot.slane %v285_v36, 1  ;;  %v288_v40 = vand.u32 65535, %v281_v35 }
 0x387   :  { %v291_v39 = vcvt.s32.f32 %v289_v37  ;;  %v287_v41 = vadd.s32 %v286_v38, %v285_v36  ;;  %v290_v43 = vcvt.s32.f32 %v288_v40 }
 0x389   :  { %294 = vadd.xlane.f32.xlu0 %v291_v39  ;;  %v301_v42 = vshrl.u32 %v287_v41, 16  ;;  %v300_v45 = vand.u32 65535, %v287_v41 }
 0x38b   :  { %v303_v44 = vcvt.s32.f32 %v301_v42  ;;  %v302_v46 = vcvt.s32.f32 %v300_v45 }
 0x38d   :  { %292 = vadd.xlane.f32.xlu0 %v290_v43  ;;  %306 = vadd.xlane.f32.xlu1 %v303_v44 }
 0x391   :  { %304 = vadd.xlane.f32.xlu1 %v302_v46 }
 0x416   :  { %v295_v47 = vpop.xlane.xlu0 %294 }
 0x417   :  { %v297_v48 = vcvt.f32.s32 %v295_v47 }
 0x419   :  { %v298_v51 = vshll.u32 %v297_v48, 16 }
 0x41a   :  { %v293_v49 = vpop.xlane.xlu0 %292  ;;  %v307_v50 = vpop.xlane.xlu1 %306 }
 0x41b   :  { %v296_v52 = vcvt.f32.s32 %v293_v49  ;;  %v309_v53 = vcvt.f32.s32 %v307_v50 }
 0x41d   :  { %v299_v54 = vadd.s32 %v298_v51, %v296_v52  ;;  %v310_v56 = vshll.u32 %v309_v53, 16 }
 0x41e   :  { %v305_v55 = vpop.xlane.xlu1 %304 }
 0x41f   :  { %vm312_vm10 = vcmp.le.s32.totalorder %v299_v54, 165  ;;  %v308_v57 = vcvt.f32.s32 %v305_v55 }
 0x420   :  { %v314_v58 = vsel %vm312_vm10, %v270_v21, %v268_v20 }
 0x421   :  { %v316_v59 = vor.u32 33554432, %v314_v58  ;;  %v311_v60 = vadd.s32 %v310_v56, %v308_v57 }
 0x423   :  { %vm318_vm11 = vcmp.lt.s32.totalorder %v1771_v11, %v316_v59  ;;  %vm313_vm12 = vcmp.le.s32.totalorder %v311_v60, 165 }
 0x424   :  { %v315_v61 = vsel %vm313_vm12, %v271_v25, %v269_v23  ;;  %v320_v62 = vsel %vm318_vm11, 1, %v1738_v13 }
 0x425   :  { %v317_v63 = vor.u32 33554432, %v315_v61  ;;  %v322_v0 = vrot.slane %v320_v62, 4 }
 0x427   :  { %vm319_vm13 = vcmp.lt.s32.totalorder %v1775_v12, %v317_v63  ;;  %v323_v1 = vadd.s32 %v322_v0, %v320_v62 }
 0x428   :  { %v321_v2 = vsel %vm319_vm13, 1, %v1738_v13 }
 0x429   :  { %v324_v3 = vrot.slane %v323_v1, 2  ;;  %v328_v5 = vrot.slane %v321_v2, 4 }
 0x42b   :  { %v325_v6 = vadd.s32 %v324_v3, %v323_v1  ;;  %v329_v7 = vadd.s32 %v328_v5, %v321_v2 }
 0x42d   :  { %v326_v8 = vrot.slane %v325_v6, 1  ;;  %v330_v9 = vrot.slane %v329_v7, 2 }
 0x42f   :  { %v327_v10 = vadd.s32 %v326_v8, %v325_v6  ;;  %v331_v14 = vadd.s32 %v330_v9, %v329_v7 }
 0x431   :  { %v335_v15 = vshrl.u32 %v327_v10, 16  ;;  %v332_v16 = vrot.slane %v331_v14, 1  ;;  %v334_v18 = vand.u32 65535, %v327_v10 }
 0x433   :  { %v337_v17 = vcvt.s32.f32 %v335_v15  ;;  %v333_v19 = vadd.s32 %v332_v16, %v331_v14  ;;  %v336_v21 = vcvt.s32.f32 %v334_v18 }
 0x435   :  { %340 = vadd.xlane.f32.xlu0 %v337_v17  ;;  %v347_v20 = vshrl.u32 %v333_v19, 16  ;;  %v346_v23 = vand.u32 65535, %v333_v19 }
 0x437   :  { %v349_v22 = vcvt.s32.f32 %v347_v20  ;;  %v348_v24 = vcvt.s32.f32 %v346_v23 }
 0x439   :  { %338 = vadd.xlane.f32.xlu0 %v336_v21  ;;  %352 = vadd.xlane.f32.xlu1 %v349_v22 }
 0x43d   :  { %350 = vadd.xlane.f32.xlu1 %v348_v24 }
 0x4c2   :  { %v341_v25 = vpop.xlane.xlu0 %340 }
 0x4c3   :  { %v343_v26 = vcvt.f32.s32 %v341_v25 }
 0x4c5   :  { %v344_v29 = vshll.u32 %v343_v26, 16 }
 0x4c6   :  { %v339_v27 = vpop.xlane.xlu0 %338  ;;  %v353_v28 = vpop.xlane.xlu1 %352 }
 0x4c7   :  { %v342_v30 = vcvt.f32.s32 %v339_v27  ;;  %v355_v31 = vcvt.f32.s32 %v353_v28 }
 0x4c9   :  { %v345_v32 = vadd.s32 %v344_v29, %v342_v30  ;;  %v356_v34 = vshll.u32 %v355_v31, 16 }
 0x4ca   :  { %v351_v33 = vpop.xlane.xlu1 %350 }
 0x4cb   :  { %vm358_vm14 = vcmp.le.s32.totalorder %v345_v32, 165  ;;  %v354_v35 = vcvt.f32.s32 %v351_v33 }
 0x4cc   :  { %v360_v36 = vsel %vm358_vm14, %v316_v59, %v314_v58 }
 0x4cd   :  { %v362_v37 = vor.u32 16777216, %v360_v36  ;;  %v357_v38 = vadd.s32 %v356_v34, %v354_v35 }
 0x4cf   :  { %vm364_vm15 = vcmp.lt.s32.totalorder %v1771_v11, %v362_v37  ;;  %vm359_vm0 = vcmp.le.s32.totalorder %v357_v38, 165 }
 0x4d0   :  { %v361_v39 = vsel %vm359_vm0, %v317_v63, %v315_v61  ;;  %v366_v40 = vsel %vm364_vm15, 1, %v1738_v13 }
 0x4d1   :  { %v363_v41 = vor.u32 16777216, %v361_v39  ;;  %v368_v42 = vrot.slane %v366_v40, 4 }
 0x4d3   :  { %vm365_vm1 = vcmp.lt.s32.totalorder %v1775_v12, %v363_v41  ;;  %v369_v43 = vadd.s32 %v368_v42, %v366_v40 }
 0x4d4   :  { %v367_v44 = vsel %vm365_vm1, 1, %v1738_v13 }
 0x4d5   :  { %v370_v45 = vrot.slane %v369_v43, 2  ;;  %v374_v46 = vrot.slane %v367_v44, 4 }
 0x4d7   :  { %v371_v47 = vadd.s32 %v370_v45, %v369_v43  ;;  %v375_v48 = vadd.s32 %v374_v46, %v367_v44 }
 0x4d9   :  { %v372_v49 = vrot.slane %v371_v47, 1  ;;  %v376_v50 = vrot.slane %v375_v48, 2 }
 0x4db   :  { %v373_v51 = vadd.s32 %v372_v49, %v371_v47  ;;  %v377_v52 = vadd.s32 %v376_v50, %v375_v48 }
 0x4dd   :  { %v381_v53 = vshrl.u32 %v373_v51, 16  ;;  %v378_v54 = vrot.slane %v377_v52, 1  ;;  %v380_v56 = vand.u32 65535, %v373_v51 }
 0x4df   :  { %v383_v55 = vcvt.s32.f32 %v381_v53  ;;  %v379_v57 = vadd.s32 %v378_v54, %v377_v52  ;;  %v382_v59 = vcvt.s32.f32 %v380_v56 }
 0x4e1   :  { %386 = vadd.xlane.f32.xlu0 %v383_v55  ;;  %v393_v58 = vshrl.u32 %v379_v57, 16  ;;  %v392_v61 = vand.u32 65535, %v379_v57 }
 0x4e3   :  { %v395_v60 = vcvt.s32.f32 %v393_v58  ;;  %v394_v62 = vcvt.s32.f32 %v392_v61 }
 0x4e5   :  { %384 = vadd.xlane.f32.xlu0 %v382_v59  ;;  %398 = vadd.xlane.f32.xlu1 %v395_v60 }
 0x4e9   :  { %396 = vadd.xlane.f32.xlu1 %v394_v62 }
 0x56e   :  { %v387_v63 = vpop.xlane.xlu0 %386 }
 0x56f   :  { %v389_v0 = vcvt.f32.s32 %v387_v63 }
 0x571   :  { %v390_v3 = vshll.u32 %v389_v0, 16 }
 0x572   :  { %v385_v1 = vpop.xlane.xlu0 %384  ;;  %v399_v2 = vpop.xlane.xlu1 %398 }
 0x573   :  { %v388_v5 = vcvt.f32.s32 %v385_v1  ;;  %v401_v6 = vcvt.f32.s32 %v399_v2 }
 0x575   :  { %v391_v7 = vadd.s32 %v390_v3, %v388_v5  ;;  %v402_v9 = vshll.u32 %v401_v6, 16 }
 0x576   :  { %v397_v8 = vpop.xlane.xlu1 %396 }
 0x577   :  { %vm404_vm3 = vcmp.le.s32.totalorder %v391_v7, 165  ;;  %v400_v10 = vcvt.f32.s32 %v397_v8 }
 0x578   :  { %v406_v14 = vsel %vm404_vm3, %v362_v37, %v360_v36 }
 0x579   :  { %v408_v15 = vor.u32 8388608, %v406_v14  ;;  %v403_v16 = vadd.s32 %v402_v9, %v400_v10 }
 0x57b   :  { %vm410_vm4 = vcmp.lt.s32.totalorder %v1771_v11, %v408_v15  ;;  %vm405_vm5 = vcmp.le.s32.totalorder %v403_v16, 165 }
 0x57c   :  { %v407_v17 = vsel %vm405_vm5, %v363_v41, %v361_v39  ;;  %v412_v18 = vsel %vm410_vm4, 1, %v1738_v13 }
 0x57d   :  { %v409_v19 = vor.u32 8388608, %v407_v17  ;;  %v414_v20 = vrot.slane %v412_v18, 4 }
 0x57f   :  { %vm411_vm6 = vcmp.lt.s32.totalorder %v1775_v12, %v409_v19  ;;  %v415_v21 = vadd.s32 %v414_v20, %v412_v18 }
 0x580   :  { %v413_v22 = vsel %vm411_vm6, 1, %v1738_v13 }
 0x581   :  { %v416_v23 = vrot.slane %v415_v21, 2  ;;  %v420_v24 = vrot.slane %v413_v22, 4 }
 0x583   :  { %v417_v25 = vadd.s32 %v416_v23, %v415_v21  ;;  %v421_v26 = vadd.s32 %v420_v24, %v413_v22 }
 0x585   :  { %v418_v27 = vrot.slane %v417_v25, 1  ;;  %v422_v28 = vrot.slane %v421_v26, 2 }
 0x587   :  { %v419_v29 = vadd.s32 %v418_v27, %v417_v25  ;;  %v423_v30 = vadd.s32 %v422_v28, %v421_v26 }
 0x589   :  { %v427_v31 = vshrl.u32 %v419_v29, 16  ;;  %v424_v32 = vrot.slane %v423_v30, 1  ;;  %v426_v34 = vand.u32 65535, %v419_v29 }
 0x58b   :  { %v429_v33 = vcvt.s32.f32 %v427_v31  ;;  %v425_v35 = vadd.s32 %v424_v32, %v423_v30  ;;  %v428_v37 = vcvt.s32.f32 %v426_v34 }
 0x58d   :  { %432 = vadd.xlane.f32.xlu0 %v429_v33  ;;  %v439_v36 = vshrl.u32 %v425_v35, 16  ;;  %v438_v39 = vand.u32 65535, %v425_v35 }
 0x58f   :  { %v441_v38 = vcvt.s32.f32 %v439_v36  ;;  %v440_v40 = vcvt.s32.f32 %v438_v39 }
 0x591   :  { %430 = vadd.xlane.f32.xlu0 %v428_v37  ;;  %444 = vadd.xlane.f32.xlu1 %v441_v38 }
 0x595   :  { %442 = vadd.xlane.f32.xlu1 %v440_v40 }
 0x61a   :  { %v433_v41 = vpop.xlane.xlu0 %432 }
 0x61b   :  { %v435_v42 = vcvt.f32.s32 %v433_v41 }
 0x61d   :  { %v436_v45 = vshll.u32 %v435_v42, 16 }
 0x61e   :  { %v431_v43 = vpop.xlane.xlu0 %430  ;;  %v445_v44 = vpop.xlane.xlu1 %444 }
 0x61f   :  { %v434_v46 = vcvt.f32.s32 %v431_v43  ;;  %v447_v47 = vcvt.f32.s32 %v445_v44 }
 0x621   :  { %v437_v48 = vadd.s32 %v436_v45, %v434_v46  ;;  %v448_v50 = vshll.u32 %v447_v47, 16 }
 0x622   :  { %v443_v49 = vpop.xlane.xlu1 %442 }
 0x623   :  { %vm450_vm7 = vcmp.le.s32.totalorder %v437_v48, 165  ;;  %v446_v51 = vcvt.f32.s32 %v443_v49 }
 0x624   :  { %v452_v52 = vsel %vm450_vm7, %v408_v15, %v406_v14 }
 0x625   :  { %v454_v53 = vor.u32 4194304, %v452_v52  ;;  %v449_v54 = vadd.s32 %v448_v50, %v446_v51 }
 0x627   :  { %vm456_vm8 = vcmp.lt.s32.totalorder %v1771_v11, %v454_v53  ;;  %vm451_vm9 = vcmp.le.s32.totalorder %v449_v54, 165 }
 0x628   :  { %v453_v55 = vsel %vm451_vm9, %v409_v19, %v407_v17  ;;  %v458_v56 = vsel %vm456_vm8, 1, %v1738_v13 }
 0x629   :  { %v455_v57 = vor.u32 4194304, %v453_v55  ;;  %v460_v58 = vrot.slane %v458_v56, 4 }
 0x62b   :  { %vm457_vm10 = vcmp.lt.s32.totalorder %v1775_v12, %v455_v57  ;;  %v461_v59 = vadd.s32 %v460_v58, %v458_v56 }
 0x62c   :  { %v459_v60 = vsel %vm457_vm10, 1, %v1738_v13 }
 0x62d   :  { %v462_v61 = vrot.slane %v461_v59, 2  ;;  %v466_v62 = vrot.slane %v459_v60, 4 }
 0x62f   :  { %v463_v63 = vadd.s32 %v462_v61, %v461_v59  ;;  %v467_v0 = vadd.s32 %v466_v62, %v459_v60 }
 0x631   :  { %v464_v1 = vrot.slane %v463_v63, 1  ;;  %v468_v2 = vrot.slane %v467_v0, 2 }
 0x633   :  { %v465_v3 = vadd.s32 %v464_v1, %v463_v63  ;;  %v469_v5 = vadd.s32 %v468_v2, %v467_v0 }
 0x635   :  { %v473_v6 = vshrl.u32 %v465_v3, 16  ;;  %v470_v7 = vrot.slane %v469_v5, 1  ;;  %v472_v9 = vand.u32 65535, %v465_v3 }
 0x637   :  { %v475_v8 = vcvt.s32.f32 %v473_v6  ;;  %v471_v10 = vadd.s32 %v470_v7, %v469_v5  ;;  %v474_v15 = vcvt.s32.f32 %v472_v9 }
 0x639   :  { %478 = vadd.xlane.f32.xlu0 %v475_v8  ;;  %v485_v14 = vshrl.u32 %v471_v10, 16  ;;  %v484_v17 = vand.u32 65535, %v471_v10 }
 0x63b   :  { %v487_v16 = vcvt.s32.f32 %v485_v14  ;;  %v486_v18 = vcvt.s32.f32 %v484_v17 }
 0x63d   :  { %476 = vadd.xlane.f32.xlu0 %v474_v15  ;;  %490 = vadd.xlane.f32.xlu1 %v487_v16 }
 0x641   :  { %488 = vadd.xlane.f32.xlu1 %v486_v18 }
 0x6c6   :  { %v479_v19 = vpop.xlane.xlu0 %478 }
 0x6c7   :  { %v481_v20 = vcvt.f32.s32 %v479_v19 }
 0x6c9   :  { %v482_v23 = vshll.u32 %v481_v20, 16 }
 0x6ca   :  { %v477_v21 = vpop.xlane.xlu0 %476  ;;  %v491_v22 = vpop.xlane.xlu1 %490 }
 0x6cb   :  { %v480_v24 = vcvt.f32.s32 %v477_v21  ;;  %v493_v25 = vcvt.f32.s32 %v491_v22 }
 0x6cd   :  { %v483_v26 = vadd.s32 %v482_v23, %v480_v24  ;;  %v494_v28 = vshll.u32 %v493_v25, 16 }
 0x6ce   :  { %v489_v27 = vpop.xlane.xlu1 %488 }
 0x6cf   :  { %vm496_vm11 = vcmp.le.s32.totalorder %v483_v26, 165  ;;  %v492_v29 = vcvt.f32.s32 %v489_v27 }
 0x6d0   :  { %v498_v30 = vsel %vm496_vm11, %v454_v53, %v452_v52 }
 0x6d1   :  { %v500_v31 = vor.u32 2097152, %v498_v30  ;;  %v495_v32 = vadd.s32 %v494_v28, %v492_v29 }
 0x6d3   :  { %vm502_vm12 = vcmp.lt.s32.totalorder %v1771_v11, %v500_v31  ;;  %vm497_vm13 = vcmp.le.s32.totalorder %v495_v32, 165 }
 0x6d4   :  { %v499_v33 = vsel %vm497_vm13, %v455_v57, %v453_v55  ;;  %v504_v34 = vsel %vm502_vm12, 1, %v1738_v13 }
 0x6d5   :  { %v501_v35 = vor.u32 2097152, %v499_v33  ;;  %v506_v36 = vrot.slane %v504_v34, 4 }
 0x6d7   :  { %vm503_vm14 = vcmp.lt.s32.totalorder %v1775_v12, %v501_v35  ;;  %v507_v37 = vadd.s32 %v506_v36, %v504_v34 }
 0x6d8   :  { %v505_v38 = vsel %vm503_vm14, 1, %v1738_v13 }
 0x6d9   :  { %v508_v39 = vrot.slane %v507_v37, 2  ;;  %v512_v40 = vrot.slane %v505_v38, 4 }
 0x6db   :  { %v509_v41 = vadd.s32 %v508_v39, %v507_v37  ;;  %v513_v42 = vadd.s32 %v512_v40, %v505_v38 }
 0x6dd   :  { %v510_v43 = vrot.slane %v509_v41, 1  ;;  %v514_v44 = vrot.slane %v513_v42, 2 }
 0x6df   :  { %v511_v45 = vadd.s32 %v510_v43, %v509_v41  ;;  %v515_v46 = vadd.s32 %v514_v44, %v513_v42 }
 0x6e1   :  { %v519_v47 = vshrl.u32 %v511_v45, 16  ;;  %v516_v48 = vrot.slane %v515_v46, 1  ;;  %v518_v50 = vand.u32 65535, %v511_v45 }
 0x6e3   :  { %v521_v49 = vcvt.s32.f32 %v519_v47  ;;  %v517_v51 = vadd.s32 %v516_v48, %v515_v46  ;;  %v520_v53 = vcvt.s32.f32 %v518_v50 }
 0x6e5   :  { %524 = vadd.xlane.f32.xlu0 %v521_v49  ;;  %v531_v52 = vshrl.u32 %v517_v51, 16  ;;  %v530_v55 = vand.u32 65535, %v517_v51 }
 0x6e7   :  { %v533_v54 = vcvt.s32.f32 %v531_v52  ;;  %v532_v56 = vcvt.s32.f32 %v530_v55 }
 0x6e9   :  { %522 = vadd.xlane.f32.xlu0 %v520_v53  ;;  %536 = vadd.xlane.f32.xlu1 %v533_v54 }
 0x6ed   :  { %534 = vadd.xlane.f32.xlu1 %v532_v56 }
 0x772   :  { %v525_v57 = vpop.xlane.xlu0 %524 }
 0x773   :  { %v527_v58 = vcvt.f32.s32 %v525_v57 }
 0x775   :  { %v528_v61 = vshll.u32 %v527_v58, 16 }
 0x776   :  { %v523_v59 = vpop.xlane.xlu0 %522  ;;  %v537_v60 = vpop.xlane.xlu1 %536 }
 0x777   :  { %v526_v62 = vcvt.f32.s32 %v523_v59  ;;  %v539_v63 = vcvt.f32.s32 %v537_v60 }
 0x779   :  { %v529_v0 = vadd.s32 %v528_v61, %v526_v62  ;;  %v540_v2 = vshll.u32 %v539_v63, 16 }
 0x77a   :  { %v535_v1 = vpop.xlane.xlu1 %534 }
 0x77b   :  { %vm542_vm15 = vcmp.le.s32.totalorder %v529_v0, 165  ;;  %v538_v3 = vcvt.f32.s32 %v535_v1 }
 0x77c   :  { %v544_v5 = vsel %vm542_vm15, %v500_v31, %v498_v30 }
 0x77d   :  { %v546_v6 = vor.u32 1048576, %v544_v5  ;;  %v541_v7 = vadd.s32 %v540_v2, %v538_v3 }
 0x77f   :  { %vm548_vm0 = vcmp.lt.s32.totalorder %v1771_v11, %v546_v6  ;;  %vm543_vm1 = vcmp.le.s32.totalorder %v541_v7, 165 }
 0x780   :  { %v545_v8 = vsel %vm543_vm1, %v501_v35, %v499_v33  ;;  %v550_v9 = vsel %vm548_vm0, 1, %v1738_v13 }
 0x781   :  { %v547_v10 = vor.u32 1048576, %v545_v8  ;;  %v552_v14 = vrot.slane %v550_v9, 4 }
 0x783   :  { %vm549_vm3 = vcmp.lt.s32.totalorder %v1775_v12, %v547_v10  ;;  %v553_v15 = vadd.s32 %v552_v14, %v550_v9 }
 0x784   :  { %v551_v16 = vsel %vm549_vm3, 1, %v1738_v13 }
 0x785   :  { %v554_v17 = vrot.slane %v553_v15, 2  ;;  %v558_v18 = vrot.slane %v551_v16, 4 }
 0x787   :  { %v555_v19 = vadd.s32 %v554_v17, %v553_v15  ;;  %v559_v20 = vadd.s32 %v558_v18, %v551_v16 }
 0x789   :  { %v556_v21 = vrot.slane %v555_v19, 1  ;;  %v560_v22 = vrot.slane %v559_v20, 2 }
 0x78b   :  { %v557_v23 = vadd.s32 %v556_v21, %v555_v19  ;;  %v561_v24 = vadd.s32 %v560_v22, %v559_v20 }
 0x78d   :  { %v565_v25 = vshrl.u32 %v557_v23, 16  ;;  %v562_v26 = vrot.slane %v561_v24, 1  ;;  %v564_v28 = vand.u32 65535, %v557_v23 }
 0x78f   :  { %v567_v27 = vcvt.s32.f32 %v565_v25  ;;  %v563_v29 = vadd.s32 %v562_v26, %v561_v24  ;;  %v566_v31 = vcvt.s32.f32 %v564_v28 }
 0x791   :  { %570 = vadd.xlane.f32.xlu0 %v567_v27  ;;  %v577_v30 = vshrl.u32 %v563_v29, 16  ;;  %v576_v33 = vand.u32 65535, %v563_v29 }
 0x793   :  { %v579_v32 = vcvt.s32.f32 %v577_v30  ;;  %v578_v34 = vcvt.s32.f32 %v576_v33 }
 0x795   :  { %568 = vadd.xlane.f32.xlu0 %v566_v31  ;;  %582 = vadd.xlane.f32.xlu1 %v579_v32 }
 0x799   :  { %580 = vadd.xlane.f32.xlu1 %v578_v34 }
 0x81e   :  { %v571_v35 = vpop.xlane.xlu0 %570 }
 0x81f   :  { %v573_v36 = vcvt.f32.s32 %v571_v35 }
 0x821   :  { %v574_v39 = vshll.u32 %v573_v36, 16 }
 0x822   :  { %v569_v37 = vpop.xlane.xlu0 %568  ;;  %v583_v38 = vpop.xlane.xlu1 %582 }
 0x823   :  { %v572_v40 = vcvt.f32.s32 %v569_v37  ;;  %v585_v41 = vcvt.f32.s32 %v583_v38 }
 0x825   :  { %v575_v42 = vadd.s32 %v574_v39, %v572_v40  ;;  %v586_v44 = vshll.u32 %v585_v41, 16 }
 0x826   :  { %v581_v43 = vpop.xlane.xlu1 %580 }
 0x827   :  { %vm588_vm4 = vcmp.le.s32.totalorder %v575_v42, 165  ;;  %v584_v45 = vcvt.f32.s32 %v581_v43 }
 0x828   :  { %v590_v46 = vsel %vm588_vm4, %v546_v6, %v544_v5 }
 0x829   :  { %v592_v47 = vor.u32 524288, %v590_v46  ;;  %v587_v48 = vadd.s32 %v586_v44, %v584_v45 }
 0x82b   :  { %vm594_vm5 = vcmp.lt.s32.totalorder %v1771_v11, %v592_v47  ;;  %vm589_vm6 = vcmp.le.s32.totalorder %v587_v48, 165 }
 0x82c   :  { %v591_v49 = vsel %vm589_vm6, %v547_v10, %v545_v8  ;;  %v596_v50 = vsel %vm594_vm5, 1, %v1738_v13 }
 0x82d   :  { %v593_v51 = vor.u32 524288, %v591_v49  ;;  %v598_v52 = vrot.slane %v596_v50, 4 }
 0x82f   :  { %vm595_vm7 = vcmp.lt.s32.totalorder %v1775_v12, %v593_v51  ;;  %v599_v53 = vadd.s32 %v598_v52, %v596_v50 }
 0x830   :  { %v597_v54 = vsel %vm595_vm7, 1, %v1738_v13 }
 0x831   :  { %v600_v55 = vrot.slane %v599_v53, 2  ;;  %v604_v56 = vrot.slane %v597_v54, 4 }
 0x833   :  { %v601_v57 = vadd.s32 %v600_v55, %v599_v53  ;;  %v605_v58 = vadd.s32 %v604_v56, %v597_v54 }
 0x835   :  { %v602_v59 = vrot.slane %v601_v57, 1  ;;  %v606_v60 = vrot.slane %v605_v58, 2 }
 0x837   :  { %v603_v61 = vadd.s32 %v602_v59, %v601_v57  ;;  %v607_v62 = vadd.s32 %v606_v60, %v605_v58 }
 0x839   :  { %v611_v63 = vshrl.u32 %v603_v61, 16  ;;  %v608_v0 = vrot.slane %v607_v62, 1  ;;  %v610_v2 = vand.u32 65535, %v603_v61 }
 0x83b   :  { %v613_v1 = vcvt.s32.f32 %v611_v63  ;;  %v609_v3 = vadd.s32 %v608_v0, %v607_v62  ;;  %v612_v6 = vcvt.s32.f32 %v610_v2 }
 0x83d   :  { %616 = vadd.xlane.f32.xlu0 %v613_v1  ;;  %v623_v5 = vshrl.u32 %v609_v3, 16  ;;  %v622_v8 = vand.u32 65535, %v609_v3 }
 0x83f   :  { %v625_v7 = vcvt.s32.f32 %v623_v5  ;;  %v624_v9 = vcvt.s32.f32 %v622_v8 }
 0x841   :  { %614 = vadd.xlane.f32.xlu0 %v612_v6  ;;  %628 = vadd.xlane.f32.xlu1 %v625_v7 }
 0x845   :  { %626 = vadd.xlane.f32.xlu1 %v624_v9 }
 0x8ca   :  { %v617_v10 = vpop.xlane.xlu0 %616 }
 0x8cb   :  { %v619_v14 = vcvt.f32.s32 %v617_v10 }
 0x8cd   :  { %v620_v17 = vshll.u32 %v619_v14, 16 }
 0x8ce   :  { %v615_v15 = vpop.xlane.xlu0 %614  ;;  %v629_v16 = vpop.xlane.xlu1 %628 }
 0x8cf   :  { %v618_v18 = vcvt.f32.s32 %v615_v15  ;;  %v631_v19 = vcvt.f32.s32 %v629_v16 }
 0x8d1   :  { %v621_v20 = vadd.s32 %v620_v17, %v618_v18  ;;  %v632_v22 = vshll.u32 %v631_v19, 16 }
 0x8d2   :  { %v627_v21 = vpop.xlane.xlu1 %626 }
 0x8d3   :  { %vm634_vm8 = vcmp.le.s32.totalorder %v621_v20, 165  ;;  %v630_v23 = vcvt.f32.s32 %v627_v21 }
 0x8d4   :  { %v636_v24 = vsel %vm634_vm8, %v592_v47, %v590_v46 }
 0x8d5   :  { %v638_v25 = vor.u32 262144, %v636_v24  ;;  %v633_v26 = vadd.s32 %v632_v22, %v630_v23 }
 0x8d7   :  { %vm640_vm9 = vcmp.lt.s32.totalorder %v1771_v11, %v638_v25  ;;  %vm635_vm10 = vcmp.le.s32.totalorder %v633_v26, 165 }
 0x8d8   :  { %v637_v27 = vsel %vm635_vm10, %v593_v51, %v591_v49  ;;  %v642_v28 = vsel %vm640_vm9, 1, %v1738_v13 }
 0x8d9   :  { %v639_v29 = vor.u32 262144, %v637_v27  ;;  %v644_v30 = vrot.slane %v642_v28, 4 }
 0x8db   :  { %vm641_vm11 = vcmp.lt.s32.totalorder %v1775_v12, %v639_v29  ;;  %v645_v31 = vadd.s32 %v644_v30, %v642_v28 }
 0x8dc   :  { %v643_v32 = vsel %vm641_vm11, 1, %v1738_v13 }
 0x8dd   :  { %v646_v33 = vrot.slane %v645_v31, 2  ;;  %v650_v34 = vrot.slane %v643_v32, 4 }
 0x8df   :  { %v647_v35 = vadd.s32 %v646_v33, %v645_v31  ;;  %v651_v36 = vadd.s32 %v650_v34, %v643_v32 }
 0x8e1   :  { %v648_v37 = vrot.slane %v647_v35, 1  ;;  %v652_v38 = vrot.slane %v651_v36, 2 }
 0x8e3   :  { %v649_v39 = vadd.s32 %v648_v37, %v647_v35  ;;  %v653_v40 = vadd.s32 %v652_v38, %v651_v36 }
 0x8e5   :  { %v657_v41 = vshrl.u32 %v649_v39, 16  ;;  %v654_v42 = vrot.slane %v653_v40, 1  ;;  %v656_v44 = vand.u32 65535, %v649_v39 }
 0x8e7   :  { %v659_v43 = vcvt.s32.f32 %v657_v41  ;;  %v655_v45 = vadd.s32 %v654_v42, %v653_v40  ;;  %v658_v47 = vcvt.s32.f32 %v656_v44 }
 0x8e9   :  { %662 = vadd.xlane.f32.xlu0 %v659_v43  ;;  %v669_v46 = vshrl.u32 %v655_v45, 16  ;;  %v668_v49 = vand.u32 65535, %v655_v45 }
 0x8eb   :  { %v671_v48 = vcvt.s32.f32 %v669_v46  ;;  %v670_v50 = vcvt.s32.f32 %v668_v49 }
 0x8ed   :  { %660 = vadd.xlane.f32.xlu0 %v658_v47  ;;  %674 = vadd.xlane.f32.xlu1 %v671_v48 }
 0x8f1   :  { %672 = vadd.xlane.f32.xlu1 %v670_v50 }
 0x976   :  { %v663_v51 = vpop.xlane.xlu0 %662 }
 0x977   :  { %v665_v52 = vcvt.f32.s32 %v663_v51 }
 0x979   :  { %v666_v55 = vshll.u32 %v665_v52, 16 }
 0x97a   :  { %v661_v53 = vpop.xlane.xlu0 %660  ;;  %v675_v54 = vpop.xlane.xlu1 %674 }
 0x97b   :  { %v664_v56 = vcvt.f32.s32 %v661_v53  ;;  %v677_v57 = vcvt.f32.s32 %v675_v54 }
 0x97d   :  { %v667_v58 = vadd.s32 %v666_v55, %v664_v56  ;;  %v678_v60 = vshll.u32 %v677_v57, 16 }
 0x97e   :  { %v673_v59 = vpop.xlane.xlu1 %672 }
 0x97f   :  { %vm680_vm12 = vcmp.le.s32.totalorder %v667_v58, 165  ;;  %v676_v61 = vcvt.f32.s32 %v673_v59 }
 0x980   :  { %v682_v62 = vsel %vm680_vm12, %v638_v25, %v636_v24 }
 0x981   :  { %v684_v63 = vor.u32 131072, %v682_v62  ;;  %v679_v0 = vadd.s32 %v678_v60, %v676_v61 }
 0x983   :  { %vm686_vm13 = vcmp.lt.s32.totalorder %v1771_v11, %v684_v63  ;;  %vm681_vm14 = vcmp.le.s32.totalorder %v679_v0, 165 }
 0x984   :  { %v683_v1 = vsel %vm681_vm14, %v639_v29, %v637_v27  ;;  %v688_v2 = vsel %vm686_vm13, 1, %v1738_v13 }
 0x985   :  { %v685_v3 = vor.u32 131072, %v683_v1  ;;  %v690_v5 = vrot.slane %v688_v2, 4 }
 0x987   :  { %vm687_vm15 = vcmp.lt.s32.totalorder %v1775_v12, %v685_v3  ;;  %v691_v6 = vadd.s32 %v690_v5, %v688_v2 }
 0x988   :  { %v689_v7 = vsel %vm687_vm15, 1, %v1738_v13 }
 0x989   :  { %v692_v8 = vrot.slane %v691_v6, 2  ;;  %v696_v9 = vrot.slane %v689_v7, 4 }
 0x98b   :  { %v693_v10 = vadd.s32 %v692_v8, %v691_v6  ;;  %v697_v14 = vadd.s32 %v696_v9, %v689_v7 }
 0x98d   :  { %v694_v15 = vrot.slane %v693_v10, 1  ;;  %v698_v16 = vrot.slane %v697_v14, 2 }
 0x98f   :  { %v695_v17 = vadd.s32 %v694_v15, %v693_v10  ;;  %v699_v18 = vadd.s32 %v698_v16, %v697_v14 }
 0x991   :  { %v703_v19 = vshrl.u32 %v695_v17, 16  ;;  %v700_v20 = vrot.slane %v699_v18, 1  ;;  %v702_v22 = vand.u32 65535, %v695_v17 }
 0x993   :  { %v705_v21 = vcvt.s32.f32 %v703_v19  ;;  %v701_v23 = vadd.s32 %v700_v20, %v699_v18  ;;  %v704_v25 = vcvt.s32.f32 %v702_v22 }
 0x995   :  { %708 = vadd.xlane.f32.xlu0 %v705_v21  ;;  %v715_v24 = vshrl.u32 %v701_v23, 16  ;;  %v714_v27 = vand.u32 65535, %v701_v23 }
 0x997   :  { %v717_v26 = vcvt.s32.f32 %v715_v24  ;;  %v716_v28 = vcvt.s32.f32 %v714_v27 }
 0x999   :  { %706 = vadd.xlane.f32.xlu0 %v704_v25  ;;  %720 = vadd.xlane.f32.xlu1 %v717_v26 }
 0x99d   :  { %718 = vadd.xlane.f32.xlu1 %v716_v28 }
 0xa22   :  { %v709_v29 = vpop.xlane.xlu0 %708 }
 0xa23   :  { %v711_v30 = vcvt.f32.s32 %v709_v29 }
 0xa25   :  { %v712_v33 = vshll.u32 %v711_v30, 16 }
 0xa26   :  { %v707_v31 = vpop.xlane.xlu0 %706  ;;  %v721_v32 = vpop.xlane.xlu1 %720 }
 0xa27   :  { %v710_v34 = vcvt.f32.s32 %v707_v31  ;;  %v723_v35 = vcvt.f32.s32 %v721_v32 }
 0xa29   :  { %v713_v36 = vadd.s32 %v712_v33, %v710_v34  ;;  %v724_v38 = vshll.u32 %v723_v35, 16 }
 0xa2a   :  { %v719_v37 = vpop.xlane.xlu1 %718 }
 0xa2b   :  { %vm726_vm0 = vcmp.le.s32.totalorder %v713_v36, 165  ;;  %v722_v39 = vcvt.f32.s32 %v719_v37 }
 0xa2c   :  { %v728_v40 = vsel %vm726_vm0, %v684_v63, %v682_v62 }
 0xa2d   :  { %v730_v41 = vor.u32 65536, %v728_v40  ;;  %v725_v42 = vadd.s32 %v724_v38, %v722_v39 }
 0xa2f   :  { %vm732_vm1 = vcmp.lt.s32.totalorder %v1771_v11, %v730_v41  ;;  %vm727_vm3 = vcmp.le.s32.totalorder %v725_v42, 165 }
 0xa30   :  { %v729_v43 = vsel %vm727_vm3, %v685_v3, %v683_v1  ;;  %v734_v44 = vsel %vm732_vm1, 1, %v1738_v13 }
 0xa31   :  { %v731_v45 = vor.u32 65536, %v729_v43  ;;  %v736_v46 = vrot.slane %v734_v44, 4 }
 0xa33   :  { %vm733_vm4 = vcmp.lt.s32.totalorder %v1775_v12, %v731_v45  ;;  %v737_v47 = vadd.s32 %v736_v46, %v734_v44 }
 0xa34   :  { %v735_v48 = vsel %vm733_vm4, 1, %v1738_v13 }
 0xa35   :  { %v738_v49 = vrot.slane %v737_v47, 2  ;;  %v742_v50 = vrot.slane %v735_v48, 4 }
 0xa37   :  { %v739_v51 = vadd.s32 %v738_v49, %v737_v47  ;;  %v743_v52 = vadd.s32 %v742_v50, %v735_v48 }
 0xa39   :  { %v740_v53 = vrot.slane %v739_v51, 1  ;;  %v744_v54 = vrot.slane %v743_v52, 2 }
 0xa3b   :  { %v741_v55 = vadd.s32 %v740_v53, %v739_v51  ;;  %v745_v56 = vadd.s32 %v744_v54, %v743_v52 }
 0xa3d   :  { %v749_v57 = vshrl.u32 %v741_v55, 16  ;;  %v746_v58 = vrot.slane %v745_v56, 1  ;;  %v748_v60 = vand.u32 65535, %v741_v55 }
 0xa3f   :  { %v751_v59 = vcvt.s32.f32 %v749_v57  ;;  %v747_v61 = vadd.s32 %v746_v58, %v745_v56  ;;  %v750_v63 = vcvt.s32.f32 %v748_v60 }
 0xa41   :  { %754 = vadd.xlane.f32.xlu0 %v751_v59  ;;  %v761_v62 = vshrl.u32 %v747_v61, 16  ;;  %v760_v1 = vand.u32 65535, %v747_v61 }
 0xa43   :  { %v763_v0 = vcvt.s32.f32 %v761_v62  ;;  %v762_v2 = vcvt.s32.f32 %v760_v1 }
 0xa45   :  { %752 = vadd.xlane.f32.xlu0 %v750_v63  ;;  %766 = vadd.xlane.f32.xlu1 %v763_v0 }
 0xa49   :  { %764 = vadd.xlane.f32.xlu1 %v762_v2 }
 0xace   :  { %v755_v3 = vpop.xlane.xlu0 %754 }
 0xacf   :  { %v757_v5 = vcvt.f32.s32 %v755_v3 }
 0xad1   :  { %v758_v8 = vshll.u32 %v757_v5, 16 }
 0xad2   :  { %v753_v6 = vpop.xlane.xlu0 %752  ;;  %v767_v7 = vpop.xlane.xlu1 %766 }
 0xad3   :  { %v756_v9 = vcvt.f32.s32 %v753_v6  ;;  %v769_v10 = vcvt.f32.s32 %v767_v7 }
 0xad5   :  { %v759_v14 = vadd.s32 %v758_v8, %v756_v9  ;;  %v770_v16 = vshll.u32 %v769_v10, 16 }
 0xad6   :  { %v765_v15 = vpop.xlane.xlu1 %764 }
 0xad7   :  { %vm772_vm5 = vcmp.le.s32.totalorder %v759_v14, 165  ;;  %v768_v17 = vcvt.f32.s32 %v765_v15 }
 0xad8   :  { %v774_v18 = vsel %vm772_vm5, %v730_v41, %v728_v40 }
 0xad9   :  { %v776_v19 = vor.u32 32768, %v774_v18  ;;  %v771_v20 = vadd.s32 %v770_v16, %v768_v17 }
 0xadb   :  { %vm778_vm6 = vcmp.lt.s32.totalorder %v1771_v11, %v776_v19  ;;  %vm773_vm7 = vcmp.le.s32.totalorder %v771_v20, 165 }
 0xadc   :  { %v775_v21 = vsel %vm773_vm7, %v731_v45, %v729_v43  ;;  %v780_v22 = vsel %vm778_vm6, 1, %v1738_v13 }
 0xadd   :  { %v777_v23 = vor.u32 32768, %v775_v21  ;;  %v782_v24 = vrot.slane %v780_v22, 4 }
 0xadf   :  { %vm779_vm8 = vcmp.lt.s32.totalorder %v1775_v12, %v777_v23  ;;  %v783_v25 = vadd.s32 %v782_v24, %v780_v22 }
 0xae0   :  { %v781_v26 = vsel %vm779_vm8, 1, %v1738_v13 }
 0xae1   :  { %v784_v27 = vrot.slane %v783_v25, 2  ;;  %v788_v28 = vrot.slane %v781_v26, 4 }
 0xae3   :  { %v785_v29 = vadd.s32 %v784_v27, %v783_v25  ;;  %v789_v30 = vadd.s32 %v788_v28, %v781_v26 }
 0xae5   :  { %v786_v31 = vrot.slane %v785_v29, 1  ;;  %v790_v32 = vrot.slane %v789_v30, 2 }
 0xae7   :  { %v787_v33 = vadd.s32 %v786_v31, %v785_v29  ;;  %v791_v34 = vadd.s32 %v790_v32, %v789_v30 }
 0xae9   :  { %v795_v35 = vshrl.u32 %v787_v33, 16  ;;  %v792_v36 = vrot.slane %v791_v34, 1  ;;  %v794_v38 = vand.u32 65535, %v787_v33 }
 0xaeb   :  { %v797_v37 = vcvt.s32.f32 %v795_v35  ;;  %v793_v39 = vadd.s32 %v792_v36, %v791_v34  ;;  %v796_v41 = vcvt.s32.f32 %v794_v38 }
 0xaed   :  { %800 = vadd.xlane.f32.xlu0 %v797_v37  ;;  %v807_v40 = vshrl.u32 %v793_v39, 16  ;;  %v806_v43 = vand.u32 65535, %v793_v39 }
 0xaef   :  { %v809_v42 = vcvt.s32.f32 %v807_v40  ;;  %v808_v44 = vcvt.s32.f32 %v806_v43 }
 0xaf1   :  { %798 = vadd.xlane.f32.xlu0 %v796_v41  ;;  %812 = vadd.xlane.f32.xlu1 %v809_v42 }
 0xaf5   :  { %810 = vadd.xlane.f32.xlu1 %v808_v44 }
 0xb7a   :  { %v801_v45 = vpop.xlane.xlu0 %800 }
 0xb7b   :  { %v803_v46 = vcvt.f32.s32 %v801_v45 }
 0xb7d   :  { %v804_v49 = vshll.u32 %v803_v46, 16 }
 0xb7e   :  { %v799_v47 = vpop.xlane.xlu0 %798  ;;  %v813_v48 = vpop.xlane.xlu1 %812 }
 0xb7f   :  { %v802_v50 = vcvt.f32.s32 %v799_v47  ;;  %v815_v51 = vcvt.f32.s32 %v813_v48 }
 0xb81   :  { %v805_v52 = vadd.s32 %v804_v49, %v802_v50  ;;  %v816_v54 = vshll.u32 %v815_v51, 16 }
 0xb82   :  { %v811_v53 = vpop.xlane.xlu1 %810 }
 0xb83   :  { %vm818_vm9 = vcmp.le.s32.totalorder %v805_v52, 165  ;;  %v814_v55 = vcvt.f32.s32 %v811_v53 }
 0xb84   :  { %v820_v56 = vsel %vm818_vm9, %v776_v19, %v774_v18 }
 0xb85   :  { %v822_v57 = vor.u32 16384, %v820_v56  ;;  %v817_v58 = vadd.s32 %v816_v54, %v814_v55 }
 0xb87   :  { %vm824_vm10 = vcmp.lt.s32.totalorder %v1771_v11, %v822_v57  ;;  %vm819_vm11 = vcmp.le.s32.totalorder %v817_v58, 165 }
 0xb88   :  { %v821_v59 = vsel %vm819_vm11, %v777_v23, %v775_v21  ;;  %v826_v60 = vsel %vm824_vm10, 1, %v1738_v13 }
 0xb89   :  { %v823_v61 = vor.u32 16384, %v821_v59  ;;  %v828_v62 = vrot.slane %v826_v60, 4 }
 0xb8b   :  { %vm825_vm12 = vcmp.lt.s32.totalorder %v1775_v12, %v823_v61  ;;  %v829_v63 = vadd.s32 %v828_v62, %v826_v60 }
 0xb8c   :  { %v827_v0 = vsel %vm825_vm12, 1, %v1738_v13 }
 0xb8d   :  { %v830_v1 = vrot.slane %v829_v63, 2  ;;  %v834_v2 = vrot.slane %v827_v0, 4 }
 0xb8f   :  { %v831_v3 = vadd.s32 %v830_v1, %v829_v63  ;;  %v835_v5 = vadd.s32 %v834_v2, %v827_v0 }
 0xb91   :  { %v832_v6 = vrot.slane %v831_v3, 1  ;;  %v836_v7 = vrot.slane %v835_v5, 2 }
 0xb93   :  { %v833_v8 = vadd.s32 %v832_v6, %v831_v3  ;;  %v837_v9 = vadd.s32 %v836_v7, %v835_v5 }
 0xb95   :  { %v841_v10 = vshrl.u32 %v833_v8, 16  ;;  %v838_v14 = vrot.slane %v837_v9, 1  ;;  %v840_v16 = vand.u32 65535, %v833_v8 }
 0xb97   :  { %v843_v15 = vcvt.s32.f32 %v841_v10  ;;  %v839_v17 = vadd.s32 %v838_v14, %v837_v9  ;;  %v842_v19 = vcvt.s32.f32 %v840_v16 }
 0xb99   :  { %846 = vadd.xlane.f32.xlu0 %v843_v15  ;;  %v853_v18 = vshrl.u32 %v839_v17, 16  ;;  %v852_v21 = vand.u32 65535, %v839_v17 }
 0xb9b   :  { %v855_v20 = vcvt.s32.f32 %v853_v18  ;;  %v854_v22 = vcvt.s32.f32 %v852_v21 }
 0xb9d   :  { %844 = vadd.xlane.f32.xlu0 %v842_v19  ;;  %858 = vadd.xlane.f32.xlu1 %v855_v20 }
 0xba1   :  { %856 = vadd.xlane.f32.xlu1 %v854_v22 }
 0xc26   :  { %v847_v23 = vpop.xlane.xlu0 %846 }
 0xc27   :  { %v849_v24 = vcvt.f32.s32 %v847_v23 }
 0xc29   :  { %v850_v27 = vshll.u32 %v849_v24, 16 }
 0xc2a   :  { %v845_v25 = vpop.xlane.xlu0 %844  ;;  %v859_v26 = vpop.xlane.xlu1 %858 }
 0xc2b   :  { %v848_v28 = vcvt.f32.s32 %v845_v25  ;;  %v861_v29 = vcvt.f32.s32 %v859_v26 }
 0xc2d   :  { %v851_v30 = vadd.s32 %v850_v27, %v848_v28  ;;  %v862_v32 = vshll.u32 %v861_v29, 16 }
 0xc2e   :  { %v857_v31 = vpop.xlane.xlu1 %856 }
 0xc2f   :  { %vm864_vm13 = vcmp.le.s32.totalorder %v851_v30, 165  ;;  %v860_v33 = vcvt.f32.s32 %v857_v31 }
 0xc30   :  { %v866_v34 = vsel %vm864_vm13, %v822_v57, %v820_v56 }
 0xc31   :  { %v868_v35 = vor.u32 8192, %v866_v34  ;;  %v863_v36 = vadd.s32 %v862_v32, %v860_v33 }
 0xc33   :  { %vm870_vm14 = vcmp.lt.s32.totalorder %v1771_v11, %v868_v35  ;;  %vm865_vm15 = vcmp.le.s32.totalorder %v863_v36, 165 }
 0xc34   :  { %v867_v37 = vsel %vm865_vm15, %v823_v61, %v821_v59  ;;  %v872_v38 = vsel %vm870_vm14, 1, %v1738_v13 }
 0xc35   :  { %v869_v39 = vor.u32 8192, %v867_v37  ;;  %v874_v40 = vrot.slane %v872_v38, 4 }
 0xc37   :  { %vm871_vm0 = vcmp.lt.s32.totalorder %v1775_v12, %v869_v39  ;;  %v875_v41 = vadd.s32 %v874_v40, %v872_v38 }
 0xc38   :  { %v873_v42 = vsel %vm871_vm0, 1, %v1738_v13 }
 0xc39   :  { %v876_v43 = vrot.slane %v875_v41, 2  ;;  %v880_v44 = vrot.slane %v873_v42, 4 }
 0xc3b   :  { %v877_v45 = vadd.s32 %v876_v43, %v875_v41  ;;  %v881_v46 = vadd.s32 %v880_v44, %v873_v42 }
 0xc3d   :  { %v878_v47 = vrot.slane %v877_v45, 1  ;;  %v882_v48 = vrot.slane %v881_v46, 2 }
 0xc3f   :  { %v879_v49 = vadd.s32 %v878_v47, %v877_v45  ;;  %v883_v50 = vadd.s32 %v882_v48, %v881_v46 }
 0xc41   :  { %v887_v51 = vshrl.u32 %v879_v49, 16  ;;  %v884_v52 = vrot.slane %v883_v50, 1  ;;  %v886_v54 = vand.u32 65535, %v879_v49 }
 0xc43   :  { %v889_v53 = vcvt.s32.f32 %v887_v51  ;;  %v885_v55 = vadd.s32 %v884_v52, %v883_v50  ;;  %v888_v57 = vcvt.s32.f32 %v886_v54 }
 0xc45   :  { %892 = vadd.xlane.f32.xlu0 %v889_v53  ;;  %v899_v56 = vshrl.u32 %v885_v55, 16  ;;  %v898_v59 = vand.u32 65535, %v885_v55 }
 0xc47   :  { %v901_v58 = vcvt.s32.f32 %v899_v56  ;;  %v900_v60 = vcvt.s32.f32 %v898_v59 }
 0xc49   :  { %890 = vadd.xlane.f32.xlu0 %v888_v57  ;;  %904 = vadd.xlane.f32.xlu1 %v901_v58 }
 0xc4d   :  { %902 = vadd.xlane.f32.xlu1 %v900_v60 }
 0xcd2   :  { %v893_v61 = vpop.xlane.xlu0 %892 }
 0xcd3   :  { %v895_v62 = vcvt.f32.s32 %v893_v61 }
 0xcd5   :  { %v896_v1 = vshll.u32 %v895_v62, 16 }
 0xcd6   :  { %v891_v63 = vpop.xlane.xlu0 %890  ;;  %v905_v0 = vpop.xlane.xlu1 %904 }
 0xcd7   :  { %v894_v2 = vcvt.f32.s32 %v891_v63  ;;  %v907_v3 = vcvt.f32.s32 %v905_v0 }
 0xcd9   :  { %v897_v5 = vadd.s32 %v896_v1, %v894_v2  ;;  %v908_v7 = vshll.u32 %v907_v3, 16 }
 0xcda   :  { %v903_v6 = vpop.xlane.xlu1 %902 }
 0xcdb   :  { %vm910_vm1 = vcmp.le.s32.totalorder %v897_v5, 165  ;;  %v906_v8 = vcvt.f32.s32 %v903_v6 }
 0xcdc   :  { %v912_v9 = vsel %vm910_vm1, %v868_v35, %v866_v34 }
 0xcdd   :  { %v914_v10 = vor.u32 4096, %v912_v9  ;;  %v909_v14 = vadd.s32 %v908_v7, %v906_v8 }
 0xcdf   :  { %vm916_vm3 = vcmp.lt.s32.totalorder %v1771_v11, %v914_v10  ;;  %vm911_vm4 = vcmp.le.s32.totalorder %v909_v14, 165 }
 0xce0   :  { %v913_v15 = vsel %vm911_vm4, %v869_v39, %v867_v37  ;;  %v918_v16 = vsel %vm916_vm3, 1, %v1738_v13 }
 0xce1   :  { %v915_v17 = vor.u32 4096, %v913_v15  ;;  %v920_v18 = vrot.slane %v918_v16, 4 }
 0xce3   :  { %vm917_vm5 = vcmp.lt.s32.totalorder %v1775_v12, %v915_v17  ;;  %v921_v19 = vadd.s32 %v920_v18, %v918_v16 }
 0xce4   :  { %v919_v20 = vsel %vm917_vm5, 1, %v1738_v13 }
 0xce5   :  { %v922_v21 = vrot.slane %v921_v19, 2  ;;  %v926_v22 = vrot.slane %v919_v20, 4 }
 0xce7   :  { %v923_v23 = vadd.s32 %v922_v21, %v921_v19  ;;  %v927_v24 = vadd.s32 %v926_v22, %v919_v20 }
 0xce9   :  { %v924_v25 = vrot.slane %v923_v23, 1  ;;  %v928_v26 = vrot.slane %v927_v24, 2 }
 0xceb   :  { %v925_v27 = vadd.s32 %v924_v25, %v923_v23  ;;  %v929_v28 = vadd.s32 %v928_v26, %v927_v24 }
 0xced   :  { %v933_v29 = vshrl.u32 %v925_v27, 16  ;;  %v930_v30 = vrot.slane %v929_v28, 1  ;;  %v932_v32 = vand.u32 65535, %v925_v27 }
 0xcef   :  { %v935_v31 = vcvt.s32.f32 %v933_v29  ;;  %v931_v33 = vadd.s32 %v930_v30, %v929_v28  ;;  %v934_v35 = vcvt.s32.f32 %v932_v32 }
 0xcf1   :  { %938 = vadd.xlane.f32.xlu0 %v935_v31  ;;  %v945_v34 = vshrl.u32 %v931_v33, 16  ;;  %v944_v37 = vand.u32 65535, %v931_v33 }
 0xcf3   :  { %v947_v36 = vcvt.s32.f32 %v945_v34  ;;  %v946_v38 = vcvt.s32.f32 %v944_v37 }
 0xcf5   :  { %936 = vadd.xlane.f32.xlu0 %v934_v35  ;;  %950 = vadd.xlane.f32.xlu1 %v947_v36 }
 0xcf9   :  { %948 = vadd.xlane.f32.xlu1 %v946_v38 }
 0xd7e   :  { %v939_v39 = vpop.xlane.xlu0 %938 }
 0xd7f   :  { %v941_v40 = vcvt.f32.s32 %v939_v39 }
 0xd81   :  { %v942_v43 = vshll.u32 %v941_v40, 16 }
 0xd82   :  { %v937_v41 = vpop.xlane.xlu0 %936  ;;  %v951_v42 = vpop.xlane.xlu1 %950 }
 0xd83   :  { %v940_v44 = vcvt.f32.s32 %v937_v41  ;;  %v953_v45 = vcvt.f32.s32 %v951_v42 }
 0xd85   :  { %v943_v46 = vadd.s32 %v942_v43, %v940_v44  ;;  %v954_v48 = vshll.u32 %v953_v45, 16 }
 0xd86   :  { %v949_v47 = vpop.xlane.xlu1 %948 }
 0xd87   :  { %vm956_vm6 = vcmp.le.s32.totalorder %v943_v46, 165  ;;  %v952_v49 = vcvt.f32.s32 %v949_v47 }
 0xd88   :  { %v958_v50 = vsel %vm956_vm6, %v914_v10, %v912_v9 }
 0xd89   :  { %v960_v51 = vor.u32 2048, %v958_v50  ;;  %v955_v52 = vadd.s32 %v954_v48, %v952_v49 }
 0xd8b   :  { %vm962_vm7 = vcmp.lt.s32.totalorder %v1771_v11, %v960_v51  ;;  %vm957_vm8 = vcmp.le.s32.totalorder %v955_v52, 165 }
 0xd8c   :  { %v959_v53 = vsel %vm957_vm8, %v915_v17, %v913_v15  ;;  %v964_v54 = vsel %vm962_vm7, 1, %v1738_v13 }
 0xd8d   :  { %v961_v55 = vor.u32 2048, %v959_v53  ;;  %v966_v56 = vrot.slane %v964_v54, 4 }
 0xd8f   :  { %vm963_vm9 = vcmp.lt.s32.totalorder %v1775_v12, %v961_v55  ;;  %v967_v57 = vadd.s32 %v966_v56, %v964_v54 }
 0xd90   :  { %v965_v58 = vsel %vm963_vm9, 1, %v1738_v13 }
 0xd91   :  { %v968_v59 = vrot.slane %v967_v57, 2  ;;  %v972_v60 = vrot.slane %v965_v58, 4 }
 0xd93   :  { %v969_v61 = vadd.s32 %v968_v59, %v967_v57  ;;  %v973_v62 = vadd.s32 %v972_v60, %v965_v58 }
 0xd95   :  { %v970_v63 = vrot.slane %v969_v61, 1  ;;  %v974_v0 = vrot.slane %v973_v62, 2 }
 0xd97   :  { %v971_v1 = vadd.s32 %v970_v63, %v969_v61  ;;  %v975_v2 = vadd.s32 %v974_v0, %v973_v62 }
 0xd99   :  { %v979_v3 = vshrl.u32 %v971_v1, 16  ;;  %v976_v5 = vrot.slane %v975_v2, 1  ;;  %v978_v7 = vand.u32 65535, %v971_v1 }
 0xd9b   :  { %v981_v6 = vcvt.s32.f32 %v979_v3  ;;  %v977_v8 = vadd.s32 %v976_v5, %v975_v2  ;;  %v980_v10 = vcvt.s32.f32 %v978_v7 }
 0xd9d   :  { %984 = vadd.xlane.f32.xlu0 %v981_v6  ;;  %v991_v9 = vshrl.u32 %v977_v8, 16  ;;  %v990_v15 = vand.u32 65535, %v977_v8 }
 0xd9f   :  { %v993_v14 = vcvt.s32.f32 %v991_v9  ;;  %v992_v16 = vcvt.s32.f32 %v990_v15 }
 0xda1   :  { %982 = vadd.xlane.f32.xlu0 %v980_v10  ;;  %996 = vadd.xlane.f32.xlu1 %v993_v14 }
 0xda5   :  { %994 = vadd.xlane.f32.xlu1 %v992_v16 }
 0xe2a   :  { %v985_v17 = vpop.xlane.xlu0 %984 }
 0xe2b   :  { %v987_v18 = vcvt.f32.s32 %v985_v17 }
 0xe2d   :  { %v988_v21 = vshll.u32 %v987_v18, 16 }
 0xe2e   :  { %v983_v19 = vpop.xlane.xlu0 %982  ;;  %v997_v20 = vpop.xlane.xlu1 %996 }
 0xe2f   :  { %v986_v22 = vcvt.f32.s32 %v983_v19  ;;  %v999_v23 = vcvt.f32.s32 %v997_v20 }
 0xe31   :  { %v989_v24 = vadd.s32 %v988_v21, %v986_v22  ;;  %v1000_v26 = vshll.u32 %v999_v23, 16 }
 0xe32   :  { %v995_v25 = vpop.xlane.xlu1 %994 }
 0xe33   :  { %vm1002_vm10 = vcmp.le.s32.totalorder %v989_v24, 165  ;;  %v998_v27 = vcvt.f32.s32 %v995_v25 }
 0xe34   :  { %v1004_v28 = vsel %vm1002_vm10, %v960_v51, %v958_v50 }
 0xe35   :  { %v1006_v29 = vor.u32 1024, %v1004_v28  ;;  %v1001_v30 = vadd.s32 %v1000_v26, %v998_v27 }
 0xe37   :  { %vm1008_vm11 = vcmp.lt.s32.totalorder %v1771_v11, %v1006_v29  ;;  %vm1003_vm12 = vcmp.le.s32.totalorder %v1001_v30, 165 }
 0xe38   :  { %v1005_v31 = vsel %vm1003_vm12, %v961_v55, %v959_v53  ;;  %v1010_v32 = vsel %vm1008_vm11, 1, %v1738_v13 }
 0xe39   :  { %v1007_v33 = vor.u32 1024, %v1005_v31  ;;  %v1012_v34 = vrot.slane %v1010_v32, 4 }
 0xe3b   :  { %vm1009_vm13 = vcmp.lt.s32.totalorder %v1775_v12, %v1007_v33  ;;  %v1013_v35 = vadd.s32 %v1012_v34, %v1010_v32 }
 0xe3c   :  { %v1011_v36 = vsel %vm1009_vm13, 1, %v1738_v13 }
 0xe3d   :  { %v1014_v37 = vrot.slane %v1013_v35, 2  ;;  %v1018_v38 = vrot.slane %v1011_v36, 4 }
 0xe3f   :  { %v1015_v39 = vadd.s32 %v1014_v37, %v1013_v35  ;;  %v1019_v40 = vadd.s32 %v1018_v38, %v1011_v36 }
 0xe41   :  { %v1016_v41 = vrot.slane %v1015_v39, 1  ;;  %v1020_v42 = vrot.slane %v1019_v40, 2 }
 0xe43   :  { %v1017_v43 = vadd.s32 %v1016_v41, %v1015_v39  ;;  %v1021_v44 = vadd.s32 %v1020_v42, %v1019_v40 }
 0xe45   :  { %v1025_v45 = vshrl.u32 %v1017_v43, 16  ;;  %v1022_v46 = vrot.slane %v1021_v44, 1  ;;  %v1024_v48 = vand.u32 65535, %v1017_v43 }
 0xe47   :  { %v1027_v47 = vcvt.s32.f32 %v1025_v45  ;;  %v1023_v49 = vadd.s32 %v1022_v46, %v1021_v44  ;;  %v1026_v51 = vcvt.s32.f32 %v1024_v48 }
 0xe49   :  { %1030 = vadd.xlane.f32.xlu0 %v1027_v47  ;;  %v1037_v50 = vshrl.u32 %v1023_v49, 16  ;;  %v1036_v53 = vand.u32 65535, %v1023_v49 }
 0xe4b   :  { %v1039_v52 = vcvt.s32.f32 %v1037_v50  ;;  %v1038_v54 = vcvt.s32.f32 %v1036_v53 }
 0xe4d   :  { %1028 = vadd.xlane.f32.xlu0 %v1026_v51  ;;  %1042 = vadd.xlane.f32.xlu1 %v1039_v52 }
 0xe51   :  { %1040 = vadd.xlane.f32.xlu1 %v1038_v54 }
 0xed6   :  { %v1031_v55 = vpop.xlane.xlu0 %1030 }
 0xed7   :  { %v1033_v56 = vcvt.f32.s32 %v1031_v55 }
 0xed9   :  { %v1034_v59 = vshll.u32 %v1033_v56, 16 }
 0xeda   :  { %v1029_v57 = vpop.xlane.xlu0 %1028  ;;  %v1043_v58 = vpop.xlane.xlu1 %1042 }
 0xedb   :  { %v1032_v60 = vcvt.f32.s32 %v1029_v57  ;;  %v1045_v61 = vcvt.f32.s32 %v1043_v58 }
 0xedd   :  { %v1035_v62 = vadd.s32 %v1034_v59, %v1032_v60  ;;  %v1046_v0 = vshll.u32 %v1045_v61, 16 }
 0xede   :  { %v1041_v63 = vpop.xlane.xlu1 %1040 }
 0xedf   :  { %vm1048_vm14 = vcmp.le.s32.totalorder %v1035_v62, 165  ;;  %v1044_v1 = vcvt.f32.s32 %v1041_v63 }
 0xee0   :  { %v1050_v2 = vsel %vm1048_vm14, %v1006_v29, %v1004_v28 }
 0xee1   :  { %v1052_v3 = vor.u32 512, %v1050_v2  ;;  %v1047_v5 = vadd.s32 %v1046_v0, %v1044_v1 }
 0xee3   :  { %vm1054_vm15 = vcmp.lt.s32.totalorder %v1771_v11, %v1052_v3  ;;  %vm1049_vm0 = vcmp.le.s32.totalorder %v1047_v5, 165 }
 0xee4   :  { %v1051_v6 = vsel %vm1049_vm0, %v1007_v33, %v1005_v31  ;;  %v1056_v7 = vsel %vm1054_vm15, 1, %v1738_v13 }
 0xee5   :  { %v1053_v8 = vor.u32 512, %v1051_v6  ;;  %v1058_v9 = vrot.slane %v1056_v7, 4 }
 0xee7   :  { %vm1055_vm1 = vcmp.lt.s32.totalorder %v1775_v12, %v1053_v8  ;;  %v1059_v10 = vadd.s32 %v1058_v9, %v1056_v7 }
 0xee8   :  { %v1057_v14 = vsel %vm1055_vm1, 1, %v1738_v13 }
 0xee9   :  { %v1060_v15 = vrot.slane %v1059_v10, 2  ;;  %v1064_v16 = vrot.slane %v1057_v14, 4 }
 0xeeb   :  { %v1061_v17 = vadd.s32 %v1060_v15, %v1059_v10  ;;  %v1065_v18 = vadd.s32 %v1064_v16, %v1057_v14 }
 0xeed   :  { %v1062_v19 = vrot.slane %v1061_v17, 1  ;;  %v1066_v20 = vrot.slane %v1065_v18, 2 }
 0xeef   :  { %v1063_v21 = vadd.s32 %v1062_v19, %v1061_v17  ;;  %v1067_v22 = vadd.s32 %v1066_v20, %v1065_v18 }
 0xef1   :  { %v1071_v23 = vshrl.u32 %v1063_v21, 16  ;;  %v1068_v24 = vrot.slane %v1067_v22, 1  ;;  %v1070_v26 = vand.u32 65535, %v1063_v21 }
 0xef3   :  { %v1073_v25 = vcvt.s32.f32 %v1071_v23  ;;  %v1069_v27 = vadd.s32 %v1068_v24, %v1067_v22  ;;  %v1072_v29 = vcvt.s32.f32 %v1070_v26 }
 0xef5   :  { %1076 = vadd.xlane.f32.xlu0 %v1073_v25  ;;  %v1083_v28 = vshrl.u32 %v1069_v27, 16  ;;  %v1082_v31 = vand.u32 65535, %v1069_v27 }
 0xef7   :  { %v1085_v30 = vcvt.s32.f32 %v1083_v28  ;;  %v1084_v32 = vcvt.s32.f32 %v1082_v31 }
 0xef9   :  { %1074 = vadd.xlane.f32.xlu0 %v1072_v29  ;;  %1088 = vadd.xlane.f32.xlu1 %v1085_v30 }
 0xefd   :  { %1086 = vadd.xlane.f32.xlu1 %v1084_v32 }
 0xf82   :  { %v1077_v33 = vpop.xlane.xlu0 %1076 }
 0xf83   :  { %v1079_v34 = vcvt.f32.s32 %v1077_v33 }
 0xf85   :  { %v1080_v37 = vshll.u32 %v1079_v34, 16 }
 0xf86   :  { %v1075_v35 = vpop.xlane.xlu0 %1074  ;;  %v1089_v36 = vpop.xlane.xlu1 %1088 }
 0xf87   :  { %v1078_v38 = vcvt.f32.s32 %v1075_v35  ;;  %v1091_v39 = vcvt.f32.s32 %v1089_v36 }
 0xf89   :  { %v1081_v40 = vadd.s32 %v1080_v37, %v1078_v38  ;;  %v1092_v42 = vshll.u32 %v1091_v39, 16 }
 0xf8a   :  { %v1087_v41 = vpop.xlane.xlu1 %1086 }
 0xf8b   :  { %vm1094_vm3 = vcmp.le.s32.totalorder %v1081_v40, 165  ;;  %v1090_v43 = vcvt.f32.s32 %v1087_v41 }
 0xf8c   :  { %v1096_v44 = vsel %vm1094_vm3, %v1052_v3, %v1050_v2 }
 0xf8d   :  { %v1098_v45 = vor.u32 256, %v1096_v44  ;;  %v1093_v46 = vadd.s32 %v1092_v42, %v1090_v43 }
 0xf8f   :  { %vm1100_vm4 = vcmp.lt.s32.totalorder %v1771_v11, %v1098_v45  ;;  %vm1095_vm5 = vcmp.le.s32.totalorder %v1093_v46, 165 }
 0xf90   :  { %v1097_v47 = vsel %vm1095_vm5, %v1053_v8, %v1051_v6  ;;  %v1102_v48 = vsel %vm1100_vm4, 1, %v1738_v13 }
 0xf91   :  { %v1099_v49 = vor.u32 256, %v1097_v47  ;;  %v1104_v50 = vrot.slane %v1102_v48, 4 }
 0xf93   :  { %vm1101_vm6 = vcmp.lt.s32.totalorder %v1775_v12, %v1099_v49  ;;  %v1105_v51 = vadd.s32 %v1104_v50, %v1102_v48 }
 0xf94   :  { %v1103_v52 = vsel %vm1101_vm6, 1, %v1738_v13 }
 0xf95   :  { %v1106_v53 = vrot.slane %v1105_v51, 2  ;;  %v1110_v54 = vrot.slane %v1103_v52, 4 }
 0xf97   :  { %v1107_v55 = vadd.s32 %v1106_v53, %v1105_v51  ;;  %v1111_v56 = vadd.s32 %v1110_v54, %v1103_v52 }
 0xf99   :  { %v1108_v57 = vrot.slane %v1107_v55, 1  ;;  %v1112_v58 = vrot.slane %v1111_v56, 2 }
 0xf9b   :  { %v1109_v59 = vadd.s32 %v1108_v57, %v1107_v55  ;;  %v1113_v60 = vadd.s32 %v1112_v58, %v1111_v56 }
 0xf9d   :  { %v1117_v61 = vshrl.u32 %v1109_v59, 16  ;;  %v1114_v62 = vrot.slane %v1113_v60, 1  ;;  %v1116_v0 = vand.u32 65535, %v1109_v59 }
 0xf9f   :  { %v1119_v63 = vcvt.s32.f32 %v1117_v61  ;;  %v1115_v1 = vadd.s32 %v1114_v62, %v1113_v60  ;;  %v1118_v3 = vcvt.s32.f32 %v1116_v0 }
 0xfa1   :  { %1122 = vadd.xlane.f32.xlu0 %v1119_v63  ;;  %v1129_v2 = vshrl.u32 %v1115_v1, 16  ;;  %v1128_v6 = vand.u32 65535, %v1115_v1 }
 0xfa3   :  { %v1131_v5 = vcvt.s32.f32 %v1129_v2  ;;  %v1130_v7 = vcvt.s32.f32 %v1128_v6 }
 0xfa5   :  { %1120 = vadd.xlane.f32.xlu0 %v1118_v3  ;;  %1134 = vadd.xlane.f32.xlu1 %v1131_v5 }
 0xfa9   :  { %1132 = vadd.xlane.f32.xlu1 %v1130_v7 }
0x102e   :  { %v1123_v8 = vpop.xlane.xlu0 %1122 }
0x102f   :  { %v1125_v9 = vcvt.f32.s32 %v1123_v8 }
0x1031   :  { %v1126_v15 = vshll.u32 %v1125_v9, 16 }
0x1032   :  { %v1121_v10 = vpop.xlane.xlu0 %1120  ;;  %v1135_v14 = vpop.xlane.xlu1 %1134 }
0x1033   :  { %v1124_v16 = vcvt.f32.s32 %v1121_v10  ;;  %v1137_v17 = vcvt.f32.s32 %v1135_v14 }
0x1035   :  { %v1127_v18 = vadd.s32 %v1126_v15, %v1124_v16  ;;  %v1138_v20 = vshll.u32 %v1137_v17, 16 }
0x1036   :  { %v1133_v19 = vpop.xlane.xlu1 %1132 }
0x1037   :  { %vm1140_vm7 = vcmp.le.s32.totalorder %v1127_v18, 165  ;;  %v1136_v21 = vcvt.f32.s32 %v1133_v19 }
0x1038   :  { %v1142_v22 = vsel %vm1140_vm7, %v1098_v45, %v1096_v44 }
0x1039   :  { %v1144_v23 = vor.u32 128, %v1142_v22  ;;  %v1139_v24 = vadd.s32 %v1138_v20, %v1136_v21 }
0x103b   :  { %vm1146_vm8 = vcmp.lt.s32.totalorder %v1771_v11, %v1144_v23  ;;  %vm1141_vm9 = vcmp.le.s32.totalorder %v1139_v24, 165 }
0x103c   :  { %v1143_v25 = vsel %vm1141_vm9, %v1099_v49, %v1097_v47  ;;  %v1148_v26 = vsel %vm1146_vm8, 1, %v1738_v13 }
0x103d   :  { %v1145_v27 = vor.u32 128, %v1143_v25  ;;  %v1150_v28 = vrot.slane %v1148_v26, 4 }
0x103f   :  { %vm1147_vm10 = vcmp.lt.s32.totalorder %v1775_v12, %v1145_v27  ;;  %v1151_v29 = vadd.s32 %v1150_v28, %v1148_v26 }
0x1040   :  { %v1149_v30 = vsel %vm1147_vm10, 1, %v1738_v13 }
0x1041   :  { %v1152_v31 = vrot.slane %v1151_v29, 2  ;;  %v1156_v32 = vrot.slane %v1149_v30, 4 }
0x1043   :  { %v1153_v33 = vadd.s32 %v1152_v31, %v1151_v29  ;;  %v1157_v34 = vadd.s32 %v1156_v32, %v1149_v30 }
0x1045   :  { %v1154_v35 = vrot.slane %v1153_v33, 1  ;;  %v1158_v36 = vrot.slane %v1157_v34, 2 }
0x1047   :  { %v1155_v37 = vadd.s32 %v1154_v35, %v1153_v33  ;;  %v1159_v38 = vadd.s32 %v1158_v36, %v1157_v34 }
0x1049   :  { %v1163_v39 = vshrl.u32 %v1155_v37, 16  ;;  %v1160_v40 = vrot.slane %v1159_v38, 1  ;;  %v1162_v42 = vand.u32 65535, %v1155_v37 }
0x104b   :  { %v1165_v41 = vcvt.s32.f32 %v1163_v39  ;;  %v1161_v43 = vadd.s32 %v1160_v40, %v1159_v38  ;;  %v1164_v45 = vcvt.s32.f32 %v1162_v42 }
0x104d   :  { %1168 = vadd.xlane.f32.xlu0 %v1165_v41  ;;  %v1175_v44 = vshrl.u32 %v1161_v43, 16  ;;  %v1174_v47 = vand.u32 65535, %v1161_v43 }
0x104f   :  { %v1177_v46 = vcvt.s32.f32 %v1175_v44  ;;  %v1176_v48 = vcvt.s32.f32 %v1174_v47 }
0x1051   :  { %1166 = vadd.xlane.f32.xlu0 %v1164_v45  ;;  %1180 = vadd.xlane.f32.xlu1 %v1177_v46 }
0x1055   :  { %1178 = vadd.xlane.f32.xlu1 %v1176_v48 }
0x10da   :  { %v1169_v49 = vpop.xlane.xlu0 %1168 }
0x10db   :  { %v1171_v50 = vcvt.f32.s32 %v1169_v49 }
0x10dd   :  { %v1172_v53 = vshll.u32 %v1171_v50, 16 }
0x10de   :  { %v1167_v51 = vpop.xlane.xlu0 %1166  ;;  %v1181_v52 = vpop.xlane.xlu1 %1180 }
0x10df   :  { %v1170_v54 = vcvt.f32.s32 %v1167_v51  ;;  %v1183_v55 = vcvt.f32.s32 %v1181_v52 }
0x10e1   :  { %v1173_v56 = vadd.s32 %v1172_v53, %v1170_v54  ;;  %v1184_v58 = vshll.u32 %v1183_v55, 16 }
0x10e2   :  { %v1179_v57 = vpop.xlane.xlu1 %1178 }
0x10e3   :  { %vm1186_vm11 = vcmp.le.s32.totalorder %v1173_v56, 165  ;;  %v1182_v59 = vcvt.f32.s32 %v1179_v57 }
0x10e4   :  { %v1188_v60 = vsel %vm1186_vm11, %v1144_v23, %v1142_v22 }
0x10e5   :  { %v1190_v61 = vor.u32 64, %v1188_v60  ;;  %v1185_v62 = vadd.s32 %v1184_v58, %v1182_v59 }
0x10e7   :  { %vm1192_vm12 = vcmp.lt.s32.totalorder %v1771_v11, %v1190_v61  ;;  %vm1187_vm13 = vcmp.le.s32.totalorder %v1185_v62, 165 }
0x10e8   :  { %v1194_v63 = vsel %vm1192_vm12, 1, %v1738_v13  ;;  %v1189_v0 = vsel %vm1187_vm13, %v1145_v27, %v1143_v25 }
0x10e9   :  { %v1196_v1 = vrot.slane %v1194_v63, 4  ;;  %v1191_v2 = vor.u32 64, %v1189_v0 }
0x10eb   :  { %v1197_v3 = vadd.s32 %v1196_v1, %v1194_v63  ;;  %vm1193_vm14 = vcmp.lt.s32.totalorder %v1775_v12, %v1191_v2 }
0x10ec   :  { %v1195_v5 = vsel %vm1193_vm14, 1, %v1738_v13 }
0x10ed   :  { %v1202_v6 = vrot.slane %v1195_v5, 4  ;;  %v1198_v7 = vrot.slane %v1197_v3, 2 }
0x10ef   :  { %v1203_v8 = vadd.s32 %v1202_v6, %v1195_v5  ;;  %v1199_v9 = vadd.s32 %v1198_v7, %v1197_v3 }
0x10f1   :  { %v1200_v10 = vrot.slane %v1199_v9, 1  ;;  %v1204_v14 = vrot.slane %v1203_v8, 2 }
0x10f3   :  { %v1201_v15 = vadd.s32 %v1200_v10, %v1199_v9  ;;  %v1205_v16 = vadd.s32 %v1204_v14, %v1203_v8 }
0x10f5   :  { %v1209_v17 = vshrl.u32 %v1201_v15, 16  ;;  %v1206_v18 = vrot.slane %v1205_v16, 1  ;;  %v1208_v20 = vand.u32 65535, %v1201_v15 }
0x10f7   :  { %v1211_v19 = vcvt.s32.f32 %v1209_v17  ;;  %v1207_v21 = vadd.s32 %v1206_v18, %v1205_v16  ;;  %v1210_v23 = vcvt.s32.f32 %v1208_v20 }
0x10f9   :  { %1214 = vadd.xlane.f32.xlu0 %v1211_v19  ;;  %v1221_v22 = vshrl.u32 %v1207_v21, 16  ;;  %v1220_v25 = vand.u32 65535, %v1207_v21 }
0x10fb   :  { %v1223_v24 = vcvt.s32.f32 %v1221_v22  ;;  %v1222_v26 = vcvt.s32.f32 %v1220_v25 }
0x10fd   :  { %1212 = vadd.xlane.f32.xlu0 %v1210_v23  ;;  %1226 = vadd.xlane.f32.xlu1 %v1223_v24 }
0x1101   :  { %1224 = vadd.xlane.f32.xlu1 %v1222_v26 }
0x1186   :  { %v1215_v27 = vpop.xlane.xlu0 %1214 }
0x1187   :  { %v1217_v28 = vcvt.f32.s32 %v1215_v27 }
0x1189   :  { %v1218_v31 = vshll.u32 %v1217_v28, 16 }
0x118a   :  { %v1213_v29 = vpop.xlane.xlu0 %1212  ;;  %v1227_v30 = vpop.xlane.xlu1 %1226 }
0x118b   :  { %v1216_v32 = vcvt.f32.s32 %v1213_v29  ;;  %v1229_v33 = vcvt.f32.s32 %v1227_v30 }
0x118d   :  { %v1219_v34 = vadd.s32 %v1218_v31, %v1216_v32  ;;  %v1230_v36 = vshll.u32 %v1229_v33, 16 }
0x118e   :  { %v1225_v35 = vpop.xlane.xlu1 %1224 }
0x118f   :  { %vm1232_vm15 = vcmp.le.s32.totalorder %v1219_v34, 165  ;;  %v1228_v37 = vcvt.f32.s32 %v1225_v35 }
0x1190   :  { %v1234_v38 = vsel %vm1232_vm15, %v1190_v61, %v1188_v60 }
0x1191   :  { %v1236_v39 = vor.u32 32, %v1234_v38  ;;  %v1231_v40 = vadd.s32 %v1230_v36, %v1228_v37 }
0x1193   :  { %vm1238_vm0 = vcmp.lt.s32.totalorder %v1771_v11, %v1236_v39  ;;  %vm1233_vm1 = vcmp.le.s32.totalorder %v1231_v40, 165 }
0x1194   :  { %v1240_v41 = vsel %vm1238_vm0, 1, %v1738_v13  ;;  %v1235_v42 = vsel %vm1233_vm1, %v1191_v2, %v1189_v0 }
0x1195   :  { %v1242_v43 = vrot.slane %v1240_v41, 4  ;;  %v1237_v44 = vor.u32 32, %v1235_v42 }
0x1197   :  { %v1243_v45 = vadd.s32 %v1242_v43, %v1240_v41  ;;  %vm1239_vm3 = vcmp.lt.s32.totalorder %v1775_v12, %v1237_v44 }
0x1198   :  { %v1241_v46 = vsel %vm1239_vm3, 1, %v1738_v13 }
0x1199   :  { %v1248_v47 = vrot.slane %v1241_v46, 4  ;;  %v1244_v48 = vrot.slane %v1243_v45, 2 }
0x119b   :  { %v1249_v49 = vadd.s32 %v1248_v47, %v1241_v46  ;;  %v1245_v50 = vadd.s32 %v1244_v48, %v1243_v45 }
0x119d   :  { %v1246_v51 = vrot.slane %v1245_v50, 1  ;;  %v1250_v52 = vrot.slane %v1249_v49, 2 }
0x119f   :  { %v1247_v53 = vadd.s32 %v1246_v51, %v1245_v50  ;;  %v1251_v54 = vadd.s32 %v1250_v52, %v1249_v49 }
0x11a1   :  { %v1255_v55 = vshrl.u32 %v1247_v53, 16  ;;  %v1252_v56 = vrot.slane %v1251_v54, 1  ;;  %v1254_v58 = vand.u32 65535, %v1247_v53 }
0x11a3   :  { %v1257_v57 = vcvt.s32.f32 %v1255_v55  ;;  %v1253_v59 = vadd.s32 %v1252_v56, %v1251_v54  ;;  %v1256_v61 = vcvt.s32.f32 %v1254_v58 }
0x11a5   :  { %1260 = vadd.xlane.f32.xlu0 %v1257_v57  ;;  %v1267_v60 = vshrl.u32 %v1253_v59, 16  ;;  %v1266_v63 = vand.u32 65535, %v1253_v59 }
0x11a7   :  { %v1269_v62 = vcvt.s32.f32 %v1267_v60  ;;  %v1268_v0 = vcvt.s32.f32 %v1266_v63 }
0x11a9   :  { %1258 = vadd.xlane.f32.xlu0 %v1256_v61  ;;  %1272 = vadd.xlane.f32.xlu1 %v1269_v62 }
0x11ad   :  { %1270 = vadd.xlane.f32.xlu1 %v1268_v0 }
0x1232   :  { %v1261_v1 = vpop.xlane.xlu0 %1260 }
0x1233   :  { %v1263_v2 = vcvt.f32.s32 %v1261_v1 }
0x1235   :  { %v1264_v6 = vshll.u32 %v1263_v2, 16 }
0x1236   :  { %v1259_v3 = vpop.xlane.xlu0 %1258  ;;  %v1273_v5 = vpop.xlane.xlu1 %1272 }
0x1237   :  { %v1262_v7 = vcvt.f32.s32 %v1259_v3  ;;  %v1275_v8 = vcvt.f32.s32 %v1273_v5 }
0x1239   :  { %v1265_v9 = vadd.s32 %v1264_v6, %v1262_v7  ;;  %v1276_v14 = vshll.u32 %v1275_v8, 16 }
0x123a   :  { %v1271_v10 = vpop.xlane.xlu1 %1270 }
0x123b   :  { %vm1278_vm4 = vcmp.le.s32.totalorder %v1265_v9, 165  ;;  %v1274_v15 = vcvt.f32.s32 %v1271_v10 }
0x123c   :  { %v1280_v16 = vsel %vm1278_vm4, %v1236_v39, %v1234_v38 }
0x123d   :  { %v1282_v17 = vor.u32 16, %v1280_v16  ;;  %v1277_v18 = vadd.s32 %v1276_v14, %v1274_v15 }
0x123f   :  { %vm1284_vm5 = vcmp.lt.s32.totalorder %v1771_v11, %v1282_v17  ;;  %vm1279_vm6 = vcmp.le.s32.totalorder %v1277_v18, 165 }
0x1240   :  { %v1286_v19 = vsel %vm1284_vm5, 1, %v1738_v13  ;;  %v1281_v20 = vsel %vm1279_vm6, %v1237_v44, %v1235_v42 }
0x1241   :  { %v1288_v21 = vrot.slane %v1286_v19, 4  ;;  %v1283_v22 = vor.u32 16, %v1281_v20 }
0x1243   :  { %v1289_v23 = vadd.s32 %v1288_v21, %v1286_v19  ;;  %vm1285_vm7 = vcmp.lt.s32.totalorder %v1775_v12, %v1283_v22 }
0x1244   :  { %v1287_v24 = vsel %vm1285_vm7, 1, %v1738_v13 }
0x1245   :  { %v1294_v25 = vrot.slane %v1287_v24, 4  ;;  %v1290_v26 = vrot.slane %v1289_v23, 2 }
0x1247   :  { %v1295_v27 = vadd.s32 %v1294_v25, %v1287_v24  ;;  %v1291_v28 = vadd.s32 %v1290_v26, %v1289_v23 }
0x1249   :  { %v1292_v29 = vrot.slane %v1291_v28, 1  ;;  %v1296_v30 = vrot.slane %v1295_v27, 2 }
0x124b   :  { %v1293_v31 = vadd.s32 %v1292_v29, %v1291_v28  ;;  %v1297_v32 = vadd.s32 %v1296_v30, %v1295_v27 }
0x124d   :  { %v1301_v33 = vshrl.u32 %v1293_v31, 16  ;;  %v1298_v34 = vrot.slane %v1297_v32, 1  ;;  %v1300_v36 = vand.u32 65535, %v1293_v31 }
0x124f   :  { %v1303_v35 = vcvt.s32.f32 %v1301_v33  ;;  %v1299_v37 = vadd.s32 %v1298_v34, %v1297_v32  ;;  %v1302_v39 = vcvt.s32.f32 %v1300_v36 }
0x1251   :  { %1306 = vadd.xlane.f32.xlu0 %v1303_v35  ;;  %v1313_v38 = vshrl.u32 %v1299_v37, 16  ;;  %v1312_v41 = vand.u32 65535, %v1299_v37 }
0x1253   :  { %v1315_v40 = vcvt.s32.f32 %v1313_v38  ;;  %v1314_v42 = vcvt.s32.f32 %v1312_v41 }
0x1255   :  { %1304 = vadd.xlane.f32.xlu0 %v1302_v39  ;;  %1318 = vadd.xlane.f32.xlu1 %v1315_v40 }
0x1259   :  { %1316 = vadd.xlane.f32.xlu1 %v1314_v42 }
0x12de   :  { %v1307_v43 = vpop.xlane.xlu0 %1306 }
0x12df   :  { %v1309_v44 = vcvt.f32.s32 %v1307_v43 }
0x12e1   :  { %v1310_v47 = vshll.u32 %v1309_v44, 16 }
0x12e2   :  { %v1305_v45 = vpop.xlane.xlu0 %1304  ;;  %v1319_v46 = vpop.xlane.xlu1 %1318 }
0x12e3   :  { %v1308_v48 = vcvt.f32.s32 %v1305_v45  ;;  %v1321_v49 = vcvt.f32.s32 %v1319_v46 }
0x12e5   :  { %v1311_v50 = vadd.s32 %v1310_v47, %v1308_v48  ;;  %v1322_v52 = vshll.u32 %v1321_v49, 16 }
0x12e6   :  { %v1317_v51 = vpop.xlane.xlu1 %1316 }
0x12e7   :  { %vm1324_vm8 = vcmp.le.s32.totalorder %v1311_v50, 165  ;;  %v1320_v53 = vcvt.f32.s32 %v1317_v51 }
0x12e8   :  { %v1326_v54 = vsel %vm1324_vm8, %v1282_v17, %v1280_v16 }
0x12e9   :  { %v1328_v55 = vor.u32 8, %v1326_v54  ;;  %v1323_v56 = vadd.s32 %v1322_v52, %v1320_v53 }
0x12eb   :  { %vm1330_vm9 = vcmp.lt.s32.totalorder %v1771_v11, %v1328_v55  ;;  %vm1325_vm10 = vcmp.le.s32.totalorder %v1323_v56, 165 }
0x12ec   :  { %v1332_v57 = vsel %vm1330_vm9, 1, %v1738_v13  ;;  %v1327_v58 = vsel %vm1325_vm10, %v1283_v22, %v1281_v20 }
0x12ed   :  { %v1334_v59 = vrot.slane %v1332_v57, 4  ;;  %v1329_v60 = vor.u32 8, %v1327_v58 }
0x12ef   :  { %v1335_v61 = vadd.s32 %v1334_v59, %v1332_v57  ;;  %vm1331_vm11 = vcmp.lt.s32.totalorder %v1775_v12, %v1329_v60 }
0x12f0   :  { %v1333_v62 = vsel %vm1331_vm11, 1, %v1738_v13 }
0x12f1   :  { %v1340_v63 = vrot.slane %v1333_v62, 4  ;;  %v1336_v0 = vrot.slane %v1335_v61, 2 }
0x12f3   :  { %v1341_v1 = vadd.s32 %v1340_v63, %v1333_v62  ;;  %v1337_v2 = vadd.s32 %v1336_v0, %v1335_v61 }
0x12f5   :  { %v1338_v3 = vrot.slane %v1337_v2, 1  ;;  %v1342_v5 = vrot.slane %v1341_v1, 2 }
0x12f7   :  { %v1339_v6 = vadd.s32 %v1338_v3, %v1337_v2  ;;  %v1343_v7 = vadd.s32 %v1342_v5, %v1341_v1 }
0x12f9   :  { %v1347_v8 = vshrl.u32 %v1339_v6, 16  ;;  %v1344_v9 = vrot.slane %v1343_v7, 1  ;;  %v1346_v14 = vand.u32 65535, %v1339_v6 }
0x12fb   :  { %v1349_v10 = vcvt.s32.f32 %v1347_v8  ;;  %v1345_v15 = vadd.s32 %v1344_v9, %v1343_v7  ;;  %v1348_v17 = vcvt.s32.f32 %v1346_v14 }
0x12fd   :  { %1352 = vadd.xlane.f32.xlu0 %v1349_v10  ;;  %v1359_v16 = vshrl.u32 %v1345_v15, 16  ;;  %v1358_v19 = vand.u32 65535, %v1345_v15 }
0x12ff   :  { %v1361_v18 = vcvt.s32.f32 %v1359_v16  ;;  %v1360_v20 = vcvt.s32.f32 %v1358_v19 }
0x1301   :  { %1350 = vadd.xlane.f32.xlu0 %v1348_v17  ;;  %1364 = vadd.xlane.f32.xlu1 %v1361_v18 }
0x1305   :  { %1362 = vadd.xlane.f32.xlu1 %v1360_v20 }
0x138a   :  { %v1353_v21 = vpop.xlane.xlu0 %1352 }
0x138b   :  { %v1355_v22 = vcvt.f32.s32 %v1353_v21 }
0x138d   :  { %v1356_v25 = vshll.u32 %v1355_v22, 16 }
0x138e   :  { %v1351_v23 = vpop.xlane.xlu0 %1350  ;;  %v1365_v24 = vpop.xlane.xlu1 %1364 }
0x138f   :  { %v1354_v26 = vcvt.f32.s32 %v1351_v23  ;;  %v1367_v27 = vcvt.f32.s32 %v1365_v24 }
0x1391   :  { %v1357_v28 = vadd.s32 %v1356_v25, %v1354_v26  ;;  %v1368_v30 = vshll.u32 %v1367_v27, 16 }
0x1392   :  { %v1363_v29 = vpop.xlane.xlu1 %1362 }
0x1393   :  { %vm1370_vm12 = vcmp.le.s32.totalorder %v1357_v28, 165  ;;  %v1366_v31 = vcvt.f32.s32 %v1363_v29 }
0x1394   :  { %v1372_v32 = vsel %vm1370_vm12, %v1328_v55, %v1326_v54 }
0x1395   :  { %v1374_v33 = vor.u32 4, %v1372_v32  ;;  %v1369_v34 = vadd.s32 %v1368_v30, %v1366_v31 }
0x1397   :  { %vm1376_vm13 = vcmp.lt.s32.totalorder %v1771_v11, %v1374_v33  ;;  %vm1371_vm14 = vcmp.le.s32.totalorder %v1369_v34, 165 }
0x1398   :  { %v1378_v35 = vsel %vm1376_vm13, 1, %v1738_v13  ;;  %v1373_v36 = vsel %vm1371_vm14, %v1329_v60, %v1327_v58 }
0x1399   :  { %v1380_v37 = vrot.slane %v1378_v35, 4  ;;  %v1375_v38 = vor.u32 4, %v1373_v36 }
0x139b   :  { %v1381_v39 = vadd.s32 %v1380_v37, %v1378_v35  ;;  %vm1377_vm15 = vcmp.lt.s32.totalorder %v1775_v12, %v1375_v38 }
0x139c   :  { %v1379_v40 = vsel %vm1377_vm15, 1, %v1738_v13 }
0x139d   :  { %v1386_v41 = vrot.slane %v1379_v40, 4  ;;  %v1382_v42 = vrot.slane %v1381_v39, 2 }
0x139f   :  { %v1387_v43 = vadd.s32 %v1386_v41, %v1379_v40  ;;  %v1383_v44 = vadd.s32 %v1382_v42, %v1381_v39 }
0x13a1   :  { %v1384_v45 = vrot.slane %v1383_v44, 1  ;;  %v1388_v46 = vrot.slane %v1387_v43, 2 }
0x13a3   :  { %v1385_v47 = vadd.s32 %v1384_v45, %v1383_v44  ;;  %v1389_v48 = vadd.s32 %v1388_v46, %v1387_v43 }
0x13a5   :  { %v1393_v49 = vshrl.u32 %v1385_v47, 16  ;;  %v1390_v50 = vrot.slane %v1389_v48, 1  ;;  %v1392_v52 = vand.u32 65535, %v1385_v47 }
0x13a7   :  { %v1395_v51 = vcvt.s32.f32 %v1393_v49  ;;  %v1391_v53 = vadd.s32 %v1390_v50, %v1389_v48  ;;  %v1394_v55 = vcvt.s32.f32 %v1392_v52 }
0x13a9   :  { %1398 = vadd.xlane.f32.xlu0 %v1395_v51  ;;  %v1405_v54 = vshrl.u32 %v1391_v53, 16  ;;  %v1404_v57 = vand.u32 65535, %v1391_v53 }
0x13ab   :  { %v1407_v56 = vcvt.s32.f32 %v1405_v54  ;;  %v1406_v58 = vcvt.s32.f32 %v1404_v57 }
0x13ad   :  { %1396 = vadd.xlane.f32.xlu0 %v1394_v55  ;;  %1410 = vadd.xlane.f32.xlu1 %v1407_v56 }
0x13b1   :  { %1408 = vadd.xlane.f32.xlu1 %v1406_v58 }
0x1436   :  { %v1399_v59 = vpop.xlane.xlu0 %1398 }
0x1437   :  { %v1401_v60 = vcvt.f32.s32 %v1399_v59 }
0x1439   :  { %v1402_v63 = vshll.u32 %v1401_v60, 16 }
0x143a   :  { %v1397_v61 = vpop.xlane.xlu0 %1396  ;;  %v1411_v62 = vpop.xlane.xlu1 %1410 }
0x143b   :  { %v1400_v0 = vcvt.f32.s32 %v1397_v61  ;;  %v1413_v1 = vcvt.f32.s32 %v1411_v62 }
0x143d   :  { %v1403_v2 = vadd.s32 %v1402_v63, %v1400_v0  ;;  %v1414_v5 = vshll.u32 %v1413_v1, 16 }
0x143e   :  { %v1409_v3 = vpop.xlane.xlu1 %1408 }
0x143f   :  { %vm1416_vm0 = vcmp.le.s32.totalorder %v1403_v2, 165  ;;  %v1412_v6 = vcvt.f32.s32 %v1409_v3 }
0x1440   :  { %v1418_v7 = vsel %vm1416_vm0, %v1374_v33, %v1372_v32 }
0x1441   :  { %v1420_v8 = vor.u32 2, %v1418_v7  ;;  %v1415_v9 = vadd.s32 %v1414_v5, %v1412_v6 }
0x1443   :  { %vm1422_vm1 = vcmp.lt.s32.totalorder %v1771_v11, %v1420_v8  ;;  %vm1417_vm3 = vcmp.le.s32.totalorder %v1415_v9, 165 }
0x1444   :  { %v1424_v10 = vsel %vm1422_vm1, 1, %v1738_v13  ;;  %v1419_v14 = vsel %vm1417_vm3, %v1375_v38, %v1373_v36 }
0x1445   :  { %v1426_v15 = vrot.slane %v1424_v10, 4  ;;  %v1421_v16 = vor.u32 2, %v1419_v14 }
0x1447   :  { %v1427_v17 = vadd.s32 %v1426_v15, %v1424_v10  ;;  %vm1423_vm4 = vcmp.lt.s32.totalorder %v1775_v12, %v1421_v16 }
0x1448   :  { %v1425_v18 = vsel %vm1423_vm4, 1, %v1738_v13 }
0x1449   :  { %v1432_v19 = vrot.slane %v1425_v18, 4  ;;  %v1428_v20 = vrot.slane %v1427_v17, 2 }
0x144b   :  { %v1433_v21 = vadd.s32 %v1432_v19, %v1425_v18  ;;  %v1429_v22 = vadd.s32 %v1428_v20, %v1427_v17 }
0x144d   :  { %v1430_v23 = vrot.slane %v1429_v22, 1  ;;  %v1434_v24 = vrot.slane %v1433_v21, 2 }
0x144f   :  { %v1431_v25 = vadd.s32 %v1430_v23, %v1429_v22  ;;  %v1435_v26 = vadd.s32 %v1434_v24, %v1433_v21 }
0x1451   :  { %v1439_v27 = vshrl.u32 %v1431_v25, 16  ;;  %v1436_v28 = vrot.slane %v1435_v26, 1  ;;  %v1438_v30 = vand.u32 65535, %v1431_v25 }
0x1453   :  { %v1441_v29 = vcvt.s32.f32 %v1439_v27  ;;  %v1437_v31 = vadd.s32 %v1436_v28, %v1435_v26  ;;  %v1440_v33 = vcvt.s32.f32 %v1438_v30  ;;  %v1908_v28 = vld [vmem:[#allocation2] sm:$0xff] }
0x1455   :  { %1444 = vadd.xlane.f32.xlu0 %v1441_v29  ;;  %v1451_v32 = vshrl.u32 %v1437_v31, 16  ;;  %v1450_v35 = vand.u32 65535, %v1437_v31 }
0x1457   :  { %v1453_v34 = vcvt.s32.f32 %v1451_v32  ;;  %v1452_v36 = vcvt.s32.f32 %v1450_v35 }
0x1459   :  { %1442 = vadd.xlane.f32.xlu0 %v1440_v33  ;;  %1456 = vadd.xlane.f32.xlu1 %v1453_v34 }
0x145d   :  { %1454 = vadd.xlane.f32.xlu1 %v1452_v36 }
0x14e2   :  { %v1445_v37 = vpop.xlane.xlu0 %1444 }
0x14e3   :  { %v1447_v38 = vcvt.f32.s32 %v1445_v37 }
0x14e5   :  { %v1448_v41 = vshll.u32 %v1447_v38, 16 }
0x14e6   :  { %v1443_v39 = vpop.xlane.xlu0 %1442  ;;  %v1457_v40 = vpop.xlane.xlu1 %1456 }
0x14e7   :  { %v1446_v42 = vcvt.f32.s32 %v1443_v39  ;;  %v1459_v43 = vcvt.f32.s32 %v1457_v40 }
0x14e9   :  { %v1449_v44 = vadd.s32 %v1448_v41, %v1446_v42  ;;  %v1460_v46 = vshll.u32 %v1459_v43, 16 }
0x14ea   :  { %v1455_v45 = vpop.xlane.xlu1 %1454 }
0x14eb   :  { %vm1462_vm5 = vcmp.le.s32.totalorder %v1449_v44, 165  ;;  %v1458_v47 = vcvt.f32.s32 %v1455_v45 }
0x14ec   :  { %v1464_v48 = vsel %vm1462_vm5, %v1420_v8, %v1418_v7 }
0x14ed   :  { %v1466_v49 = vor.u32 1, %v1464_v48  ;;  %v1461_v50 = vadd.s32 %v1460_v46, %v1458_v47 }
0x14ef   :  { %vm1468_vm6 = vcmp.lt.s32.totalorder %v1771_v11, %v1466_v49  ;;  %vm1463_vm7 = vcmp.le.s32.totalorder %v1461_v50, 165 }
0x14f0   :  { %v1470_v51 = vsel %vm1468_vm6, 1, %v1738_v13  ;;  %v1465_v52 = vsel %vm1463_vm7, %v1421_v16, %v1419_v14 }
0x14f1   :  { %v1472_v53 = vrot.slane %v1470_v51, 4  ;;  %v1467_v54 = vor.u32 1, %v1465_v52 }
0x14f3   :  { %v1473_v55 = vadd.s32 %v1472_v53, %v1470_v51  ;;  %vm1469_vm8 = vcmp.lt.s32.totalorder %v1775_v12, %v1467_v54 }
0x14f4   :  { %v1471_v56 = vsel %vm1469_vm8, 1, %v1738_v13 }
0x14f5   :  { %v1478_v57 = vrot.slane %v1471_v56, 4  ;;  %v1474_v58 = vrot.slane %v1473_v55, 2 }
0x14f7   :  { %v1479_v59 = vadd.s32 %v1478_v57, %v1471_v56  ;;  %v1475_v60 = vadd.s32 %v1474_v58, %v1473_v55 }
0x14f9   :  { %v1476_v61 = vrot.slane %v1475_v60, 1  ;;  %v1480_v62 = vrot.slane %v1479_v59, 2 }
0x14fb   :  { %v1477_v63 = vadd.s32 %v1476_v61, %v1475_v60  ;;  %v1481_v0 = vadd.s32 %v1480_v62, %v1479_v59 }
0x14fd   :  { %v1485_v1 = vshrl.u32 %v1477_v63, 16  ;;  %v1482_v2 = vrot.slane %v1481_v0, 1  ;;  %v1484_v5 = vand.u32 65535, %v1477_v63 }
0x14ff   :  { %v1487_v3 = vcvt.s32.f32 %v1485_v1  ;;  %v1483_v6 = vadd.s32 %v1482_v2, %v1481_v0  ;;  %v1486_v8 = vcvt.s32.f32 %v1484_v5 }
0x1501   :  { %1490 = vadd.xlane.f32.xlu0 %v1487_v3  ;;  %v1497_v7 = vshrl.u32 %v1483_v6, 16  ;;  %v1496_v10 = vand.u32 65535, %v1483_v6 }
0x1503   :  { %v1499_v9 = vcvt.s32.f32 %v1497_v7  ;;  %v1498_v14 = vcvt.s32.f32 %v1496_v10 }
0x1505   :  { %1488 = vadd.xlane.f32.xlu0 %v1486_v8  ;;  %1502 = vadd.xlane.f32.xlu1 %v1499_v9 }
0x1509   :  { %1500 = vadd.xlane.f32.xlu1 %v1498_v14 }
0x158e   :  { %v1491_v15 = vpop.xlane.xlu0 %1490 }
0x158f   :  { %v1493_v16 = vcvt.f32.s32 %v1491_v15 }
0x1591   :  { %v1494_v19 = vshll.u32 %v1493_v16, 16 }
0x1592   :  { %v1489_v17 = vpop.xlane.xlu0 %1488  ;;  %v1503_v18 = vpop.xlane.xlu1 %1502 }
0x1593   :  { %v1492_v20 = vcvt.f32.s32 %v1489_v17  ;;  %v1505_v21 = vcvt.f32.s32 %v1503_v18 }
0x1595   :  { %v1495_v22 = vadd.s32 %v1494_v19, %v1492_v20  ;;  %v1506_v24 = vshll.u32 %v1505_v21, 16 }
0x1596   :  { %v1501_v23 = vpop.xlane.xlu1 %1500 }
0x1597   :  { %vm1508_vm9 = vcmp.le.s32.totalorder %v1495_v22, 165  ;;  %v1504_v25 = vcvt.f32.s32 %v1501_v23 }
0x1598   :  { %v1510_v26 = vsel %vm1508_vm9, %v1466_v49, %v1464_v48 }
0x1599   :  { %vm1512_vm10 = vcmp.eq.s32.totalorder %v1771_v11, %v1510_v26  ;;  %vm1532_vm11 = vcmp.le.s32.totalorder %v1771_v11, %v1510_v26  ;;  %vm1572_vm12 = vcmp.gt.s32.totalorder %v1771_v11, %v1510_v26  ;;  %v1507_v27 = vadd.s32 %v1506_v24, %v1504_v25  ;;  %v1918_v11 = vld [vmem:[#allocation2 + $0x8] sm:$0xff] }
0x159a   :  { %v1514_v29 = vsel %vm1512_vm10, %v1908_v28, -inf  ;;  %v1534_v30 = vsel %vm1532_vm11, 1, %v1738_v13  ;;  %vm1574_vm13 = vmand %vm1572_vm12, %vm39_vm2 }
0x159b   :  { %v1536_v31 = vrot.slane %v1534_v30, 4  ;;  %vm1509_vm14 = vcmp.le.s32.totalorder %v1507_v27, 165  ;;  %v1516_v32 = vrot.slane %v1514_v29, 4  ;;  %v1576_v34 = vsel %vm1574_vm13, %v1908_v28, inf }
0x159c   :  { %v1511_v33 = vsel %vm1509_vm14, %v1467_v54, %v1465_v52  ;;  %v1578_v41 = vrot.slane %v1576_v34, 4 }
0x159d   :  { %v1537_v35 = vadd.s32 %v1536_v31, %v1534_v30  ;;  %vm1513_vm15 = vcmp.eq.s32.totalorder %v1775_v12, %v1511_v33  ;;  %vm1533_vm0 = vcmp.le.s32.totalorder %v1775_v12, %v1511_v33  ;;  %vm1573_vm1 = vcmp.gt.s32.totalorder %v1775_v12, %v1511_v33 }
0x159e   :  { %v1515_v36 = vsel %vm1513_vm15, %v1918_v11, -inf  ;;  %v1535_v37 = vsel %vm1533_vm0, 1, %v1738_v13  ;;  %vm1575_vm3 = vmand %vm1573_vm1, %vm39_vm2  ;;  %v1517_v40 = vmax.f32 %v1514_v29, %v1516_v32  ;;  %v1579_v48 = vmin.f32 %v1576_v34, %v1578_v41 }
0x159f   :  { %v1542_v38 = vrot.slane %v1535_v37, 4  ;;  %v1538_v39 = vrot.slane %v1537_v35, 2  ;;  %v1522_v42 = vrot.slane %v1515_v36, 4  ;;  %v1577_v45 = vsel %vm1575_vm3, %v1918_v11, inf }
0x15a0   :  { %v1518_v47 = vrot.slane %v1517_v40, 2  ;;  %v1584_v49 = vrot.slane %v1577_v45, 4  ;;  %v1580_v54 = vrot.slane %v1579_v48, 2 }
0x15a1   :  { %v1543_v43 = vadd.s32 %v1542_v38, %v1535_v37  ;;  %v1539_v44 = vadd.s32 %v1538_v39, %v1537_v35  ;;  %v1523_v13 = vmax.f32 %v1515_v36, %v1522_v42  ;;  %v1604_v35 = vrot.slane %v1908_v28, 4 }
0x15a2   :  { %v1519_v53 = vmax.f32 %v1517_v40, %v1518_v47  ;;  %v1585_v55 = vmin.f32 %v1577_v45, %v1584_v49  ;;  %v1581_v62 = vmin.f32 %v1579_v48, %v1580_v54  ;;  %v1610_v42 = vrot.slane %v1918_v11, 4 }
0x15a3   :  { %v1540_v46 = vrot.slane %v1539_v44, 1  ;;  %v1544_v12 = vrot.slane %v1543_v43, 2  ;;  %v1524_v59 = vrot.slane %v1523_v13, 2  ;;  %v1605_v41 = vadd.f32 %v1908_v28, %v1604_v35 }
0x15a4   :  { %v1520_v61 = vrot.slane %v1519_v53, 1  ;;  %v1586_v63 = vrot.slane %v1585_v55, 2  ;;  %v1582_v5 = vrot.slane %v1581_v62, 1  ;;  %v1611_v47 = vadd.f32 %v1918_v11, %v1610_v42 }
0x15a5   :  { %v1541_v50 = vadd.s32 %v1540_v46, %v1539_v44  ;;  %v1545_v51 = vadd.s32 %v1544_v12, %v1543_v43  ;;  %v1525_v3 = vmax.f32 %v1523_v13, %v1524_v59  ;;  %v1606_v12 = vrot.slane %v1605_v41, 2 }
0x15a6   :  { %v1521_v6 = vmax.f32 %v1519_v53, %v1520_v61  ;;  %v1587_v9 = vmin.f32 %v1585_v55, %v1586_v63  ;;  %v1583_v10 = vmin.f32 %v1581_v62, %v1582_v5 }
0x15a7   :  { %v1549_v52 = vshrl.u32 %v1541_v50, 16  ;;  %v1546_v4 = vrot.slane %v1545_v51, 1  ;;  %v1548_v57 = vand.u32 65535, %v1541_v50  ;;  %v1526_v8 = vrot.slane %v1525_v3, 1 }
0x15a8   :  { %v1588_v15 = vrot.slane %v1587_v9, 1  ;;  %v1607_v13 = vadd.f32 %v1606_v12, %v1605_v41 }
0x15a9   :  { %v1551_v56 = vcvt.s32.f32 %v1549_v52  ;;  %v1547_v58 = vadd.s32 %v1546_v4, %v1545_v51  ;;  %v1550_v0 = vcvt.s32.f32 %v1548_v57  ;;  %v1527_v14 = vmax.f32 %v1525_v3, %v1526_v8 }
0x15aa   :  { %v1589_v16 = vmin.f32 %v1587_v9, %v1588_v15  ;;  %v1612_v52 = vrot.slane %v1611_v47, 2 }
0x15ab   :  { %1554 = vadd.xlane.f32.xlu0 %v1551_v56  ;;  %v1561_v60 = vshrl.u32 %v1547_v58, 16  ;;  %v1560_v2 = vand.u32 65535, %v1547_v58  ;;  %v1608_v56 = vrot.slane %v1607_v13, 1 }
0x15ad   :  { %v1563_v1 = vcvt.s32.f32 %v1561_v60  ;;  %v1562_v7 = vcvt.s32.f32 %v1560_v2  ;;  %v1609_v60 = vadd.f32 %v1608_v56, %v1607_v13 }
0x15af   :  { %1552 = vadd.xlane.f32.xlu0 %v1550_v0  ;;  %1566 = vadd.xlane.f32.xlu1 %v1563_v1 }
0x15b3   :  { %1528 = vmax.xlane.f32.xlu0 %v1521_v6  ;;  %1564 = vadd.xlane.f32.xlu1 %v1562_v7 }
0x15b7   :  { %1590 = vmin.xlane.f32.xlu0 %v1583_v10  ;;  %1530 = vmax.xlane.f32.xlu1 %v1527_v14 }
0x15bb   :  { %1592 = vmin.xlane.f32.xlu1 %v1589_v16 }
0x1638   :  { %v1555_v17 = vpop.xlane.xlu0 %1554 }
0x1639   :  { %v1557_v18 = vcvt.f32.s32 %v1555_v17 }
0x163b   :  { %v1558_v22 = vshll.u32 %v1557_v18, 16 }
0x163c   :  { %v1553_v19 = vpop.xlane.xlu0 %1552  ;;  %v1567_v20 = vpop.xlane.xlu1 %1566 }
0x163d   :  { %v1556_v21 = vcvt.f32.s32 %v1553_v19  ;;  %v1569_v23 = vcvt.f32.s32 %v1567_v20 }
0x163f   :  { %v1559_v24 = vadd.s32 %v1558_v22, %v1556_v21  ;;  %v1570_v29 = vshll.u32 %v1569_v23, 16 }
0x1640   :  { %v1529_v25 = vpop.xlane.xlu0 %1528  ;;  %v1565_v26 = vpop.xlane.xlu1 %1564 }
0x1641   :  { %v1568_v27 = vcvt.f32.s32 %v1565_v26  ;;  %vm1594_vm2 = vcmp.ge.s32.totalorder %v1559_v24, 167 }
0x1643   :  { %v1571_v30 = vadd.s32 %v1570_v29, %v1568_v27 }
0x1644   :  { %v1591_v31 = vpop.xlane.xlu0 %1590  ;;  %v1531_v32 = vpop.xlane.xlu1 %1530 }
0x1645   :  { %v1596_v33 = vsel %vm1594_vm2, %v1529_v25, %v1591_v31  ;;  %vm1595_vm4 = vcmp.ge.s32.totalorder %v1571_v30, 167 }
0x1646   :  { %v1598_v34 = vsub.f32 %v1596_v33, %v1529_v25 }
0x1648   :  { %v1600_v36 = vmul.f32 0.75, %v1598_v34  ;;  %v1593_v37 = vpop.xlane.xlu1 %1592 }
0x1649   :  { %v1597_v38 = vsel %vm1595_vm4, %v1531_v32, %v1593_v37 }
0x164a   :  { %v1602_v39 = vadd.f32 %v1600_v36, %v1529_v25  ;;  %v1599_v40 = vsub.f32 %v1597_v38, %v1531_v32 }
0x164c   :  { %vm1620_vm5 = vcmp.gt.f32.partialorder %v1908_v28, %v1602_v39  ;;  %v1601_v43 = vmul.f32 0.75, %v1599_v40 }
0x164d   :  { %v1622_v44 = vsel %vm1620_vm5, %v1908_v28, 0.0  ;;  %v1613_v28 = vadd.f32 %v1612_v52, %v1611_v47 }
0x164e   :  { %v1603_v45 = vadd.f32 %v1601_v43, %v1531_v32  ;;  %v1624_v46 = vrot.slane %v1622_v44, 4 }
0x164f   :  { %v1614_v61 = vrot.slane %v1613_v28, 1 }
0x1650   :  { %vm1621_vm6 = vcmp.gt.f32.partialorder %v1918_v11, %v1603_v45  ;;  %v1625_v48 = vadd.f32 %v1624_v46, %v1622_v44 }
0x1651   :  { %v1623_v49 = vsel %vm1621_vm6, %v1918_v11, 0.0  ;;  %v1615_v11 = vadd.f32 %v1614_v61, %v1613_v28 }
0x1652   :  { %v1626_v50 = vrot.slane %v1625_v48, 2  ;;  %v1630_v51 = vrot.slane %v1623_v49, 4 }
0x1654   :  { %v1627_v4 = vadd.f32 %v1626_v50, %v1625_v48  ;;  %v1631_v53 = vadd.f32 %v1630_v51, %v1623_v49 }
0x1656   :  { %v1628_v54 = vrot.slane %v1627_v4, 1  ;;  %v1632_v55 = vrot.slane %v1631_v53, 2 }
0x1658   :  { %v1629_v57 = vadd.f32 %v1628_v54, %v1627_v4  ;;  %v1633_v58 = vadd.f32 %v1632_v55, %v1631_v53 }
0x165a   :  { %1636 = vadd.xlane.f32.xlu0 %v1629_v57  ;;  %v1634_v59 = vrot.slane %v1633_v58, 1 }
0x165c   :  { %v1635_v62 = vadd.f32 %v1634_v59, %v1633_v58 }
0x165e   :  { %1638 = vadd.xlane.f32.xlu1 %v1635_v62  ;;  %1616 = vadd.xlane.f32.xlu0 %v1609_v60 }
0x1662   :  { %1618 = vadd.xlane.f32.xlu1 %v1615_v11 }
0x16e7   :  { %v1637_v63 = vpop.xlane.xlu0 %1636 }
0x16e8   :  { %v1640_v0 = vadd.f32 1e-06, %v1637_v63 }
0x16ea   :  { %1677 = vrcp.f32 %v1640_v0 }
0x16eb   :  { %v1639_v1 = vpop.xlane.xlu1 %1638  ;;  %v1617_v3 = vpop.xlane.xlu0 %1616 }
0x16ec   :  { %v1641_v2 = vadd.f32 1e-06, %v1639_v1 }
0x16ee   :  { %1679 = vrcp.f32 %v1641_v2 }
0x16ef   :  { %v1619_v7 = vpop.xlane.xlu1 %1618 }
0x16f4   :  { %v1678_v5 = vpop.eup %1677 }
0x16f5   :  { %v1643_v6 = vmul.f32 %v1678_v5, %v1617_v3 }
0x16f7   :  { %v1646_v8 = vmul.f32 1.442695, %v1643_v6 }
0x16f8   :  { %v1680_v9 = vpop.eup %1679 }
0x16f9   :  { %1681 = vpow2.f32 %v1646_v8  ;;  %v1645_v10 = vmul.f32 %v1680_v9, %v1619_v7 }
0x16fb   :  { %v1648_v14 = vmul.f32 1.442695, %v1645_v10 }
0x16fd   :  { %1683 = vpow2.f32 %v1648_v14 }
0x1703   :  { %v1682_v15 = vpop.eup %1681 }
0x1704   :  { %v1650_v16 = vmul.f32 %v1682_v15, %v1622_v44 }
0x1706   :  { %1652 = vst [vmem:[#allocation5] sm:$0xff] %v1650_v16 }
0x1707   :  { %v1684_v17 = vpop.eup %1683 }
0x1708   :  { %v1651_v18 = vmul.f32 %v1684_v17, %v1623_v49 }
0x170a   :  { %1653 = vst [vmem:[#allocation5 + $0x8] sm:$0xff] %v1651_v18 }
0x170b   :  { %1720 = shalt.err (!%p1717_p12)
}
0x170c   :  { %s1721_s24 = scalar_lea.hbm %s1949_s1, 256 }
0x170d   :  { %p1722_p13 = scmp.ne.s32.totalorder %s1949_s1, %s1721_s24  ;;  %p1725_p0 = scmp.lt.u32.totalorder %s1721_s24, %s1949_s1 }
0x170f   :  { %p1727_p1 = pnand %p1725_p0, %p1722_p13 }
0x1711   :  { %1730 = shalt.err (!%p1727_p1)
}
0x1712   :  { %1665 = dma.vmem_to_hbm [thread:$0]  %s1660_s20, 256, %s1949_s1, [#allocation4], %s1736_s16, %s1736_s16, %s1737_s17  }
0x1713   :  { %1733 = dma.done.wait [#allocation4], 256  }
0x1714   :  { %1734 = vsyncadd [#allocation4], 4294967040 }
0x1715   :  { %1669 = vsyncpa [#allocation3], 1 }
0x1716   :  { %1670 = vsyncpa [#allocation4], 1 }

</bundles_post_ra>
